<compile_context>
chip_gen: v7x
topology: tpu7x:2x2x1
jax: 0.10.0
libtpu: 0.0.40
codegen_flags: <defaults>
</compile_context>

<pallas_src>
import functools

import jax
import jax.numpy as jnp
from jax.experimental import pallas as pl
from jax.experimental.pallas import tpu as pltpu

NEG_SLOPE = 0.01      # nn.LeakyReLU default negative_slope
CH1, CH2 = 20, 40     # hidden channel widths (after folding the 1x1 convs)
MARGIN = 2            # frame margin = max 'same' padding in the module (5x5 -> 2)


def _fused_kernel(x_ref, wA_ref, bA_ref, wB_ref, bB_ref, wC_ref, bC_ref,
                  mask_ref, o_ref, fB, fC, *, H, W):
    """Fused conv5x5 -> LReLU -> conv3x3 -> LReLU -> conv3x3 for one batch elem.

    Layout: activations live as (C, NF) bf16 "frames", NF = (H+2a)*Wf + 2a,
    Wf = W + 2a, flattened row-major over a zero-padded (H+2a, Wf) image.
    With this layout the patch for tap (kh, kw) is a pure lane-slice of the
    frame, so each conv is KH*KW small MXU matmuls accumulated in f32 — no
    im2col buffer, no sublane-misaligned copies.
    """
    a = MARGIN
    Wf = W + 2 * a          # framed row width, shared by all layers
    M = H * Wf              # flattened spatial extent the convs are evaluated on
    emb = a * Wf + a        # lane offset of pixel (0, 0) inside a frame
    NF = fB.shape[1]

    # Zero only the top/bottom pad rings of the activation frames.  Interiors
    # [emb, emb+M) are fully rewritten below before being read.  Re-zeroed
    # every grid step (cheap) so this is megacore-safe (see header comment).
    fB[:, 0:emb] = jnp.zeros((fB.shape[0], emb), fB.dtype)
    fB[:, emb + M:NF] = jnp.zeros((fB.shape[0], NF - emb - M), fB.dtype)
    fC[:, 0:emb] = jnp.zeros((fC.shape[0], emb), fC.dtype)
    fC[:, emb + M:NF] = jnp.zeros((fC.shape[0], NF - emb - M), fC.dtype)

    # 1.0 on valid frame columns (w < W of each Wf-wide row), 0.0 on junk cols.
    mask = mask_ref[...]                                  # (1, M) f32

    def conv(read_tap, w_ref, b_ref, ksize, pad, leaky):
        """Per-tap accumulated conv; every tap is a lane-slice, one small matmul."""
        acc = None
        t = 0
        for kh in range(ksize):
            for kw in range(ksize):
                s = (kh - pad + a) * Wf + (kw - pad + a)
                part = jnp.dot(w_ref[t], read_tap(s),
                               preferred_element_type=jnp.float32)
                acc = part if acc is None else acc + part
                t += 1
        y = acc + b_ref[...]
        if leaky:
            y = jnp.where(y > 0, y, NEG_SLOPE * y)
        return y                                          # (Cout_layer, M) f32

    # Input arrives pre-framed (padded + flattened, bf16) from the wrapper.
    xb = x_ref[0]                                         # (Cin, NF) bf16

    # conv5x5(in_ch->20) folded with conv1x1(20->20), + LeakyReLU
    yA = conv(lambda s: xb[:, s:s + M], wA_ref, bA_ref, ksize=5, pad=2, leaky=True)
    fB[:, emb:emb + M] = (yA * mask).astype(fB.dtype)

    # conv3x3(20->20) folded with conv1x1(20->40), + LeakyReLU
    yB = conv(lambda s: fB[:, s:s + M], wB_ref, bB_ref, ksize=3, pad=1, leaky=True)
    fC[:, emb:emb + M] = (yB * mask).astype(fC.dtype)

    # conv3x3(40->out_ch)
    yC = conv(lambda s: fC[:, s:s + M], wC_ref, bC_ref, ksize=3, pad=1, leaky=False)
    o_ref[0, :, :] = yC.astype(o_ref.dtype)


def _prepare_params(params):
    """Fold the 1x1 convs (in f32) into the preceding convs and lay the weights
    out per tap for the kernel.  Cheap; hoist out of the step if called often."""
    (w1, b1), (w2, b2), (w3, b3), (w4, b4), (w5, b5) = params

    w2m = w2[:, :, 0, 0]                                  # (20, 20)
    wA = jnp.einsum("om,mikl->oikl", w2m, w1)             # (20, in_ch, 5, 5)
    bA = w2m @ b1 + b2
    w4m = w4[:, :, 0, 0]                                  # (40, 20)
    wB = jnp.einsum("om,mikl->oikl", w4m, w3)             # (40, 20, 3, 3)
    bB = w4m @ b3 + b4
    wC, bC = w5, b5

    def as_taps(w):  # OIHW -> (KH*KW, O, I) bf16; tap t = kh*KW + kw
        o, i, kh, kw = w.shape
        return jnp.transpose(w, (2, 3, 0, 1)).reshape(kh * kw, o, i).astype(
            jnp.bfloat16)

    def as_col(b):
        return b.reshape(-1, 1).astype(jnp.float32)

    return ((as_taps(wA), as_col(bA)),
            (as_taps(wB), as_col(bB)),
            (as_taps(wC), as_col(bC)))


def down_feature_forward(x_nchw, params):
    """Pallas implementation of down_feature.forward (NCHW in, NCHW out, bf16)."""
    B, Cin, H, W = x_nchw.shape
    (wA, bA), (wB, bB), (wC, bC) = _prepare_params(params)
    Cout = wC.shape[1]

    a = MARGIN
    Wf = W + 2 * a
    M = H * Wf
    NF = (H + 2 * a) * Wf + 2 * a          # frame length incl. max 5x5 tap overrun
    mask = ((jnp.arange(M) % Wf) < W).astype(jnp.float32).reshape(1, M)

    # Wrapper-side framing: 'same' padding + flatten + bf16 cast, all fused by
    # XLA; the BlockSpec DMA then delivers an already-framed bf16 slab.
    x_framed = jnp.pad(x_nchw, ((0, 0), (0, 0), (a, a), (a, a)))
    x_framed = x_framed.reshape(B, Cin, (H + 2 * a) * Wf)
    x_framed = jnp.pad(x_framed, ((0, 0), (0, 0), (0, 2 * a)))
    x_framed = x_framed.astype(jnp.bfloat16)              # (B, Cin, NF)

    kernel = functools.partial(_fused_kernel, H=H, W=W)

    # TODO(synk): at real BIRNAT resolutions (e.g. 256x256) add an H-row grid
    # axis with a 4-row halo (2+1+1 through the three convs) and/or batch-block
    # several images along the lane axis, re-budgeting frames against v7x's
    # 64 MiB VMEM and v5e's scoped limit.  At 16x16 everything is <100 KiB.
    out = pl.pallas_call(
        kernel,
        out_shape=jax.ShapeDtypeStruct((B, Cout, M), jnp.bfloat16),
        grid=(B,),
        in_specs=[
            pl.BlockSpec((1, Cin, NF), lambda b: (b, 0, 0)),
            pl.BlockSpec(wA.shape, lambda b: (0, 0, 0)),
            pl.BlockSpec(bA.shape, lambda b: (0, 0)),
            pl.BlockSpec(wB.shape, lambda b: (0, 0, 0)),
            pl.BlockSpec(bB.shape, lambda b: (0, 0)),
            pl.BlockSpec(wC.shape, lambda b: (0, 0, 0)),
            pl.BlockSpec(bC.shape, lambda b: (0, 0)),
            pl.BlockSpec((1, M), lambda b: (0, 0)),
        ],
        out_specs=pl.BlockSpec((1, Cout, M), lambda b: (b, 0, 0)),
        scratch_shapes=[
            pltpu.VMEM((CH1, NF), jnp.bfloat16),      # frame B (padded act A)
            pltpu.VMEM((CH2, NF), jnp.bfloat16),      # frame C (padded act B)
        ],
        compiler_params=pltpu.CompilerParams(
            dimension_semantics=("parallel",),
            vmem_limit_bytes=32 * 1024 * 1024),
    )(x_framed, wA, bA, wB, bB, wC, bC, mask)

    # Drop the junk frame columns: (B, Cout, H, Wf)[..., :W] -> NCHW output (bf16).
    return out.reshape(B, Cout, H, Wf)[:, :, :, :W]


def init_down_feature_params(key, in_ch, out_ch):
    """Deterministic synthetic parameters matching the PyTorch module shapes."""
    defs = [
        (in_ch, 20, 5),   # Conv2d(in_ch, 20, 5, padding=2)
        (20, 20, 1),      # Conv2d(20, 20, 1)
        (20, 20, 3),      # Conv2d(20, 20, 3, padding=1)
        (20, 40, 1),      # Conv2d(20, 40, 1)
        (40, out_ch, 3),  # Conv2d(40, out_ch, 3, padding=1)
    ]
    params = []
    for cin, cout, k in defs:
        key, kw_, kb_ = jax.random.split(key, 3)
        fan_in = cin * k * k
        scale = 1.0 / jnp.sqrt(jnp.float32(fan_in))
        w = jax.random.uniform(kw_, (cout, cin, k, k), jnp.float32,
                               minval=-scale, maxval=scale)
        b = jax.random.uniform(kb_, (cout,), jnp.float32,
                               minval=-scale, maxval=scale)
        params.append((w, b))
    return params


def down_feature_reference(x_nchw, params):
    """Plain-JAX reference (lax conv, unfolded, f32) for numerical verification."""
    def conv(x, w, b, pad, leaky):
        y = jax.lax.conv_general_dilated(
            x, w, window_strides=(1, 1), padding=[(pad, pad), (pad, pad)],
            dimension_numbers=("NCHW", "OIHW", "NCHW"))
        y = y + b[None, :, None, None]
        if leaky:
            y = jnp.where(y > 0, y, NEG_SLOPE * y)
        return y

    (w1, b1), (w2, b2), (w3, b3), (w4, b4), (w5, b5) = params
    x = conv(x_nchw, w1, b1, 2, False)
    x = conv(x, w2, b2, 0, True)
    x = conv(x, w3, b3, 1, False)
    x = conv(x, w4, b4, 0, True)
    x = conv(x, w5, b5, 1, False)
    return x


if __name__ == "__main__":
    key = jax.random.PRNGKey(0)
    k_x, k_p = jax.random.split(key)

    B, in_ch, H, W = 2, 4, 16, 16
    out_ch = 16

    x = jax.random.normal(k_x, (B, in_ch, H, W), jnp.float32)
    params = init_down_feature_params(k_p, in_ch, out_ch)

    fwd = jax.jit(down_feature_forward)
    out = jax.block_until_ready(fwd(x, params))

    ref = down_feature_reference(x, params)
    assert out.shape == (B, out_ch, H, W), out.shape
    max_err = float(jnp.max(jnp.abs(out.astype(jnp.float32) - ref)))
    # bf16 MXU inputs + folded-1x1 weights cast to bf16 + bf16 output; the error
    # compounds through three layers, so keep this tolerance loose on purpose.
    assert max_err < 4e-2, max_err
    print("KERNEL_OK")
</pallas_src>

<mosaic_0001>
module attributes {stable_mosaic.version = 11 : i64} {
  func.func @_fused_kernel(%arg0: i32, %arg1: memref<1x4x404xbf16, #tpu.memory_space<vmem>>, %arg2: memref<25x20x4xbf16, #tpu.memory_space<vmem>>, %arg3: memref<20x1xf32, #tpu.memory_space<vmem>>, %arg4: memref<9x40x20xbf16, #tpu.memory_space<vmem>>, %arg5: memref<40x1xf32, #tpu.memory_space<vmem>>, %arg6: memref<9x16x40xbf16, #tpu.memory_space<vmem>>, %arg7: memref<16x1xf32, #tpu.memory_space<vmem>>, %arg8: memref<1x320xf32, #tpu.memory_space<vmem>>, %arg9: memref<1x16x320xbf16, #tpu.memory_space<vmem>>, %arg10: memref<20x404xbf16, #tpu.memory_space<vmem>>, %arg11: memref<40x404xbf16, #tpu.memory_space<vmem>>) attributes {dimension_semantics = [#tpu.dimension_semantics<parallel>], iteration_bounds = array<i64: 2>, scalar_prefetch = 0 : i64, scratch_operands = 2 : i64, tpu.core_type = #tpu.core_type<tc>, window_params = [{transform_indices = @transform_0, window_bounds = array<i64: 1, 4, 404>}, {pipeline_mode = #tpu.pipeline_mode<synchronous>, transform_indices = @transform_1, window_bounds = array<i64: 25, 20, 4>}, {pipeline_mode = #tpu.pipeline_mode<synchronous>, transform_indices = @transform_2, window_bounds = array<i64: 20, 1>}, {pipeline_mode = #tpu.pipeline_mode<synchronous>, transform_indices = @transform_3, window_bounds = array<i64: 9, 40, 20>}, {pipeline_mode = #tpu.pipeline_mode<synchronous>, transform_indices = @transform_4, window_bounds = array<i64: 40, 1>}, {pipeline_mode = #tpu.pipeline_mode<synchronous>, transform_indices = @transform_5, window_bounds = array<i64: 9, 16, 40>}, {pipeline_mode = #tpu.pipeline_mode<synchronous>, transform_indices = @transform_6, window_bounds = array<i64: 16, 1>}, {pipeline_mode = #tpu.pipeline_mode<synchronous>, transform_indices = @transform_7, window_bounds = array<i64: 1, 320>}, {transform_indices = @transform_8, window_bounds = array<i64: 1, 16, 320>}]} {
    %cst = arith.constant 0.000000e+00 : bf16
    %0 = vector.broadcast %cst : bf16 to vector<20x42xbf16>
    %c0 = arith.constant 0 : index
    %c0_0 = arith.constant 0 : index
    %1 = vector.load %arg10[%c0, %c0_0] : memref<20x404xbf16, #tpu.memory_space<vmem>>, vector<20x42xbf16>
    tpu.vector_store %arg10[%c0, %c0_0], %0 {strides = array<i32>} : memref<20x404xbf16, #tpu.memory_space<vmem>>, vector<20x42xbf16>,
    %cst_1 = arith.constant 0.000000e+00 : bf16
    %2 = vector.broadcast %cst_1 : bf16 to vector<20x42xbf16>
    %c0_2 = arith.constant 0 : index
    %c362 = arith.constant 362 : index
    %3 = vector.load %arg10[%c0_2, %c362] : memref<20x404xbf16, #tpu.memory_space<vmem>>, vector<20x42xbf16>
    tpu.vector_store %arg10[%c0_2, %c362], %2 {strides = array<i32>} : memref<20x404xbf16, #tpu.memory_space<vmem>>, vector<20x42xbf16>,
    %cst_3 = arith.constant 0.000000e+00 : bf16
    %4 = vector.broadcast %cst_3 : bf16 to vector<40x42xbf16>
    %c0_4 = arith.constant 0 : index
    %c0_5 = arith.constant 0 : index
    %5 = vector.load %arg11[%c0_4, %c0_5] : memref<40x404xbf16, #tpu.memory_space<vmem>>, vector<40x42xbf16>
    tpu.vector_store %arg11[%c0_4, %c0_5], %4 {strides = array<i32>} : memref<40x404xbf16, #tpu.memory_space<vmem>>, vector<40x42xbf16>,
    %cst_6 = arith.constant 0.000000e+00 : bf16
    %6 = vector.broadcast %cst_6 : bf16 to vector<40x42xbf16>
    %c0_7 = arith.constant 0 : index
    %c362_8 = arith.constant 362 : index
    %7 = vector.load %arg11[%c0_7, %c362_8] : memref<40x404xbf16, #tpu.memory_space<vmem>>, vector<40x42xbf16>
    tpu.vector_store %arg11[%c0_7, %c362_8], %6 {strides = array<i32>} : memref<40x404xbf16, #tpu.memory_space<vmem>>, vector<40x42xbf16>,
    %c0_9 = arith.constant 0 : index
    %c0_10 = arith.constant 0 : index
    %8 = vector.load %arg8[%c0_9, %c0_10] : memref<1x320xf32, #tpu.memory_space<vmem>>, vector<1x320xf32>
    %c0_11 = arith.constant 0 : index
    %c0_12 = arith.constant 0 : index
    %c0_13 = arith.constant 0 : index
    %9 = vector.load %arg1[%c0_11, %c0_12, %c0_13] : memref<1x4x404xbf16, #tpu.memory_space<vmem>>, vector<1x4x404xbf16>
    %10 = vector.shape_cast %9 : vector<1x4x404xbf16> to vector<4x404xbf16>
    %c0_14 = arith.constant 0 : index
    %c0_15 = arith.constant 0 : index
    %c0_16 = arith.constant 0 : index
    %11 = vector.load %arg2[%c0_14, %c0_15, %c0_16] : memref<25x20x4xbf16, #tpu.memory_space<vmem>>, vector<1x20x4xbf16>
    %12 = vector.shape_cast %11 : vector<1x20x4xbf16> to vector<20x4xbf16>
    %13 = vector.extract_strided_slice %10 {offsets = [0, 0], sizes = [4, 320], strides = [1, 1]} : vector<4x404xbf16> to vector<4x320xbf16>
    %cst_17 = arith.constant dense<0.000000e+00> : vector<20x320xf32>
    %14 = tpu.matmul %12, %13, %cst_17 {dimension_numbers = #tpu.dot_dimension_numbers<[1], [0], [0], [1], [0, 0, 1, 1], [], []>} : vector<20x4xbf16>, vector<4x320xbf16>, vector<20x320xf32> -> vector<20x320xf32>
    %c1 = arith.constant 1 : index
    %c0_18 = arith.constant 0 : index
    %c0_19 = arith.constant 0 : index
    %15 = vector.load %arg2[%c1, %c0_18, %c0_19] : memref<25x20x4xbf16, #tpu.memory_space<vmem>>, vector<1x20x4xbf16>
    %16 = vector.shape_cast %15 : vector<1x20x4xbf16> to vector<20x4xbf16>
    %17 = vector.extract_strided_slice %10 {offsets = [0, 1], sizes = [4, 320], strides = [1, 1]} : vector<4x404xbf16> to vector<4x320xbf16>
    %cst_20 = arith.constant dense<0.000000e+00> : vector<20x320xf32>
    %18 = tpu.matmul %16, %17, %cst_20 {dimension_numbers = #tpu.dot_dimension_numbers<[1], [0], [0], [1], [0, 0, 1, 1], [], []>} : vector<20x4xbf16>, vector<4x320xbf16>, vector<20x320xf32> -> vector<20x320xf32>
    %19 = arith.addf %14, %18 : vector<20x320xf32>
    %c2 = arith.constant 2 : index
    %c0_21 = arith.constant 0 : index
    %c0_22 = arith.constant 0 : index
    %20 = vector.load %arg2[%c2, %c0_21, %c0_22] : memref<25x20x4xbf16, #tpu.memory_space<vmem>>, vector<1x20x4xbf16>
    %21 = vector.shape_cast %20 : vector<1x20x4xbf16> to vector<20x4xbf16>
    %22 = vector.extract_strided_slice %10 {offsets = [0, 2], sizes = [4, 320], strides = [1, 1]} : vector<4x404xbf16> to vector<4x320xbf16>
    %cst_23 = arith.constant dense<0.000000e+00> : vector<20x320xf32>
    %23 = tpu.matmul %21, %22, %cst_23 {dimension_numbers = #tpu.dot_dimension_numbers<[1], [0], [0], [1], [0, 0, 1, 1], [], []>} : vector<20x4xbf16>, vector<4x320xbf16>, vector<20x320xf32> -> vector<20x320xf32>
    %24 = arith.addf %19, %23 : vector<20x320xf32>
    %c3 = arith.constant 3 : index
    %c0_24 = arith.constant 0 : index
    %c0_25 = arith.constant 0 : index
    %25 = vector.load %arg2[%c3, %c0_24, %c0_25] : memref<25x20x4xbf16, #tpu.memory_space<vmem>>, vector<1x20x4xbf16>
    %26 = vector.shape_cast %25 : vector<1x20x4xbf16> to vector<20x4xbf16>
    %27 = vector.extract_strided_slice %10 {offsets = [0, 3], sizes = [4, 320], strides = [1, 1]} : vector<4x404xbf16> to vector<4x320xbf16>
    %cst_26 = arith.constant dense<0.000000e+00> : vector<20x320xf32>
    %28 = tpu.matmul %26, %27, %cst_26 {dimension_numbers = #tpu.dot_dimension_numbers<[1], [0], [0], [1], [0, 0, 1, 1], [], []>} : vector<20x4xbf16>, vector<4x320xbf16>, vector<20x320xf32> -> vector<20x320xf32>
    %29 = arith.addf %24, %28 : vector<20x320xf32>
    %c4 = arith.constant 4 : index
    %c0_27 = arith.constant 0 : index
    %c0_28 = arith.constant 0 : index
    %30 = vector.load %arg2[%c4, %c0_27, %c0_28] : memref<25x20x4xbf16, #tpu.memory_space<vmem>>, vector<1x20x4xbf16>
    %31 = vector.shape_cast %30 : vector<1x20x4xbf16> to vector<20x4xbf16>
    %32 = vector.extract_strided_slice %10 {offsets = [0, 4], sizes = [4, 320], strides = [1, 1]} : vector<4x404xbf16> to vector<4x320xbf16>
    %cst_29 = arith.constant dense<0.000000e+00> : vector<20x320xf32>
    %33 = tpu.matmul %31, %32, %cst_29 {dimension_numbers = #tpu.dot_dimension_numbers<[1], [0], [0], [1], [0, 0, 1, 1], [], []>} : vector<20x4xbf16>, vector<4x320xbf16>, vector<20x320xf32> -> vector<20x320xf32>
    %34 = arith.addf %29, %33 : vector<20x320xf32>
    %c5 = arith.constant 5 : index
    %c0_30 = arith.constant 0 : index
    %c0_31 = arith.constant 0 : index
    %35 = vector.load %arg2[%c5, %c0_30, %c0_31] : memref<25x20x4xbf16, #tpu.memory_space<vmem>>, vector<1x20x4xbf16>
    %36 = vector.shape_cast %35 : vector<1x20x4xbf16> to vector<20x4xbf16>
    %37 = vector.extract_strided_slice %10 {offsets = [0, 20], sizes = [4, 320], strides = [1, 1]} : vector<4x404xbf16> to vector<4x320xbf16>
    %cst_32 = arith.constant dense<0.000000e+00> : vector<20x320xf32>
    %38 = tpu.matmul %36, %37, %cst_32 {dimension_numbers = #tpu.dot_dimension_numbers<[1], [0], [0], [1], [0, 0, 1, 1], [], []>} : vector<20x4xbf16>, vector<4x320xbf16>, vector<20x320xf32> -> vector<20x320xf32>
    %39 = arith.addf %34, %38 : vector<20x320xf32>
    %c6 = arith.constant 6 : index
    %c0_33 = arith.constant 0 : index
    %c0_34 = arith.constant 0 : index
    %40 = vector.load %arg2[%c6, %c0_33, %c0_34] : memref<25x20x4xbf16, #tpu.memory_space<vmem>>, vector<1x20x4xbf16>
    %41 = vector.shape_cast %40 : vector<1x20x4xbf16> to vector<20x4xbf16>
    %42 = vector.extract_strided_slice %10 {offsets = [0, 21], sizes = [4, 320], strides = [1, 1]} : vector<4x404xbf16> to vector<4x320xbf16>
    %cst_35 = arith.constant dense<0.000000e+00> : vector<20x320xf32>
    %43 = tpu.matmul %41, %42, %cst_35 {dimension_numbers = #tpu.dot_dimension_numbers<[1], [0], [0], [1], [0, 0, 1, 1], [], []>} : vector<20x4xbf16>, vector<4x320xbf16>, vector<20x320xf32> -> vector<20x320xf32>
    %44 = arith.addf %39, %43 : vector<20x320xf32>
    %c7 = arith.constant 7 : index
    %c0_36 = arith.constant 0 : index
    %c0_37 = arith.constant 0 : index
    %45 = vector.load %arg2[%c7, %c0_36, %c0_37] : memref<25x20x4xbf16, #tpu.memory_space<vmem>>, vector<1x20x4xbf16>
    %46 = vector.shape_cast %45 : vector<1x20x4xbf16> to vector<20x4xbf16>
    %47 = vector.extract_strided_slice %10 {offsets = [0, 22], sizes = [4, 320], strides = [1, 1]} : vector<4x404xbf16> to vector<4x320xbf16>
    %cst_38 = arith.constant dense<0.000000e+00> : vector<20x320xf32>
    %48 = tpu.matmul %46, %47, %cst_38 {dimension_numbers = #tpu.dot_dimension_numbers<[1], [0], [0], [1], [0, 0, 1, 1], [], []>} : vector<20x4xbf16>, vector<4x320xbf16>, vector<20x320xf32> -> vector<20x320xf32>
    %49 = arith.addf %44, %48 : vector<20x320xf32>
    %c8 = arith.constant 8 : index
    %c0_39 = arith.constant 0 : index
    %c0_40 = arith.constant 0 : index
    %50 = vector.load %arg2[%c8, %c0_39, %c0_40] : memref<25x20x4xbf16, #tpu.memory_space<vmem>>, vector<1x20x4xbf16>
    %51 = vector.shape_cast %50 : vector<1x20x4xbf16> to vector<20x4xbf16>
    %52 = vector.extract_strided_slice %10 {offsets = [0, 23], sizes = [4, 320], strides = [1, 1]} : vector<4x404xbf16> to vector<4x320xbf16>
    %cst_41 = arith.constant dense<0.000000e+00> : vector<20x320xf32>
    %53 = tpu.matmul %51, %52, %cst_41 {dimension_numbers = #tpu.dot_dimension_numbers<[1], [0], [0], [1], [0, 0, 1, 1], [], []>} : vector<20x4xbf16>, vector<4x320xbf16>, vector<20x320xf32> -> vector<20x320xf32>
    %54 = arith.addf %49, %53 : vector<20x320xf32>
    %c9 = arith.constant 9 : index
    %c0_42 = arith.constant 0 : index
    %c0_43 = arith.constant 0 : index
    %55 = vector.load %arg2[%c9, %c0_42, %c0_43] : memref<25x20x4xbf16, #tpu.memory_space<vmem>>, vector<1x20x4xbf16>
    %56 = vector.shape_cast %55 : vector<1x20x4xbf16> to vector<20x4xbf16>
    %57 = vector.extract_strided_slice %10 {offsets = [0, 24], sizes = [4, 320], strides = [1, 1]} : vector<4x404xbf16> to vector<4x320xbf16>
    %cst_44 = arith.constant dense<0.000000e+00> : vector<20x320xf32>
    %58 = tpu.matmul %56, %57, %cst_44 {dimension_numbers = #tpu.dot_dimension_numbers<[1], [0], [0], [1], [0, 0, 1, 1], [], []>} : vector<20x4xbf16>, vector<4x320xbf16>, vector<20x320xf32> -> vector<20x320xf32>
    %59 = arith.addf %54, %58 : vector<20x320xf32>
    %c10 = arith.constant 10 : index
    %c0_45 = arith.constant 0 : index
    %c0_46 = arith.constant 0 : index
    %60 = vector.load %arg2[%c10, %c0_45, %c0_46] : memref<25x20x4xbf16, #tpu.memory_space<vmem>>, vector<1x20x4xbf16>
    %61 = vector.shape_cast %60 : vector<1x20x4xbf16> to vector<20x4xbf16>
    %62 = vector.extract_strided_slice %10 {offsets = [0, 40], sizes = [4, 320], strides = [1, 1]} : vector<4x404xbf16> to vector<4x320xbf16>
    %cst_47 = arith.constant dense<0.000000e+00> : vector<20x320xf32>
    %63 = tpu.matmul %61, %62, %cst_47 {dimension_numbers = #tpu.dot_dimension_numbers<[1], [0], [0], [1], [0, 0, 1, 1], [], []>} : vector<20x4xbf16>, vector<4x320xbf16>, vector<20x320xf32> -> vector<20x320xf32>
    %64 = arith.addf %59, %63 : vector<20x320xf32>
    %c11 = arith.constant 11 : index
    %c0_48 = arith.constant 0 : index
    %c0_49 = arith.constant 0 : index
    %65 = vector.load %arg2[%c11, %c0_48, %c0_49] : memref<25x20x4xbf16, #tpu.memory_space<vmem>>, vector<1x20x4xbf16>
    %66 = vector.shape_cast %65 : vector<1x20x4xbf16> to vector<20x4xbf16>
    %67 = vector.extract_strided_slice %10 {offsets = [0, 41], sizes = [4, 320], strides = [1, 1]} : vector<4x404xbf16> to vector<4x320xbf16>
    %cst_50 = arith.constant dense<0.000000e+00> : vector<20x320xf32>
    %68 = tpu.matmul %66, %67, %cst_50 {dimension_numbers = #tpu.dot_dimension_numbers<[1], [0], [0], [1], [0, 0, 1, 1], [], []>} : vector<20x4xbf16>, vector<4x320xbf16>, vector<20x320xf32> -> vector<20x320xf32>
    %69 = arith.addf %64, %68 : vector<20x320xf32>
    %c12 = arith.constant 12 : index
    %c0_51 = arith.constant 0 : index
    %c0_52 = arith.constant 0 : index
    %70 = vector.load %arg2[%c12, %c0_51, %c0_52] : memref<25x20x4xbf16, #tpu.memory_space<vmem>>, vector<1x20x4xbf16>
    %71 = vector.shape_cast %70 : vector<1x20x4xbf16> to vector<20x4xbf16>
    %72 = vector.extract_strided_slice %10 {offsets = [0, 42], sizes = [4, 320], strides = [1, 1]} : vector<4x404xbf16> to vector<4x320xbf16>
    %cst_53 = arith.constant dense<0.000000e+00> : vector<20x320xf32>
    %73 = tpu.matmul %71, %72, %cst_53 {dimension_numbers = #tpu.dot_dimension_numbers<[1], [0], [0], [1], [0, 0, 1, 1], [], []>} : vector<20x4xbf16>, vector<4x320xbf16>, vector<20x320xf32> -> vector<20x320xf32>
    %74 = arith.addf %69, %73 : vector<20x320xf32>
    %c13 = arith.constant 13 : index
    %c0_54 = arith.constant 0 : index
    %c0_55 = arith.constant 0 : index
    %75 = vector.load %arg2[%c13, %c0_54, %c0_55] : memref<25x20x4xbf16, #tpu.memory_space<vmem>>, vector<1x20x4xbf16>
    %76 = vector.shape_cast %75 : vector<1x20x4xbf16> to vector<20x4xbf16>
    %77 = vector.extract_strided_slice %10 {offsets = [0, 43], sizes = [4, 320], strides = [1, 1]} : vector<4x404xbf16> to vector<4x320xbf16>
    %cst_56 = arith.constant dense<0.000000e+00> : vector<20x320xf32>
    %78 = tpu.matmul %76, %77, %cst_56 {dimension_numbers = #tpu.dot_dimension_numbers<[1], [0], [0], [1], [0, 0, 1, 1], [], []>} : vector<20x4xbf16>, vector<4x320xbf16>, vector<20x320xf32> -> vector<20x320xf32>
    %79 = arith.addf %74, %78 : vector<20x320xf32>
    %c14 = arith.constant 14 : index
    %c0_57 = arith.constant 0 : index
    %c0_58 = arith.constant 0 : index
    %80 = vector.load %arg2[%c14, %c0_57, %c0_58] : memref<25x20x4xbf16, #tpu.memory_space<vmem>>, vector<1x20x4xbf16>
    %81 = vector.shape_cast %80 : vector<1x20x4xbf16> to vector<20x4xbf16>
    %82 = vector.extract_strided_slice %10 {offsets = [0, 44], sizes = [4, 320], strides = [1, 1]} : vector<4x404xbf16> to vector<4x320xbf16>
    %cst_59 = arith.constant dense<0.000000e+00> : vector<20x320xf32>
    %83 = tpu.matmul %81, %82, %cst_59 {dimension_numbers = #tpu.dot_dimension_numbers<[1], [0], [0], [1], [0, 0, 1, 1], [], []>} : vector<20x4xbf16>, vector<4x320xbf16>, vector<20x320xf32> -> vector<20x320xf32>
    %84 = arith.addf %79, %83 : vector<20x320xf32>
    %c15 = arith.constant 15 : index
    %c0_60 = arith.constant 0 : index
    %c0_61 = arith.constant 0 : index
    %85 = vector.load %arg2[%c15, %c0_60, %c0_61] : memref<25x20x4xbf16, #tpu.memory_space<vmem>>, vector<1x20x4xbf16>
    %86 = vector.shape_cast %85 : vector<1x20x4xbf16> to vector<20x4xbf16>
    %87 = vector.extract_strided_slice %10 {offsets = [0, 60], sizes = [4, 320], strides = [1, 1]} : vector<4x404xbf16> to vector<4x320xbf16>
    %cst_62 = arith.constant dense<0.000000e+00> : vector<20x320xf32>
    %88 = tpu.matmul %86, %87, %cst_62 {dimension_numbers = #tpu.dot_dimension_numbers<[1], [0], [0], [1], [0, 0, 1, 1], [], []>} : vector<20x4xbf16>, vector<4x320xbf16>, vector<20x320xf32> -> vector<20x320xf32>
    %89 = arith.addf %84, %88 : vector<20x320xf32>
    %c16 = arith.constant 16 : index
    %c0_63 = arith.constant 0 : index
    %c0_64 = arith.constant 0 : index
    %90 = vector.load %arg2[%c16, %c0_63, %c0_64] : memref<25x20x4xbf16, #tpu.memory_space<vmem>>, vector<1x20x4xbf16>
    %91 = vector.shape_cast %90 : vector<1x20x4xbf16> to vector<20x4xbf16>
    %92 = vector.extract_strided_slice %10 {offsets = [0, 61], sizes = [4, 320], strides = [1, 1]} : vector<4x404xbf16> to vector<4x320xbf16>
    %cst_65 = arith.constant dense<0.000000e+00> : vector<20x320xf32>
    %93 = tpu.matmul %91, %92, %cst_65 {dimension_numbers = #tpu.dot_dimension_numbers<[1], [0], [0], [1], [0, 0, 1, 1], [], []>} : vector<20x4xbf16>, vector<4x320xbf16>, vector<20x320xf32> -> vector<20x320xf32>
    %94 = arith.addf %89, %93 : vector<20x320xf32>
    %c17 = arith.constant 17 : index
    %c0_66 = arith.constant 0 : index
    %c0_67 = arith.constant 0 : index
    %95 = vector.load %arg2[%c17, %c0_66, %c0_67] : memref<25x20x4xbf16, #tpu.memory_space<vmem>>, vector<1x20x4xbf16>
    %96 = vector.shape_cast %95 : vector<1x20x4xbf16> to vector<20x4xbf16>
    %97 = vector.extract_strided_slice %10 {offsets = [0, 62], sizes = [4, 320], strides = [1, 1]} : vector<4x404xbf16> to vector<4x320xbf16>
    %cst_68 = arith.constant dense<0.000000e+00> : vector<20x320xf32>
    %98 = tpu.matmul %96, %97, %cst_68 {dimension_numbers = #tpu.dot_dimension_numbers<[1], [0], [0], [1], [0, 0, 1, 1], [], []>} : vector<20x4xbf16>, vector<4x320xbf16>, vector<20x320xf32> -> vector<20x320xf32>
    %99 = arith.addf %94, %98 : vector<20x320xf32>
    %c18 = arith.constant 18 : index
    %c0_69 = arith.constant 0 : index
    %c0_70 = arith.constant 0 : index
    %100 = vector.load %arg2[%c18, %c0_69, %c0_70] : memref<25x20x4xbf16, #tpu.memory_space<vmem>>, vector<1x20x4xbf16>
    %101 = vector.shape_cast %100 : vector<1x20x4xbf16> to vector<20x4xbf16>
    %102 = vector.extract_strided_slice %10 {offsets = [0, 63], sizes = [4, 320], strides = [1, 1]} : vector<4x404xbf16> to vector<4x320xbf16>
    %cst_71 = arith.constant dense<0.000000e+00> : vector<20x320xf32>
    %103 = tpu.matmul %101, %102, %cst_71 {dimension_numbers = #tpu.dot_dimension_numbers<[1], [0], [0], [1], [0, 0, 1, 1], [], []>} : vector<20x4xbf16>, vector<4x320xbf16>, vector<20x320xf32> -> vector<20x320xf32>
    %104 = arith.addf %99, %103 : vector<20x320xf32>
    %c19 = arith.constant 19 : index
    %c0_72 = arith.constant 0 : index
    %c0_73 = arith.constant 0 : index
    %105 = vector.load %arg2[%c19, %c0_72, %c0_73] : memref<25x20x4xbf16, #tpu.memory_space<vmem>>, vector<1x20x4xbf16>
    %106 = vector.shape_cast %105 : vector<1x20x4xbf16> to vector<20x4xbf16>
    %107 = vector.extract_strided_slice %10 {offsets = [0, 64], sizes = [4, 320], strides = [1, 1]} : vector<4x404xbf16> to vector<4x320xbf16>
    %cst_74 = arith.constant dense<0.000000e+00> : vector<20x320xf32>
    %108 = tpu.matmul %106, %107, %cst_74 {dimension_numbers = #tpu.dot_dimension_numbers<[1], [0], [0], [1], [0, 0, 1, 1], [], []>} : vector<20x4xbf16>, vector<4x320xbf16>, vector<20x320xf32> -> vector<20x320xf32>
    %109 = arith.addf %104, %108 : vector<20x320xf32>
    %c20 = arith.constant 20 : index
    %c0_75 = arith.constant 0 : index
    %c0_76 = arith.constant 0 : index
    %110 = vector.load %arg2[%c20, %c0_75, %c0_76] : memref<25x20x4xbf16, #tpu.memory_space<vmem>>, vector<1x20x4xbf16>
    %111 = vector.shape_cast %110 : vector<1x20x4xbf16> to vector<20x4xbf16>
    %112 = vector.extract_strided_slice %10 {offsets = [0, 80], sizes = [4, 320], strides = [1, 1]} : vector<4x404xbf16> to vector<4x320xbf16>
    %cst_77 = arith.constant dense<0.000000e+00> : vector<20x320xf32>
    %113 = tpu.matmul %111, %112, %cst_77 {dimension_numbers = #tpu.dot_dimension_numbers<[1], [0], [0], [1], [0, 0, 1, 1], [], []>} : vector<20x4xbf16>, vector<4x320xbf16>, vector<20x320xf32> -> vector<20x320xf32>
    %114 = arith.addf %109, %113 : vector<20x320xf32>
    %c21 = arith.constant 21 : index
    %c0_78 = arith.constant 0 : index
    %c0_79 = arith.constant 0 : index
    %115 = vector.load %arg2[%c21, %c0_78, %c0_79] : memref<25x20x4xbf16, #tpu.memory_space<vmem>>, vector<1x20x4xbf16>
    %116 = vector.shape_cast %115 : vector<1x20x4xbf16> to vector<20x4xbf16>
    %117 = vector.extract_strided_slice %10 {offsets = [0, 81], sizes = [4, 320], strides = [1, 1]} : vector<4x404xbf16> to vector<4x320xbf16>
    %cst_80 = arith.constant dense<0.000000e+00> : vector<20x320xf32>
    %118 = tpu.matmul %116, %117, %cst_80 {dimension_numbers = #tpu.dot_dimension_numbers<[1], [0], [0], [1], [0, 0, 1, 1], [], []>} : vector<20x4xbf16>, vector<4x320xbf16>, vector<20x320xf32> -> vector<20x320xf32>
    %119 = arith.addf %114, %118 : vector<20x320xf32>
    %c22 = arith.constant 22 : index
    %c0_81 = arith.constant 0 : index
    %c0_82 = arith.constant 0 : index
    %120 = vector.load %arg2[%c22, %c0_81, %c0_82] : memref<25x20x4xbf16, #tpu.memory_space<vmem>>, vector<1x20x4xbf16>
    %121 = vector.shape_cast %120 : vector<1x20x4xbf16> to vector<20x4xbf16>
    %122 = vector.extract_strided_slice %10 {offsets = [0, 82], sizes = [4, 320], strides = [1, 1]} : vector<4x404xbf16> to vector<4x320xbf16>
    %cst_83 = arith.constant dense<0.000000e+00> : vector<20x320xf32>
    %123 = tpu.matmul %121, %122, %cst_83 {dimension_numbers = #tpu.dot_dimension_numbers<[1], [0], [0], [1], [0, 0, 1, 1], [], []>} : vector<20x4xbf16>, vector<4x320xbf16>, vector<20x320xf32> -> vector<20x320xf32>
    %124 = arith.addf %119, %123 : vector<20x320xf32>
    %c23 = arith.constant 23 : index
    %c0_84 = arith.constant 0 : index
    %c0_85 = arith.constant 0 : index
    %125 = vector.load %arg2[%c23, %c0_84, %c0_85] : memref<25x20x4xbf16, #tpu.memory_space<vmem>>, vector<1x20x4xbf16>
    %126 = vector.shape_cast %125 : vector<1x20x4xbf16> to vector<20x4xbf16>
    %127 = vector.extract_strided_slice %10 {offsets = [0, 83], sizes = [4, 320], strides = [1, 1]} : vector<4x404xbf16> to vector<4x320xbf16>
    %cst_86 = arith.constant dense<0.000000e+00> : vector<20x320xf32>
    %128 = tpu.matmul %126, %127, %cst_86 {dimension_numbers = #tpu.dot_dimension_numbers<[1], [0], [0], [1], [0, 0, 1, 1], [], []>} : vector<20x4xbf16>, vector<4x320xbf16>, vector<20x320xf32> -> vector<20x320xf32>
    %129 = arith.addf %124, %128 : vector<20x320xf32>
    %c24 = arith.constant 24 : index
    %c0_87 = arith.constant 0 : index
    %c0_88 = arith.constant 0 : index
    %130 = vector.load %arg2[%c24, %c0_87, %c0_88] : memref<25x20x4xbf16, #tpu.memory_space<vmem>>, vector<1x20x4xbf16>
    %131 = vector.shape_cast %130 : vector<1x20x4xbf16> to vector<20x4xbf16>
    %132 = vector.extract_strided_slice %10 {offsets = [0, 84], sizes = [4, 320], strides = [1, 1]} : vector<4x404xbf16> to vector<4x320xbf16>
    %cst_89 = arith.constant dense<0.000000e+00> : vector<20x320xf32>
    %133 = tpu.matmul %131, %132, %cst_89 {dimension_numbers = #tpu.dot_dimension_numbers<[1], [0], [0], [1], [0, 0, 1, 1], [], []>} : vector<20x4xbf16>, vector<4x320xbf16>, vector<20x320xf32> -> vector<20x320xf32>
    %134 = arith.addf %129, %133 : vector<20x320xf32>
    %c0_90 = arith.constant 0 : index
    %c0_91 = arith.constant 0 : index
    %135 = vector.load %arg3[%c0_90, %c0_91] : memref<20x1xf32, #tpu.memory_space<vmem>>, vector<20x1xf32>
    %136 = vector.broadcast %135 : vector<20x1xf32> to vector<20x320xf32>
    %137 = arith.addf %134, %136 : vector<20x320xf32>
    %cst_92 = arith.constant 0.000000e+00 : f32
    %138 = vector.broadcast %cst_92 : f32 to vector<20x320xf32>
    %139 = arith.cmpf ogt, %137, %138 : vector<20x320xf32>
    %cst_93 = arith.constant 0.00999999977 : f32
    %140 = vector.broadcast %cst_93 : f32 to vector<20x320xf32>
    %141 = arith.mulf %140, %137 : vector<20x320xf32>
    %142 = arith.select %139, %137, %141 : vector<20x320xi1>, vector<20x320xf32>
    %143 = vector.broadcast %8 : vector<1x320xf32> to vector<20x320xf32>
    %144 = arith.mulf %142, %143 : vector<20x320xf32>
    %145 = arith.truncf %144 : vector<20x320xf32> to vector<20x320xbf16>
    %c0_94 = arith.constant 0 : index
    %c42 = arith.constant 42 : index
    %146 = vector.load %arg10[%c0_94, %c42] : memref<20x404xbf16, #tpu.memory_space<vmem>>, vector<20x320xbf16>
    tpu.vector_store %arg10[%c0_94, %c42], %145 {strides = array<i32>} : memref<20x404xbf16, #tpu.memory_space<vmem>>, vector<20x320xbf16>,
    %c0_95 = arith.constant 0 : index
    %c0_96 = arith.constant 0 : index
    %c0_97 = arith.constant 0 : index
    %147 = vector.load %arg4[%c0_95, %c0_96, %c0_97] : memref<9x40x20xbf16, #tpu.memory_space<vmem>>, vector<1x40x20xbf16>
    %148 = vector.shape_cast %147 : vector<1x40x20xbf16> to vector<40x20xbf16>
    %c0_98 = arith.constant 0 : index
    %c21_99 = arith.constant 21 : index
    %149 = vector.load %arg10[%c0_98, %c21_99] : memref<20x404xbf16, #tpu.memory_space<vmem>>, vector<20x320xbf16>
    %cst_100 = arith.constant dense<0.000000e+00> : vector<40x320xf32>
    %150 = tpu.matmul %148, %149, %cst_100 {dimension_numbers = #tpu.dot_dimension_numbers<[1], [0], [0], [1], [0, 0, 1, 1], [], []>} : vector<40x20xbf16>, vector<20x320xbf16>, vector<40x320xf32> -> vector<40x320xf32>
    %c1_101 = arith.constant 1 : index
    %c0_102 = arith.constant 0 : index
    %c0_103 = arith.constant 0 : index
    %151 = vector.load %arg4[%c1_101, %c0_102, %c0_103] : memref<9x40x20xbf16, #tpu.memory_space<vmem>>, vector<1x40x20xbf16>
    %152 = vector.shape_cast %151 : vector<1x40x20xbf16> to vector<40x20xbf16>
    %c0_104 = arith.constant 0 : index
    %c22_105 = arith.constant 22 : index
    %153 = vector.load %arg10[%c0_104, %c22_105] : memref<20x404xbf16, #tpu.memory_space<vmem>>, vector<20x320xbf16>
    %cst_106 = arith.constant dense<0.000000e+00> : vector<40x320xf32>
    %154 = tpu.matmul %152, %153, %cst_106 {dimension_numbers = #tpu.dot_dimension_numbers<[1], [0], [0], [1], [0, 0, 1, 1], [], []>} : vector<40x20xbf16>, vector<20x320xbf16>, vector<40x320xf32> -> vector<40x320xf32>
    %155 = arith.addf %150, %154 : vector<40x320xf32>
    %c2_107 = arith.constant 2 : index
    %c0_108 = arith.constant 0 : index
    %c0_109 = arith.constant 0 : index
    %156 = vector.load %arg4[%c2_107, %c0_108, %c0_109] : memref<9x40x20xbf16, #tpu.memory_space<vmem>>, vector<1x40x20xbf16>
    %157 = vector.shape_cast %156 : vector<1x40x20xbf16> to vector<40x20xbf16>
    %c0_110 = arith.constant 0 : index
    %c23_111 = arith.constant 23 : index
    %158 = vector.load %arg10[%c0_110, %c23_111] : memref<20x404xbf16, #tpu.memory_space<vmem>>, vector<20x320xbf16>
    %cst_112 = arith.constant dense<0.000000e+00> : vector<40x320xf32>
    %159 = tpu.matmul %157, %158, %cst_112 {dimension_numbers = #tpu.dot_dimension_numbers<[1], [0], [0], [1], [0, 0, 1, 1], [], []>} : vector<40x20xbf16>, vector<20x320xbf16>, vector<40x320xf32> -> vector<40x320xf32>
    %160 = arith.addf %155, %159 : vector<40x320xf32>
    %c3_113 = arith.constant 3 : index
    %c0_114 = arith.constant 0 : index
    %c0_115 = arith.constant 0 : index
    %161 = vector.load %arg4[%c3_113, %c0_114, %c0_115] : memref<9x40x20xbf16, #tpu.memory_space<vmem>>, vector<1x40x20xbf16>
    %162 = vector.shape_cast %161 : vector<1x40x20xbf16> to vector<40x20xbf16>
    %c0_116 = arith.constant 0 : index
    %c41 = arith.constant 41 : index
    %163 = vector.load %arg10[%c0_116, %c41] : memref<20x404xbf16, #tpu.memory_space<vmem>>, vector<20x320xbf16>
    %cst_117 = arith.constant dense<0.000000e+00> : vector<40x320xf32>
    %164 = tpu.matmul %162, %163, %cst_117 {dimension_numbers = #tpu.dot_dimension_numbers<[1], [0], [0], [1], [0, 0, 1, 1], [], []>} : vector<40x20xbf16>, vector<20x320xbf16>, vector<40x320xf32> -> vector<40x320xf32>
    %165 = arith.addf %160, %164 : vector<40x320xf32>
    %c4_118 = arith.constant 4 : index
    %c0_119 = arith.constant 0 : index
    %c0_120 = arith.constant 0 : index
    %166 = vector.load %arg4[%c4_118, %c0_119, %c0_120] : memref<9x40x20xbf16, #tpu.memory_space<vmem>>, vector<1x40x20xbf16>
    %167 = vector.shape_cast %166 : vector<1x40x20xbf16> to vector<40x20xbf16>
    %c0_121 = arith.constant 0 : index
    %c42_122 = arith.constant 42 : index
    %168 = vector.load %arg10[%c0_121, %c42_122] : memref<20x404xbf16, #tpu.memory_space<vmem>>, vector<20x320xbf16>
    %cst_123 = arith.constant dense<0.000000e+00> : vector<40x320xf32>
    %169 = tpu.matmul %167, %168, %cst_123 {dimension_numbers = #tpu.dot_dimension_numbers<[1], [0], [0], [1], [0, 0, 1, 1], [], []>} : vector<40x20xbf16>, vector<20x320xbf16>, vector<40x320xf32> -> vector<40x320xf32>
    %170 = arith.addf %165, %169 : vector<40x320xf32>
    %c5_124 = arith.constant 5 : index
    %c0_125 = arith.constant 0 : index
    %c0_126 = arith.constant 0 : index
    %171 = vector.load %arg4[%c5_124, %c0_125, %c0_126] : memref<9x40x20xbf16, #tpu.memory_space<vmem>>, vector<1x40x20xbf16>
    %172 = vector.shape_cast %171 : vector<1x40x20xbf16> to vector<40x20xbf16>
    %c0_127 = arith.constant 0 : index
    %c43 = arith.constant 43 : index
    %173 = vector.load %arg10[%c0_127, %c43] : memref<20x404xbf16, #tpu.memory_space<vmem>>, vector<20x320xbf16>
    %cst_128 = arith.constant dense<0.000000e+00> : vector<40x320xf32>
    %174 = tpu.matmul %172, %173, %cst_128 {dimension_numbers = #tpu.dot_dimension_numbers<[1], [0], [0], [1], [0, 0, 1, 1], [], []>} : vector<40x20xbf16>, vector<20x320xbf16>, vector<40x320xf32> -> vector<40x320xf32>
    %175 = arith.addf %170, %174 : vector<40x320xf32>
    %c6_129 = arith.constant 6 : index
    %c0_130 = arith.constant 0 : index
    %c0_131 = arith.constant 0 : index
    %176 = vector.load %arg4[%c6_129, %c0_130, %c0_131] : memref<9x40x20xbf16, #tpu.memory_space<vmem>>, vector<1x40x20xbf16>
    %177 = vector.shape_cast %176 : vector<1x40x20xbf16> to vector<40x20xbf16>
    %c0_132 = arith.constant 0 : index
    %c61 = arith.constant 61 : index
    %178 = vector.load %arg10[%c0_132, %c61] : memref<20x404xbf16, #tpu.memory_space<vmem>>, vector<20x320xbf16>
    %cst_133 = arith.constant dense<0.000000e+00> : vector<40x320xf32>
    %179 = tpu.matmul %177, %178, %cst_133 {dimension_numbers = #tpu.dot_dimension_numbers<[1], [0], [0], [1], [0, 0, 1, 1], [], []>} : vector<40x20xbf16>, vector<20x320xbf16>, vector<40x320xf32> -> vector<40x320xf32>
    %180 = arith.addf %175, %179 : vector<40x320xf32>
    %c7_134 = arith.constant 7 : index
    %c0_135 = arith.constant 0 : index
    %c0_136 = arith.constant 0 : index
    %181 = vector.load %arg4[%c7_134, %c0_135, %c0_136] : memref<9x40x20xbf16, #tpu.memory_space<vmem>>, vector<1x40x20xbf16>
    %182 = vector.shape_cast %181 : vector<1x40x20xbf16> to vector<40x20xbf16>
    %c0_137 = arith.constant 0 : index
    %c62 = arith.constant 62 : index
    %183 = vector.load %arg10[%c0_137, %c62] : memref<20x404xbf16, #tpu.memory_space<vmem>>, vector<20x320xbf16>
    %cst_138 = arith.constant dense<0.000000e+00> : vector<40x320xf32>
    %184 = tpu.matmul %182, %183, %cst_138 {dimension_numbers = #tpu.dot_dimension_numbers<[1], [0], [0], [1], [0, 0, 1, 1], [], []>} : vector<40x20xbf16>, vector<20x320xbf16>, vector<40x320xf32> -> vector<40x320xf32>
    %185 = arith.addf %180, %184 : vector<40x320xf32>
    %c8_139 = arith.constant 8 : index
    %c0_140 = arith.constant 0 : index
    %c0_141 = arith.constant 0 : index
    %186 = vector.load %arg4[%c8_139, %c0_140, %c0_141] : memref<9x40x20xbf16, #tpu.memory_space<vmem>>, vector<1x40x20xbf16>
    %187 = vector.shape_cast %186 : vector<1x40x20xbf16> to vector<40x20xbf16>
    %c0_142 = arith.constant 0 : index
    %c63 = arith.constant 63 : index
    %188 = vector.load %arg10[%c0_142, %c63] : memref<20x404xbf16, #tpu.memory_space<vmem>>, vector<20x320xbf16>
    %cst_143 = arith.constant dense<0.000000e+00> : vector<40x320xf32>
    %189 = tpu.matmul %187, %188, %cst_143 {dimension_numbers = #tpu.dot_dimension_numbers<[1], [0], [0], [1], [0, 0, 1, 1], [], []>} : vector<40x20xbf16>, vector<20x320xbf16>, vector<40x320xf32> -> vector<40x320xf32>
    %190 = arith.addf %185, %189 : vector<40x320xf32>
    %c0_144 = arith.constant 0 : index
    %c0_145 = arith.constant 0 : index
    %191 = vector.load %arg5[%c0_144, %c0_145] : memref<40x1xf32, #tpu.memory_space<vmem>>, vector<40x1xf32>
    %192 = vector.broadcast %191 : vector<40x1xf32> to vector<40x320xf32>
    %193 = arith.addf %190, %192 : vector<40x320xf32>
    %cst_146 = arith.constant 0.000000e+00 : f32
    %194 = vector.broadcast %cst_146 : f32 to vector<40x320xf32>
    %195 = arith.cmpf ogt, %193, %194 : vector<40x320xf32>
    %cst_147 = arith.constant 0.00999999977 : f32
    %196 = vector.broadcast %cst_147 : f32 to vector<40x320xf32>
    %197 = arith.mulf %196, %193 : vector<40x320xf32>
    %198 = arith.select %195, %193, %197 : vector<40x320xi1>, vector<40x320xf32>
    %199 = vector.broadcast %8 : vector<1x320xf32> to vector<40x320xf32>
    %200 = arith.mulf %198, %199 : vector<40x320xf32>
    %201 = arith.truncf %200 : vector<40x320xf32> to vector<40x320xbf16>
    %c0_148 = arith.constant 0 : index
    %c42_149 = arith.constant 42 : index
    %202 = vector.load %arg11[%c0_148, %c42_149] : memref<40x404xbf16, #tpu.memory_space<vmem>>, vector<40x320xbf16>
    tpu.vector_store %arg11[%c0_148, %c42_149], %201 {strides = array<i32>} : memref<40x404xbf16, #tpu.memory_space<vmem>>, vector<40x320xbf16>,
    %c0_150 = arith.constant 0 : index
    %c0_151 = arith.constant 0 : index
    %c0_152 = arith.constant 0 : index
    %203 = vector.load %arg6[%c0_150, %c0_151, %c0_152] : memref<9x16x40xbf16, #tpu.memory_space<vmem>>, vector<1x16x40xbf16>
    %204 = vector.shape_cast %203 : vector<1x16x40xbf16> to vector<16x40xbf16>
    %c0_153 = arith.constant 0 : index
    %c21_154 = arith.constant 21 : index
    %205 = vector.load %arg11[%c0_153, %c21_154] : memref<40x404xbf16, #tpu.memory_space<vmem>>, vector<40x320xbf16>
    %cst_155 = arith.constant dense<0.000000e+00> : vector<16x320xf32>
    %206 = tpu.matmul %204, %205, %cst_155 {dimension_numbers = #tpu.dot_dimension_numbers<[1], [0], [0], [1], [0, 0, 1, 1], [], []>} : vector<16x40xbf16>, vector<40x320xbf16>, vector<16x320xf32> -> vector<16x320xf32>
    %c1_156 = arith.constant 1 : index
    %c0_157 = arith.constant 0 : index
    %c0_158 = arith.constant 0 : index
    %207 = vector.load %arg6[%c1_156, %c0_157, %c0_158] : memref<9x16x40xbf16, #tpu.memory_space<vmem>>, vector<1x16x40xbf16>
    %208 = vector.shape_cast %207 : vector<1x16x40xbf16> to vector<16x40xbf16>
    %c0_159 = arith.constant 0 : index
    %c22_160 = arith.constant 22 : index
    %209 = vector.load %arg11[%c0_159, %c22_160] : memref<40x404xbf16, #tpu.memory_space<vmem>>, vector<40x320xbf16>
    %cst_161 = arith.constant dense<0.000000e+00> : vector<16x320xf32>
    %210 = tpu.matmul %208, %209, %cst_161 {dimension_numbers = #tpu.dot_dimension_numbers<[1], [0], [0], [1], [0, 0, 1, 1], [], []>} : vector<16x40xbf16>, vector<40x320xbf16>, vector<16x320xf32> -> vector<16x320xf32>
    %211 = arith.addf %206, %210 : vector<16x320xf32>
    %c2_162 = arith.constant 2 : index
    %c0_163 = arith.constant 0 : index
    %c0_164 = arith.constant 0 : index
    %212 = vector.load %arg6[%c2_162, %c0_163, %c0_164] : memref<9x16x40xbf16, #tpu.memory_space<vmem>>, vector<1x16x40xbf16>
    %213 = vector.shape_cast %212 : vector<1x16x40xbf16> to vector<16x40xbf16>
    %c0_165 = arith.constant 0 : index
    %c23_166 = arith.constant 23 : index
    %214 = vector.load %arg11[%c0_165, %c23_166] : memref<40x404xbf16, #tpu.memory_space<vmem>>, vector<40x320xbf16>
    %cst_167 = arith.constant dense<0.000000e+00> : vector<16x320xf32>
    %215 = tpu.matmul %213, %214, %cst_167 {dimension_numbers = #tpu.dot_dimension_numbers<[1], [0], [0], [1], [0, 0, 1, 1], [], []>} : vector<16x40xbf16>, vector<40x320xbf16>, vector<16x320xf32> -> vector<16x320xf32>
    %216 = arith.addf %211, %215 : vector<16x320xf32>
    %c3_168 = arith.constant 3 : index
    %c0_169 = arith.constant 0 : index
    %c0_170 = arith.constant 0 : index
    %217 = vector.load %arg6[%c3_168, %c0_169, %c0_170] : memref<9x16x40xbf16, #tpu.memory_space<vmem>>, vector<1x16x40xbf16>
    %218 = vector.shape_cast %217 : vector<1x16x40xbf16> to vector<16x40xbf16>
    %c0_171 = arith.constant 0 : index
    %c41_172 = arith.constant 41 : index
    %219 = vector.load %arg11[%c0_171, %c41_172] : memref<40x404xbf16, #tpu.memory_space<vmem>>, vector<40x320xbf16>
    %cst_173 = arith.constant dense<0.000000e+00> : vector<16x320xf32>
    %220 = tpu.matmul %218, %219, %cst_173 {dimension_numbers = #tpu.dot_dimension_numbers<[1], [0], [0], [1], [0, 0, 1, 1], [], []>} : vector<16x40xbf16>, vector<40x320xbf16>, vector<16x320xf32> -> vector<16x320xf32>
    %221 = arith.addf %216, %220 : vector<16x320xf32>
    %c4_174 = arith.constant 4 : index
    %c0_175 = arith.constant 0 : index
    %c0_176 = arith.constant 0 : index
    %222 = vector.load %arg6[%c4_174, %c0_175, %c0_176] : memref<9x16x40xbf16, #tpu.memory_space<vmem>>, vector<1x16x40xbf16>
    %223 = vector.shape_cast %222 : vector<1x16x40xbf16> to vector<16x40xbf16>
    %c0_177 = arith.constant 0 : index
    %c42_178 = arith.constant 42 : index
    %224 = vector.load %arg11[%c0_177, %c42_178] : memref<40x404xbf16, #tpu.memory_space<vmem>>, vector<40x320xbf16>
    %cst_179 = arith.constant dense<0.000000e+00> : vector<16x320xf32>
    %225 = tpu.matmul %223, %224, %cst_179 {dimension_numbers = #tpu.dot_dimension_numbers<[1], [0], [0], [1], [0, 0, 1, 1], [], []>} : vector<16x40xbf16>, vector<40x320xbf16>, vector<16x320xf32> -> vector<16x320xf32>
    %226 = arith.addf %221, %225 : vector<16x320xf32>
    %c5_180 = arith.constant 5 : index
    %c0_181 = arith.constant 0 : index
    %c0_182 = arith.constant 0 : index
    %227 = vector.load %arg6[%c5_180, %c0_181, %c0_182] : memref<9x16x40xbf16, #tpu.memory_space<vmem>>, vector<1x16x40xbf16>
    %228 = vector.shape_cast %227 : vector<1x16x40xbf16> to vector<16x40xbf16>
    %c0_183 = arith.constant 0 : index
    %c43_184 = arith.constant 43 : index
    %229 = vector.load %arg11[%c0_183, %c43_184] : memref<40x404xbf16, #tpu.memory_space<vmem>>, vector<40x320xbf16>
    %cst_185 = arith.constant dense<0.000000e+00> : vector<16x320xf32>
    %230 = tpu.matmul %228, %229, %cst_185 {dimension_numbers = #tpu.dot_dimension_numbers<[1], [0], [0], [1], [0, 0, 1, 1], [], []>} : vector<16x40xbf16>, vector<40x320xbf16>, vector<16x320xf32> -> vector<16x320xf32>
    %231 = arith.addf %226, %230 : vector<16x320xf32>
    %c6_186 = arith.constant 6 : index
    %c0_187 = arith.constant 0 : index
    %c0_188 = arith.constant 0 : index
    %232 = vector.load %arg6[%c6_186, %c0_187, %c0_188] : memref<9x16x40xbf16, #tpu.memory_space<vmem>>, vector<1x16x40xbf16>
    %233 = vector.shape_cast %232 : vector<1x16x40xbf16> to vector<16x40xbf16>
    %c0_189 = arith.constant 0 : index
    %c61_190 = arith.constant 61 : index
    %234 = vector.load %arg11[%c0_189, %c61_190] : memref<40x404xbf16, #tpu.memory_space<vmem>>, vector<40x320xbf16>
    %cst_191 = arith.constant dense<0.000000e+00> : vector<16x320xf32>
    %235 = tpu.matmul %233, %234, %cst_191 {dimension_numbers = #tpu.dot_dimension_numbers<[1], [0], [0], [1], [0, 0, 1, 1], [], []>} : vector<16x40xbf16>, vector<40x320xbf16>, vector<16x320xf32> -> vector<16x320xf32>
    %236 = arith.addf %231, %235 : vector<16x320xf32>
    %c7_192 = arith.constant 7 : index
    %c0_193 = arith.constant 0 : index
    %c0_194 = arith.constant 0 : index
    %237 = vector.load %arg6[%c7_192, %c0_193, %c0_194] : memref<9x16x40xbf16, #tpu.memory_space<vmem>>, vector<1x16x40xbf16>
    %238 = vector.shape_cast %237 : vector<1x16x40xbf16> to vector<16x40xbf16>
    %c0_195 = arith.constant 0 : index
    %c62_196 = arith.constant 62 : index
    %239 = vector.load %arg11[%c0_195, %c62_196] : memref<40x404xbf16, #tpu.memory_space<vmem>>, vector<40x320xbf16>
    %cst_197 = arith.constant dense<0.000000e+00> : vector<16x320xf32>
    %240 = tpu.matmul %238, %239, %cst_197 {dimension_numbers = #tpu.dot_dimension_numbers<[1], [0], [0], [1], [0, 0, 1, 1], [], []>} : vector<16x40xbf16>, vector<40x320xbf16>, vector<16x320xf32> -> vector<16x320xf32>
    %241 = arith.addf %236, %240 : vector<16x320xf32>
    %c8_198 = arith.constant 8 : index
    %c0_199 = arith.constant 0 : index
    %c0_200 = arith.constant 0 : index
    %242 = vector.load %arg6[%c8_198, %c0_199, %c0_200] : memref<9x16x40xbf16, #tpu.memory_space<vmem>>, vector<1x16x40xbf16>
    %243 = vector.shape_cast %242 : vector<1x16x40xbf16> to vector<16x40xbf16>
    %c0_201 = arith.constant 0 : index
    %c63_202 = arith.constant 63 : index
    %244 = vector.load %arg11[%c0_201, %c63_202] : memref<40x404xbf16, #tpu.memory_space<vmem>>, vector<40x320xbf16>
    %cst_203 = arith.constant dense<0.000000e+00> : vector<16x320xf32>
    %245 = tpu.matmul %243, %244, %cst_203 {dimension_numbers = #tpu.dot_dimension_numbers<[1], [0], [0], [1], [0, 0, 1, 1], [], []>} : vector<16x40xbf16>, vector<40x320xbf16>, vector<16x320xf32> -> vector<16x320xf32>
    %246 = arith.addf %241, %245 : vector<16x320xf32>
    %c0_204 = arith.constant 0 : index
    %c0_205 = arith.constant 0 : index
    %247 = vector.load %arg7[%c0_204, %c0_205] : memref<16x1xf32, #tpu.memory_space<vmem>>, vector<16x1xf32>
    %248 = vector.broadcast %247 : vector<16x1xf32> to vector<16x320xf32>
    %249 = arith.addf %246, %248 : vector<16x320xf32>
    %250 = arith.truncf %249 : vector<16x320xf32> to vector<16x320xbf16>
    %c0_206 = arith.constant 0 : index
    %c0_207 = arith.constant 0 : index
    %c0_208 = arith.constant 0 : index
    %251 = vector.load %arg9[%c0_206, %c0_207, %c0_208] : memref<1x16x320xbf16, #tpu.memory_space<vmem>>, vector<1x16x320xbf16>
    %252 = vector.shape_cast %251 : vector<1x16x320xbf16> to vector<16x320xbf16>
    %253 = vector.shape_cast %250 : vector<16x320xbf16> to vector<1x16x320xbf16>
    tpu.vector_store %arg9[%c0_206, %c0_207, %c0_208], %253 {strides = array<i32>} : memref<1x16x320xbf16, #tpu.memory_space<vmem>>, vector<1x16x320xbf16>,
    return
  }
  func.func @transform_0(%arg0: i32) -> (i32, i32, i32) {
    %c0_i32 = arith.constant 0 : i32
    %c0_i32_0 = arith.constant 0 : i32
    %c0_i32_1 = arith.constant 0 : i32
    return %arg0, %c0_i32, %c0_i32_0 : i32, i32, i32
  }
  func.func @transform_1(%arg0: i32) -> (i32, i32, i32) {
    %c0_i32 = arith.constant 0 : i32
    %c0_i32_0 = arith.constant 0 : i32
    %c0_i32_1 = arith.constant 0 : i32
    %c0_i32_2 = arith.constant 0 : i32
    return %c0_i32, %c0_i32_0, %c0_i32_1 : i32, i32, i32
  }
  func.func @transform_2(%arg0: i32) -> (i32, i32) {
    %c0_i32 = arith.constant 0 : i32
    %c0_i32_0 = arith.constant 0 : i32
    %c0_i32_1 = arith.constant 0 : i32
    return %c0_i32, %c0_i32_0 : i32, i32
  }
  func.func @transform_3(%arg0: i32) -> (i32, i32, i32) {
    %c0_i32 = arith.constant 0 : i32
    %c0_i32_0 = arith.constant 0 : i32
    %c0_i32_1 = arith.constant 0 : i32
    %c0_i32_2 = arith.constant 0 : i32
    return %c0_i32, %c0_i32_0, %c0_i32_1 : i32, i32, i32
  }
  func.func @transform_4(%arg0: i32) -> (i32, i32) {
    %c0_i32 = arith.constant 0 : i32
    %c0_i32_0 = arith.constant 0 : i32
    %c0_i32_1 = arith.constant 0 : i32
    return %c0_i32, %c0_i32_0 : i32, i32
  }
  func.func @transform_5(%arg0: i32) -> (i32, i32, i32) {
    %c0_i32 = arith.constant 0 : i32
    %c0_i32_0 = arith.constant 0 : i32
    %c0_i32_1 = arith.constant 0 : i32
    %c0_i32_2 = arith.constant 0 : i32
    return %c0_i32, %c0_i32_0, %c0_i32_1 : i32, i32, i32
  }
  func.func @transform_6(%arg0: i32) -> (i32, i32) {
    %c0_i32 = arith.constant 0 : i32
    %c0_i32_0 = arith.constant 0 : i32
    %c0_i32_1 = arith.constant 0 : i32
    return %c0_i32, %c0_i32_0 : i32, i32
  }
  func.func @transform_7(%arg0: i32) -> (i32, i32) {
    %c0_i32 = arith.constant 0 : i32
    %c0_i32_0 = arith.constant 0 : i32
    %c0_i32_1 = arith.constant 0 : i32
    return %c0_i32, %c0_i32_0 : i32, i32
  }
  func.func @transform_8(%arg0: i32) -> (i32, i32, i32) {
    %c0_i32 = arith.constant 0 : i32
    %c0_i32_0 = arith.constant 0 : i32
    %c0_i32_1 = arith.constant 0 : i32
    return %arg0, %c0_i32, %c0_i32_0 : i32, i32, i32
  }
}

</mosaic_0001>

<bundles_post_ra>
// kernel: down_feature_forward.1
= control target key start
LH: loop header
LB: loop body
LE: loop exit
PB: predicated region body
PF: predicated region fallthrough
CT: control target
= control target key end

     0   :  { %s8839_s27 = smov 0   ;;  %s11112_s0 = inlined_call_operand.vmem [shape: bf16[2,4,404], index: 0, kind: input, shape index: {}]   ;;  %s11113_s1 = inlined_call_operand.vmem [shape: bf16[25,20,4], index: 1, kind: input, shape index: {}]   ;;  %s11114_s2 = inlined_call_operand.vmem [shape: f32[20,1], index: 2, kind: input, shape index: {}]   ;;  %s11115_s3 = inlined_call_operand.vmem [shape: bf16[9,40,20], index: 3, kind: input, shape index: {}]   ;;  %s11116_s4 = inlined_call_operand.vmem [shape: f32[40,1], index: 4, kind: input, shape index: {}]   ;;  %s11117_s5 = inlined_call_operand.vmem [shape: bf16[9,16,40], index: 5, kind: input, shape index: {}]   ;;  %s11118_s6 = inlined_call_operand.vmem [shape: f32[16,1], index: 6, kind: input, shape index: {}]   ;;  %s11119_s7 = inlined_call_operand.vmem [shape: f32[1,320], index: 7, kind: input, shape index: {}]   ;;  %s11120_s8 = inlined_call_operand.vmem [shape: bf16[2,16,320], index: 8, kind: output, shape index: {}]  }
   0x1 LB: > { %s7371_s28 = sadd.s32 4294967295, %s8763_s27   ;;  %p7375_p0 = scmp.ge.s32.totalorder %s8763_s27, 1  ;;  %s8763_s27 = sphi %s8839_s27, %s18_s27  }
   0x2   : > { %p262_p1 = scmp.lt.s32.totalorder %s8763_s27, 3 }
   0x4   : > { %p263_p2 = pnand %p7375_p0, %p262_p1 }
   0x6   : > { %266 = sbr.rel (%p263_p2) target bundleno = 2154 (0x86a), region = 52 }
   0xd   : > { %p296_p3 = scmp.lt.s32.totalorder %s7371_s28, 1  ;;  %v353_v0 = vlaneseq  ;;  %v8765_v1 = vmov 1983009808   ;;  %v8854_v4 = vld [vmem:[%s11113_s1 + $0xc] sm:$0xff]   ;;  %v11121_v6 = vmov 0   ;;  %vm374_vm0 = vcmask 31744  }
   0xe   : > { %v351_v2 = vunpack.c.l.s4 %v8765_v1  ;;  %423 = vmatprep.mubr.bf16.mxu0 %v11121_v6  ;;  %8661 = vset.pattern.permute.xlu1 %v11121_v6  ;;  %s8767_s13 = smov 127   ;;  %s8768_s14 = smov 126   ;;  %vm381_vm1 = vcmask 1041408   ;;  %vm371_vm2 = vcmask 1039360   ;;  %v8666_v23 = vld [vmem:[%s11113_s1] sm:$0xff]   ;;  %vm630_vm3 = vcmask 1031168  }
   0xf   : > { %s11177_s28 = smov (!%p296_p3, %s7371_s28), 1  ;;  %v8849_v3 = vshrl.u32 %v353_v0, 7  ;;  %8024 = vmatprep.mubr.msk.bf16.mxu1 %vm374_vm0, %v8854_v4  ;;  %8662 = vset.pattern.permute.xlu0 %v11121_v6  ;;  %s8769_s15 = smov 125   ;;  %v8665_v19 = vld [vmem:[%s11113_s1 + $0x14] ss:$0 sps:$4 sm:$0x33]  }
  0x10   : > { %v352_v5 = vunpack.c.0.s8 %v351_v2  ;;  %s7845_s9 = sshll.u32 %s11177_s28, 3  ;;  %s8770_s16 = smov 124   ;;  %v8667_v29 = vld [vmem:[%s11113_s1 + $0x8] ss:$0 sps:$4 sm:$0x33]   ;;  %v9007_v32 = vld [vmem:[%s11113_s1 + $0x18] sm:$0xff]  }
  0x11   : > { %11132 = vst [vmem:[#allocation4_spill] sm:$0xff] %v8849_v3  ;;  %s300_s12 = scalar_lea.vmem %s11112_s0, %s7845_s9  ;;  %s8771_s17 = smov 108   ;;  %v9030_v38 = vld [vmem:[%s11113_s1 + $0x20] ss:$0 sps:$4 sm:$0x33]   ;;  %vm774_vm4 = vcmask 1022976  }
  0x12   : > { %v355_v7 = vsub.s32 %v352_v5, %v8849_v3  ;;  %v332_v8 = vld [vmem:[%s300_s12] sm:$0xff]  ;;  %s8772_s18 = smov 107   ;;  %s8773_s19 = smov 106   ;;  %v9061_v47 = vld [vmem:[%s11113_s1 + $0x2c] ss:$0 sps:$4 sm:$0x33]  }
  0x13   : > { %v349_v10 = vcombine.high %v332_v8, %v332_v8  ;;  %s8774_s20 = smov 105   ;;  %s8775_s21 = smov 104   ;;  %v9037_v41 = vld [vmem:[%s11113_s1 + $0x24] sm:$0xff]   ;;  %v9068_v49 = vld [vmem:[%s11113_s1 + $0x30] sm:$0xff]   ;;  %v9094_v54 = vld [vmem:[%s11113_s1 + $0x3c] sm:$0xff]   ;;  %vm918_vm5 = vcmask 1014784  }
  0x14   : > { %v8866_v9 = vrot.slane %v332_v8, %v355_v7  ;;  %s8776_s22 = smov 88   ;;  %s8777_s23 = smov 87   ;;  %v9089_v53 = vld [vmem:[%s11113_s1 + $0x38] ss:$0 sps:$4 sm:$0x33]   ;;  %v9130_v0 = vld [vmem:[%s11113_s1 + $0x48] sm:$0xff]  }
  0x15   : > { %v8869_v11 = vrot.slane %v349_v10, %v355_v7  ;;  %s8778_s24 = smov 86   ;;  %s8779_s25 = smov 85   ;;  %v9124_v63 = vld [vmem:[%s11113_s1 + $0x44] ss:$0 sps:$4 sm:$0x33]   ;;  %vm1062_vm6 = vcmask 883712  }
  0x16   : > { %365 = vrot.lane.b32.xlu0 %v8866_v9, %s8767_s13  ;;  %v8873_v12 = vcombine.high %v8866_v9, %v8866_v9  ;;  %s8780_s26 = smov 84   ;;  %s8781_s29 = smov 68   ;;  %v505_v24 = vsel %vm381_vm1, %v8866_v9, 0  ;;  %v9154_v8 = vld [vmem:[%s11113_s1 + $0x50] ss:$0 sps:$4 sm:$0x33]  }
  0x17   : > { %369 = vrot.lane.b32.xlu1 %v8869_v11, %s8767_s13  ;;  %s8782_s30 = smov 67   ;;  %s8783_s9 = smov 66   ;;  %v511_v20 = vsel %vm381_vm1, %v8869_v11, 0  ;;  %v3216_v33 = vcombine.high %v8869_v11, %v8869_v11  ;;  %vm1206_vm7 = vcmask 875520   ;;  %vm1350_vm8 = vcmask 867328  }
  0x18   : > { %s8784_s10 = smov 65   ;;  %s8785_s11 = smov 64   ;;  %vm1494_vm9 = vcmask 859136   ;;  %vm1638_vm10 = vcmask 850944   ;;  %vm1782_vm11 = vcmask 719872   ;;  %vm3225_vm12 = vcmask 392192  }
  0x19   : > { %s8786_s12 = smov 48   ;;  %vm1926_vm13 = vcmask 711680   ;;  %vm3372_vm14 = vcmask 384000   ;;  %vm3519_vm15 = vcmask 375808  }
  0x1a   : > { %367 = vrot.lane.b32.xlu0 %v8873_v12, %s8767_s13 }
  0x1b   : > { %624 = vrot.lane.b32.xlu1 %v8866_v9, %s8768_s14 }
  0x1e   : > { %626 = vrot.lane.b32.xlu0 %v8873_v12, %s8768_s14 }
  0x1f   : > { %628 = vrot.lane.b32.xlu1 %v8869_v11, %s8768_s14  ;;  %s8791_s14 = smov 42  }
  0x22   : > { %768 = vrot.lane.b32.xlu0 %v8866_v9, %s8769_s15 }
  0x23   : > { %770 = vrot.lane.b32.xlu1 %v8873_v12, %s8769_s15 }
  0x26   : > { %772 = vrot.lane.b32.xlu0 %v8869_v11, %s8769_s15  ;;  %s8787_s15 = smov 47  }
  0x27   : > { %912 = vrot.lane.b32.xlu1 %v8866_v9, %s8770_s16 }
  0x2a   : > { %914 = vrot.lane.b32.xlu0 %v8873_v12, %s8770_s16 }
  0x2b   : > { %916 = vrot.lane.b32.xlu1 %v8869_v11, %s8770_s16 }
  0x2e   : > { %1056 = vrot.lane.b32.xlu0 %v8866_v9, %s8771_s17 }
  0x2f   : > { %1058 = vrot.lane.b32.xlu1 %v8873_v12, %s8771_s17 }
  0x32   : > { %1060 = vrot.lane.b32.xlu0 %v8869_v11, %s8771_s17 }
  0x33   : > { %1200 = vrot.lane.b32.xlu1 %v8866_v9, %s8772_s18 }
  0x36   : > { %1202 = vrot.lane.b32.xlu0 %v8873_v12, %s8772_s18 }
  0x37   : > { %1204 = vrot.lane.b32.xlu1 %v8869_v11, %s8772_s18 }
  0x3a   : > { %1344 = vrot.lane.b32.xlu0 %v8866_v9, %s8773_s19 }
  0x3b   : > { %1346 = vrot.lane.b32.xlu1 %v8873_v12, %s8773_s19 }
  0x3e   : > { %1348 = vrot.lane.b32.xlu0 %v8869_v11, %s8773_s19 }
  0x3f   : > { %1488 = vrot.lane.b32.xlu1 %v8866_v9, %s8774_s20 }
  0x42   : > { %1490 = vrot.lane.b32.xlu0 %v8873_v12, %s8774_s20 }
  0x43   : > { %1492 = vrot.lane.b32.xlu1 %v8869_v11, %s8774_s20 }
  0x46   : > { %1632 = vrot.lane.b32.xlu0 %v8866_v9, %s8775_s21 }
  0x47   : > { %1634 = vrot.lane.b32.xlu1 %v8873_v12, %s8775_s21 }
  0x4a   : > { %1636 = vrot.lane.b32.xlu0 %v8869_v11, %s8775_s21 }
  0x4b   : > { %1776 = vrot.lane.b32.xlu1 %v8866_v9, %s8776_s22 }
  0x4e   : > { %1778 = vrot.lane.b32.xlu0 %v8873_v12, %s8776_s22 }
  0x4f   : > { %1780 = vrot.lane.b32.xlu1 %v8869_v11, %s8776_s22 }
  0x52   : > { %1920 = vrot.lane.b32.xlu0 %v8866_v9, %s8777_s23 }
  0x53   : > { %1922 = vrot.lane.b32.xlu1 %v8873_v12, %s8777_s23 }
  0x56   : > { %1924 = vrot.lane.b32.xlu0 %v8869_v11, %s8777_s23 }
  0x57   : > { %2064 = vrot.lane.b32.xlu1 %v8866_v9, %s8778_s24 }
  0x5a   : > { %2066 = vrot.lane.b32.xlu0 %v8873_v12, %s8778_s24 }
  0x5b   : > { %2068 = vrot.lane.b32.xlu1 %v8869_v11, %s8778_s24 }
  0x5e   : > { %2208 = vrot.lane.b32.xlu0 %v8866_v9, %s8779_s25 }
  0x5f   : > { %2210 = vrot.lane.b32.xlu1 %v8873_v12, %s8779_s25 }
  0x62   : > { %2212 = vrot.lane.b32.xlu0 %v8869_v11, %s8779_s25 }
  0x63   : > { %2352 = vrot.lane.b32.xlu1 %v8866_v9, %s8780_s26 }
  0x66   : > { %2354 = vrot.lane.b32.xlu0 %v8873_v12, %s8780_s26 }
  0x67   : > { %2356 = vrot.lane.b32.xlu1 %v8869_v11, %s8780_s26  ;;  %s8788_s26 = smov 46  }
  0x6a   : > { %2496 = vrot.lane.b32.xlu0 %v8866_v9, %s8781_s29 }
  0x6b   : > { %2498 = vrot.lane.b32.xlu1 %v8873_v12, %s8781_s29 }
  0x6e   : > { %2500 = vrot.lane.b32.xlu0 %v8869_v11, %s8781_s29 }
  0x6f   : > { %2640 = vrot.lane.b32.xlu1 %v8866_v9, %s8782_s30 }
  0x72   : > { %2642 = vrot.lane.b32.xlu0 %v8873_v12, %s8782_s30 }
  0x73   : > { %2644 = vrot.lane.b32.xlu1 %v8869_v11, %s8782_s30 }
  0x76   : > { %2784 = vrot.lane.b32.xlu0 %v8866_v9, %s8783_s9 }
  0x77   : > { %2786 = vrot.lane.b32.xlu1 %v8873_v12, %s8783_s9 }
  0x7a   : > { %2788 = vrot.lane.b32.xlu0 %v8869_v11, %s8783_s9 }
  0x7b   : > { %2928 = vrot.lane.b32.xlu1 %v8866_v9, %s8784_s10 }
  0x7e   : > { %2930 = vrot.lane.b32.xlu0 %v8873_v12, %s8784_s10 }
  0x7f   : > { %2932 = vrot.lane.b32.xlu1 %v8869_v11, %s8784_s10 }
  0x82   : > { %3072 = vrot.lane.b32.xlu0 %v8866_v9, %s8785_s11 }
  0x83   : > { %3074 = vrot.lane.b32.xlu1 %v8873_v12, %s8785_s11 }
  0x86   : > { %3076 = vrot.lane.b32.xlu0 %v8869_v11, %s8785_s11 }
  0x87   : > { %3217 = vrot.lane.b32.xlu1 %v8866_v9, %s8786_s12 }
  0x88   : > { %v366_v13 = vpop.permute.xlu0 %365 }
  0x89   : > { %v370_v14 = vpop.permute.xlu1 %369 }
  0x8a   : > { %3219 = vrot.lane.b32.xlu0 %v8873_v12, %s8786_s12  ;;  %8598 = vmatprep.subr.msk.bf16.mxu1 %vm381_vm1, %v370_v14  ;;  %v389_v15 = vsel %vm381_vm1, %v370_v14, 0 }
  0x8b   : > { %8023 = vmatpush3.bf16.msra.mxu1 %v389_v15  ;;  %3221 = vrot.lane.b32.xlu1 %v8869_v11, %s8786_s12 }
  0x8c   : > { %v368_v16 = vpop.permute.xlu0 %367  ;;  %8599 = vmatprep.subr.msk.bf16.mxu1 %vm381_vm1, %v8869_v11 }
  0x8d   : > { %v373_v17 = vsel %vm371_vm2, %v368_v16, %v370_v14  ;;  %v372_v18 = vsel %vm371_vm2, %v366_v13, %v368_v16  ;;  %v625_v22 = vpop.permute.xlu1 %624  ;;  %vm2070_vm2 = vcmask 703488  }
  0x8e   : > { %7384 = vmatprep.subr.msk.bf16.mxu0 %vm381_vm1, %v373_v17  ;;  %v383_v21 = vsel %vm381_vm1, %v372_v18, 0  ;;  %3364 = vrot.lane.b32.xlu0 %v8866_v9, %s8787_s15  ;;  %v9190_v18 = vld [vmem:[%s11113_s1 + $0x5c] ss:$0 sps:$4 sm:$0x33]  }
  0x8f   : > { %392 = vmatpush1.bf16.msra.mxu0 %v383_v21  ;;  %8025 = vmatmul.mubr.msk.bf16.vlgmr.msra.gmra.mrb[0].mxu1 %vm374_vm0, %v8665_v19 }
  0x90   : > { %7391 = vmatprep.subr.msk.bf16.mxu0 %vm381_vm1, %v8873_v12  ;;  %v627_v25 = vpop.permute.xlu0 %626  ;;  %8029 = vmatpush3.bf16.msra.mxu1 %v511_v20 }
  0x91   : > { %8030 = vmatprep.mubr.msk.bf16.mxu1 %vm374_vm0, %v8666_v23  ;;  %3366 = vrot.lane.b32.xlu1 %v8873_v12, %s8787_s15  ;;  %v629_v26 = vpop.permute.xlu1 %628  ;;  %v631_v37 = vsel %vm630_vm3, %v625_v22, %v627_v25 }
  0x92   : > { %7385 = vmatmul.mubr.msk.bf16.vlgmr.msra.gmra.mrb[0].mxu0 %vm374_vm0, %v8854_v4  ;;  %3368 = vrot.lane.b32.xlu0 %v8869_v11, %s8787_s15  ;;  %v632_v27 = vsel %vm630_vm3, %v627_v25, %v629_v26  ;;  %v646_v30 = vsel %vm381_vm1, %v629_v26, 0  ;;  %v640_v42 = vsel %vm381_vm1, %v631_v37, 0  ;;  %v9220_v25 = vld [vmem:[%s11113_s1 + $0x68] ss:$0 sps:$4 sm:$0x33]   ;;  %vm3666_vm3 = vcmask 367616  }
  0x93   : > { %514 = vmatpush1.bf16.msra.mxu0 %v505_v24  ;;  %433 = vmatprep.mubr.bf16.mxu0 %v11121_v6 }
  0x94   : > { %7401 = vmatprep.subr.msk.bf16.mxu0 %vm381_vm1, %v632_v27  ;;  %8600 = vmatprep.subr.msk.bf16.mxu1 %vm381_vm1, %v629_v26  ;;  %v8996_v28 = vpop.permute.xlu0 %768  ;;  %v9225_v26 = vld [vmem:[%s11113_s1 + $0x6c] sm:$0xff]  }
  0x95   : > { %3511 = vrot.lane.b32.xlu1 %v8866_v9, %s8788_s26  ;;  %v771_v31 = vpop.permute.xlu1 %770 }
  0x96   : > { %3513 = vrot.lane.b32.xlu0 %v8873_v12, %s8788_s26  ;;  %v775_v56 = vsel %vm774_vm4, %v8996_v28, %v771_v31 }
  0x97   : > { %8031 = vmatmul.mubr.msk.bf16.vlgmr.msra.gmra.mrb[4].mxu1 %vm374_vm0, %v8667_v29  ;;  %v784_v59 = vsel %vm381_vm1, %v775_v56, 0 }
  0x98   : > { %8035 = vmatpush3.bf16.msra.mxu1 %v646_v30  ;;  %v773_v34 = vpop.permute.xlu0 %772  ;;  %8036 = vmatprep.mubr.msk.bf16.mxu1 %vm374_vm0, %v9007_v32 }
  0x99   : > { %8601 = vmatprep.subr.msk.bf16.mxu1 %vm381_vm1, %v773_v34  ;;  %3515 = vrot.lane.b32.xlu1 %v8869_v11, %s8788_s26  ;;  %v9020_v35 = vpop.permute.xlu1 %912  ;;  %v790_v39 = vsel %vm381_vm1, %v773_v34, 0  ;;  %v776_v44 = vsel %vm774_vm4, %v771_v31, %v773_v34  ;;  %vm3813_vm4 = vcmask 359424  }
  0x9a   : > { %7386 = vmatmul.mubr.msk.bf16.gmra.mrb[4].mxu0 %vm374_vm0, %v8665_v19  ;;  %3223 = vrot.lane.b32.xlu0 %v3216_v33, %s8786_s12  ;;  %s8789_s12 = smov 45   ;;  %v9196_v19 = vld [vmem:[%s11113_s1 + $0x60] sm:$0xff]  }
  0x9b   : > { %545 = vmatprep.mubr.bf16.mxu0 %v11121_v6 }
  0x9c   : > { %v9024_v36 = vpop.permute.xlu0 %914 }
  0x9d   : > { %3370 = vrot.lane.b32.xlu1 %v3216_v33, %s8787_s15  ;;  %v917_v40 = vpop.permute.xlu1 %916 }
  0x9e   : > { %3658 = vrot.lane.b32.xlu0 %v8866_v9, %s8789_s12  ;;  %v934_v48 = vsel %vm381_vm1, %v917_v40, 0  ;;  %v920_v61 = vsel %vm918_vm5, %v9024_v36, %v917_v40 }
  0x9f   : > { %8037 = vmatmul.mubr.msk.bf16.vlgmr.msra.gmra.mrb[8].mxu1 %vm374_vm0, %v9030_v38 }
  0xa0   : > { %8041 = vmatpush3.bf16.msra.mxu1 %v790_v39  ;;  %8042 = vmatprep.mubr.msk.bf16.mxu1 %vm374_vm0, %v9037_v41  ;;  %v9045_v43 = vpop.permute.xlu0 %1056 }
  0xa1   : > { %8602 = vmatprep.subr.msk.bf16.mxu1 %vm381_vm1, %v917_v40  ;;  %3660 = vrot.lane.b32.xlu1 %v8873_v12, %s8789_s12  ;;  %v9051_v45 = vpop.permute.xlu1 %1058 }
  0xa2   : > { %7392 = vmatmul.mubr.msk.bf16.vlgmr.msra.gmra.mrb[0].mxu0 %vm374_vm0, %v8666_v23  ;;  %3662 = vrot.lane.b32.xlu0 %v8869_v11, %s8789_s12  ;;  %v1063_v28 = vsel %vm1062_vm6, %v9045_v43, %v9051_v45  ;;  %v9291_v43 = vld [vmem:[%s11113_s1 + $0x84] sm:$0xff]  }
  0xa3   : > { %649 = vmatpush1.bf16.msra.mxu0 %v640_v42  ;;  %555 = vmatprep.mubr.bf16.mxu0 %v11121_v6  ;;  %v1072_v31 = vsel %vm381_vm1, %v1063_v28, 0  ;;  %v9286_v42 = vld [vmem:[%s11113_s1 + $0x80] ss:$0 sps:$4 sm:$0x33]  }
  0xa4   : > { %7411 = vmatprep.subr.msk.bf16.mxu0 %vm381_vm1, %v776_v44  ;;  %v9056_v46 = vpop.permute.xlu0 %1060 }
  0xa5   : > { %3517 = vrot.lane.b32.xlu1 %v3216_v33, %s8788_s26  ;;  %v9070_v50 = vpop.permute.xlu1 %1200  ;;  %s8790_s26 = smov 44   ;;  %v1078_v57 = vsel %vm381_vm1, %v9056_v46, 0  ;;  %v1064_v16 = vsel %vm1062_vm6, %v9051_v45, %v9056_v46  ;;  %vm2358_vm6 = vcmask 687104  }
  0xa6   : > { %3664 = vrot.lane.b32.xlu0 %v3216_v33, %s8789_s12 }
  0xa7   : > { %8043 = vmatmul.mubr.msk.bf16.vlgmr.msra.gmra.mrb[12].mxu1 %vm374_vm0, %v9061_v47 }
  0xa8   : > { %8047 = vmatpush3.bf16.msra.mxu1 %v934_v48  ;;  %8048 = vmatprep.mubr.msk.bf16.mxu1 %vm374_vm0, %v9068_v49  ;;  %v9076_v51 = vpop.permute.xlu0 %1202 }
  0xa9   : > { %8603 = vmatprep.subr.msk.bf16.mxu1 %vm381_vm1, %v9056_v46  ;;  %3805 = vrot.lane.b32.xlu1 %v8866_v9, %s8790_s26  ;;  %v9082_v52 = vpop.permute.xlu1 %1204  ;;  %v9159_v9 = vld [vmem:[%s11113_s1 + $0x54] sm:$0xff]   ;;  %v1207_v45 = vsel %vm1206_vm7, %v9070_v50, %v9076_v51 }
  0xaa   : > { %7393 = vmatmul.mubr.msk.bf16.gmra.mrb[8].mxu0 %vm374_vm0, %v8667_v29  ;;  %3807 = vrot.lane.b32.xlu0 %v8873_v12, %s8790_s26  ;;  %v1222_v2 = vsel %vm381_vm1, %v9082_v52, 0  ;;  %v1216_v48 = vsel %vm381_vm1, %v1207_v45, 0 }
  0xab   : > { %680 = vmatprep.mubr.bf16.mxu0 %v11121_v6 }
  0xac   : > { %v9096_v55 = vpop.permute.xlu0 %1344 }
  0xad   : > { %3809 = vrot.lane.b32.xlu1 %v8869_v11, %s8790_s26  ;;  %v9103_v58 = vpop.permute.xlu1 %1346  ;;  %v919_v11 = vsel %vm918_vm5, %v9020_v35, %v9024_v36  ;;  %v9256_v35 = vld [vmem:[%s11113_s1 + $0x74] ss:$0 sps:$4 sm:$0x33]   ;;  %v9262_v36 = vld [vmem:[%s11113_s1 + $0x78] sm:$0xff]   ;;  %vm2214_vm5 = vcmask 695296  }
  0xae   : > { %3811 = vrot.lane.b32.xlu0 %v3216_v33, %s8790_s26  ;;  %v928_v14 = vsel %vm381_vm1, %v919_v11, 0  ;;  %v1208_v33 = vsel %vm1206_vm7, %v9076_v51, %v9082_v52 }
  0xaf   : > { %8049 = vmatmul.mubr.msk.bf16.vlgmr.msra.gmra.mrb[16].mxu1 %vm374_vm0, %v9089_v53 }
  0xb0   : > { %8053 = vmatpush3.bf16.msra.mxu1 %v1078_v57  ;;  %8054 = vmatprep.mubr.msk.bf16.mxu1 %vm374_vm0, %v9094_v54  ;;  %v9110_v60 = vpop.permute.xlu0 %1348 }
  0xb1   : > { %8604 = vmatprep.subr.msk.bf16.mxu1 %vm381_vm1, %v9082_v52  ;;  %v9118_v62 = vpop.permute.xlu1 %1488  ;;  %v1366_v12 = vsel %vm381_vm1, %v9110_v60, 0  ;;  %v1352_v50 = vsel %vm1350_vm8, %v9103_v58, %v9110_v60  ;;  %v9322_v52 = vld [vmem:[%s11113_s1 + $0x8c] ss:$0 sps:$4 sm:$0x33]  }
  0xb2   : > { %7402 = vmatmul.mubr.msk.bf16.vlgmr.msra.gmra.mrb[0].mxu0 %vm374_vm0, %v9007_v32 }
  0xb3   : > { %793 = vmatpush1.bf16.msra.mxu0 %v784_v59  ;;  %690 = vmatprep.mubr.bf16.mxu0 %v11121_v6 }
  0xb4   : > { %7421 = vmatprep.subr.msk.bf16.mxu0 %vm381_vm1, %v920_v61  ;;  %v9132_v1 = vpop.permute.xlu0 %1490  ;;  %v9352_v61 = vld [vmem:[%s11113_s1 + $0x98] ss:$0 sps:$4 sm:$0x33]  }
  0xb5   : > { %v9136_v4 = vpop.permute.xlu1 %1492  ;;  %v1495_v45 = vsel %vm1494_vm9, %v9118_v62, %v9132_v1 }
  0xb6   : > { %v1510_v21 = vsel %vm381_vm1, %v9136_v4, 0 }
  0xb7   : > { %8055 = vmatmul.mubr.msk.bf16.vlgmr.msra.gmra.mrb[20].mxu1 %vm374_vm0, %v9124_v63 }
  0xb8   : > { %8059 = vmatpush3.bf16.msra.mxu1 %v1222_v2  ;;  %8060 = vmatprep.mubr.msk.bf16.mxu1 %vm374_vm0, %v9130_v0  ;;  %v9142_v5 = vpop.permute.xlu0 %1632  ;;  %v9357_v2 = vld [vmem:[%s11113_s1 + $0x9c] sm:$0xff]  }
  0xb9   : > { %8605 = vmatprep.subr.msk.bf16.mxu1 %vm381_vm1, %v9110_v60  ;;  %v9148_v7 = vpop.permute.xlu1 %1634 }
  0xba   : > { %7403 = vmatmul.mubr.msk.bf16.gmra.mrb[12].mxu0 %vm374_vm0, %v9030_v38 }
  0xbb   : > { %824 = vmatprep.mubr.bf16.mxu0 %v11121_v6 }
  0xbc   : > { %v9161_v10 = vpop.permute.xlu0 %1636 }
  0xbd   : > { %v9168_v13 = vpop.permute.xlu1 %1776  ;;  %v1654_v29 = vsel %vm381_vm1, %v9161_v10, 0 }
  0xbf   : > { %8061 = vmatmul.mubr.msk.bf16.vlgmr.msra.gmra.mrb[24].mxu1 %vm374_vm0, %v9154_v8 }
  0xc0   : > { %8065 = vmatpush3.bf16.msra.mxu1 %v1366_v12  ;;  %8066 = vmatprep.mubr.msk.bf16.mxu1 %vm374_vm0, %v9159_v9  ;;  %v9175_v15 = vpop.permute.xlu0 %1778 }
  0xc1   : > { %8606 = vmatprep.subr.msk.bf16.mxu1 %vm381_vm1, %v9136_v4  ;;  %v9184_v17 = vpop.permute.xlu1 %1780 }
  0xc2   : > { %7412 = vmatmul.mubr.msk.bf16.vlgmr.msra.gmra.mrb[0].mxu0 %vm374_vm0, %v9037_v41  ;;  %v1798_v38 = vsel %vm381_vm1, %v9184_v17, 0 }
  0xc3   : > { %937 = vmatpush1.bf16.msra.mxu0 %v928_v14  ;;  %834 = vmatprep.mubr.bf16.mxu0 %v11121_v6 }
  0xc4   : > { %7431 = vmatprep.subr.msk.bf16.mxu0 %vm381_vm1, %v1064_v16  ;;  %v9198_v20 = vpop.permute.xlu0 %1920 }
  0xc5   : > { %v9202_v22 = vpop.permute.xlu1 %1922 }
  0xc7   : > { %8067 = vmatmul.mubr.msk.bf16.vlgmr.msra.gmra.mrb[28].mxu1 %vm374_vm0, %v9190_v18 }
  0xc8   : > { %8071 = vmatpush3.bf16.msra.mxu1 %v1510_v21  ;;  %8072 = vmatprep.mubr.msk.bf16.mxu1 %vm374_vm0, %v9196_v19  ;;  %v9208_v23 = vpop.permute.xlu0 %1924  ;;  %v1496_v21 = vsel %vm1494_vm9, %v9132_v1, %v9136_v4  ;;  %v9392_v4 = vld [vmem:[%s11113_s1 + $0xa8] sm:$0xff]   ;;  %v9446_v1 = vld [vmem:[%s11113_s1 + $0xbc] ss:$0 sps:$4 sm:$0x33]  }
  0xc9   : > { %8607 = vmatprep.subr.msk.bf16.mxu1 %vm381_vm1, %v9161_v10  ;;  %v9214_v24 = vpop.permute.xlu1 %2064  ;;  %v1942_v46 = vsel %vm381_vm1, %v9208_v23, 0 }
  0xca   : > { %7413 = vmatmul.mubr.msk.bf16.gmra.mrb[16].mxu0 %vm374_vm0, %v9061_v47 }
  0xcb   : > { %968 = vmatprep.mubr.bf16.mxu0 %v11121_v6 }
  0xcc   : > { %v9227_v27 = vpop.permute.xlu0 %2066 }
  0xcd   : > { %v9234_v30 = vpop.permute.xlu1 %2068 }
  0xcf   : > { %8073 = vmatmul.mubr.msk.bf16.vlgmr.msra.gmra.mrb[32].mxu1 %vm374_vm0, %v9220_v25 }
  0xd0   : > { %8077 = vmatpush3.bf16.msra.mxu1 %v1654_v29  ;;  %8078 = vmatprep.mubr.msk.bf16.mxu1 %vm374_vm0, %v9225_v26  ;;  %v9241_v32 = vpop.permute.xlu0 %2208 }
  0xd1   : > { %8608 = vmatprep.subr.msk.bf16.mxu1 %vm381_vm1, %v9184_v17  ;;  %v9250_v34 = vpop.permute.xlu1 %2210 }
  0xd2   : > { %7422 = vmatmul.mubr.msk.bf16.vlgmr.msra.gmra.mrb[0].mxu0 %vm374_vm0, %v9068_v49 }
  0xd3   : > { %1081 = vmatpush1.bf16.msra.mxu0 %v1072_v31  ;;  %978 = vmatprep.mubr.bf16.mxu0 %v11121_v6  ;;  %v9412_v31 = vld [vmem:[%s11113_s1 + $0xb0] ss:$0 sps:$4 sm:$0x33]  }
  0xd4   : > { %7441 = vmatprep.subr.msk.bf16.mxu0 %vm381_vm1, %v1208_v33  ;;  %v9264_v37 = vpop.permute.xlu0 %2212 }
  0xd5   : > { %v9268_v39 = vpop.permute.xlu1 %2352  ;;  %v2230_v12 = vsel %vm381_vm1, %v9264_v37, 0 }
  0xd7   : > { %8079 = vmatmul.mubr.msk.bf16.vlgmr.msra.gmra.mrb[36].mxu1 %vm374_vm0, %v9256_v35 }
  0xd8   : > { %8083 = vmatpush3.bf16.msra.mxu1 %v1798_v38  ;;  %8084 = vmatprep.mubr.msk.bf16.mxu1 %vm374_vm0, %v9262_v36  ;;  %v9274_v40 = vpop.permute.xlu0 %2354  ;;  %v9419_v38 = vld [vmem:[%s11113_s1 + $0xb4] sm:$0xff]  }
  0xd9   : > { %8609 = vmatprep.subr.msk.bf16.mxu1 %vm381_vm1, %v9208_v23  ;;  %v9280_v41 = vpop.permute.xlu1 %2356 }
  0xda   : > { %7423 = vmatmul.mubr.msk.bf16.gmra.mrb[20].mxu0 %vm374_vm0, %v9089_v53  ;;  %v9328_v53 = vld [vmem:[%s11113_s1 + $0x90] sm:$0xff]   ;;  %v2374_v28 = vsel %vm381_vm1, %v9280_v41, 0 }
  0xdb   : > { %1112 = vmatprep.mubr.bf16.mxu0 %v11121_v6 }
  0xdc   : > { %v9293_v44 = vpop.permute.xlu0 %2496 }
  0xdd   : > { %v9300_v47 = vpop.permute.xlu1 %2498 }
  0xdf   : > { %8085 = vmatmul.mubr.msk.bf16.vlgmr.msra.gmra.mrb[40].mxu1 %vm374_vm0, %v9286_v42 }
  0xe0   : > { %8089 = vmatpush3.bf16.msra.mxu1 %v1942_v46  ;;  %8090 = vmatprep.mubr.msk.bf16.mxu1 %vm374_vm0, %v9291_v43  ;;  %v9307_v49 = vpop.permute.xlu0 %2500 }
  0xe1   : > { %8610 = vmatprep.subr.msk.bf16.mxu1 %vm381_vm1, %v9234_v30  ;;  %v9316_v51 = vpop.permute.xlu1 %2640 }
  0xe2   : > { %7432 = vmatmul.mubr.msk.bf16.vlgmr.msra.gmra.mrb[0].mxu0 %vm374_vm0, %v9094_v54  ;;  %v2086_v54 = vsel %vm381_vm1, %v9234_v30, 0 }
  0xe3   : > { %1225 = vmatpush1.bf16.msra.mxu0 %v1216_v48  ;;  %1122 = vmatprep.mubr.bf16.mxu0 %v11121_v6  ;;  %v1504_v48 = vsel %vm381_vm1, %v1495_v45, 0 }
  0xe4   : > { %7451 = vmatprep.subr.msk.bf16.mxu0 %vm381_vm1, %v1352_v50  ;;  %v9330_v56 = vpop.permute.xlu0 %2642  ;;  %v1640_v50 = vsel %vm1638_vm10, %v9148_v7, %v9161_v10  ;;  %v9454_v10 = vld [vmem:[%s11113_s1 + $0xc0] sm:$0xff]  }
  0xe5   : > { %v9334_v57 = vpop.permute.xlu1 %2644 }
  0xe7   : > { %8091 = vmatmul.mubr.msk.bf16.vlgmr.msra.gmra.mrb[44].mxu1 %vm374_vm0, %v9322_v52 }
  0xe8   : > { %8095 = vmatpush3.bf16.msra.mxu1 %v2086_v54  ;;  %8096 = vmatprep.mubr.msk.bf16.mxu1 %vm374_vm0, %v9328_v53  ;;  %v9340_v59 = vpop.permute.xlu0 %2784 }
  0xe9   : > { %8611 = vmatprep.subr.msk.bf16.mxu1 %vm381_vm1, %v9264_v37  ;;  %v9346_v60 = vpop.permute.xlu1 %2786 }
  0xea   : > { %7433 = vmatmul.mubr.msk.bf16.gmra.mrb[24].mxu0 %vm374_vm0, %v9124_v63  ;;  %v1351_v63 = vsel %vm1350_vm8, %v9096_v55, %v9103_v58  ;;  %v9386_v58 = vld [vmem:[%s11113_s1 + $0xa4] ss:$0 sps:$4 sm:$0x33]  }
  0xeb   : > { %1256 = vmatprep.mubr.bf16.mxu0 %v11121_v6  ;;  %v1360_v16 = vsel %vm381_vm1, %v1351_v63, 0 }
  0xec   : > { %v9359_v11 = vpop.permute.xlu0 %2788 }
  0xed   : > { %v9368_v14 = vpop.permute.xlu1 %2928  ;;  %v2806_v45 = vsel %vm381_vm1, %v9359_v11, 0 }
  0xef   : > { %8097 = vmatmul.mubr.msk.bf16.vlgmr.msra.gmra.mrb[48].mxu1 %vm374_vm0, %v9352_v61 }
  0xf0   : > { %8101 = vmatpush3.bf16.msra.mxu1 %v2230_v12  ;;  %8102 = vmatprep.mubr.msk.bf16.mxu1 %vm374_vm0, %v9357_v2  ;;  %v9378_v55 = vpop.permute.xlu0 %2930 }
  0xf1   : > { %8612 = vmatprep.subr.msk.bf16.mxu1 %vm381_vm1, %v9280_v41  ;;  %v9396_v29 = vpop.permute.xlu1 %2932 }
  0xf2   : > { %7442 = vmatmul.mubr.msk.bf16.vlgmr.msra.gmra.mrb[0].mxu0 %vm374_vm0, %v9130_v0 }
  0xf3   : > { %1369 = vmatpush1.bf16.msra.mxu0 %v1360_v16  ;;  %1266 = vmatprep.mubr.bf16.mxu0 %v11121_v6  ;;  %v9474_v16 = vld [vmem:[%s11113_s1 + $0xc8] ss:$0 sps:$4 sm:$0x33]  }
  0xf4   : > { %7461 = vmatprep.subr.msk.bf16.mxu0 %vm381_vm1, %v1496_v21  ;;  %v9400_v0 = vpop.permute.xlu0 %3072  ;;  %v9479_v21 = vld [vmem:[%s11113_s1 + $0xcc] sm:$0xff]  }
  0xf5   : > { %v9414_v33 = vpop.permute.xlu1 %3074 }
  0xf7   : > { %8103 = vmatmul.mubr.msk.bf16.vlgmr.msra.gmra.mrb[52].mxu1 %vm374_vm0, %v9386_v58 }
  0xf8   : > { %8107 = vmatpush3.bf16.msra.mxu1 %v2374_v28  ;;  %8108 = vmatprep.mubr.msk.bf16.mxu1 %vm374_vm0, %v9392_v4  ;;  %v9426_v46 = vpop.permute.xlu0 %3076  ;;  %v1639_v28 = vsel %vm1638_vm10, %v9142_v5, %v9148_v7  ;;  %v1784_v5 = vsel %vm1782_vm11, %v9175_v15, %v9184_v17  ;;  %v9506_v7 = vld [vmem:[%s11113_s1 + $0xd4] ss:$0 sps:$4 sm:$0x33]   ;;  %v9514_v17 = vld [vmem:[%s11113_s1 + $0xd8] sm:$0xff]   ;;  %vm2502_vm10 = vcmask 556032  }
  0xf9   : > { %8613 = vmatprep.subr.msk.bf16.mxu1 %vm381_vm1, %v9307_v49  ;;  %v9438_v62 = vpop.permute.xlu1 %3217 }
  0xfa   : > { %7443 = vmatmul.mubr.msk.bf16.gmra.mrb[28].mxu0 %vm374_vm0, %v9154_v8  ;;  %v2518_v8 = vsel %vm381_vm1, %v9307_v49, 0 }
  0xfb   : > { %1400 = vmatprep.mubr.bf16.mxu0 %v11121_v6 }
  0xfc   : > { %v9448_v54 = vpop.permute.xlu0 %3219 }
  0xfd   : > { %v9460_v63 = vpop.permute.xlu1 %3221 }
  0xff   : > { %8109 = vmatmul.mubr.msk.bf16.vlgmr.msra.gmra.mrb[56].mxu1 %vm374_vm0, %v9412_v31 }
 0x100   : > { %8113 = vmatpush3.bf16.msra.mxu1 %v2518_v8  ;;  %8114 = vmatprep.mubr.msk.bf16.mxu1 %vm374_vm0, %v9419_v38  ;;  %v9466_v12 = vpop.permute.xlu0 %3364 }
 0x101   : > { %8614 = vmatprep.subr.msk.bf16.mxu1 %vm381_vm1, %v9334_v57 }
 0x102   : > { %7452 = vmatmul.mubr.msk.bf16.vlgmr.msra.gmra.mrb[0].mxu0 %vm374_vm0, %v9159_v9  ;;  %v2662_v9 = vsel %vm381_vm1, %v9334_v57, 0 }
 0x103   : > { %1513 = vmatpush1.bf16.msra.mxu0 %v1504_v48  ;;  %1410 = vmatprep.mubr.bf16.mxu0 %v11121_v6  ;;  %v1648_v48 = vsel %vm381_vm1, %v1639_v28, 0 }
 0x104   : > { %7471 = vmatprep.subr.msk.bf16.mxu0 %vm381_vm1, %v1640_v50  ;;  %v9490_v8 = vpop.permute.xlu0 %3368 }
 0x107   : > { %8115 = vmatmul.mubr.msk.bf16.vlgmr.msra.gmra.mrb[60].mxu1 %vm374_vm0, %v9446_v1 }
 0x108   : > { %8119 = vmatpush3.bf16.msra.mxu1 %v2662_v9  ;;  %8120 = vmatprep.mubr.msk.bf16.mxu1 %vm374_vm0, %v9454_v10  ;;  %v9518_v9 = vpop.permute.xlu0 %3513 }
 0x109   : > { %8615 = vmatprep.subr.msk.bf16.mxu1 %vm381_vm1, %v9359_v11  ;;  %11134 = vst [vmem:[#allocation6_spill] sm:$0xff] %v9518_v9 }
 0x10a   : > { %7453 = vmatmul.mubr.msk.bf16.gmra.mrb[32].mxu0 %vm374_vm0, %v9190_v18  ;;  %v9486_v18 = vpop.permute.xlu1 %3366 }
 0x10b   : > { %1544 = vmatprep.mubr.bf16.mxu0 %v11121_v6 }
 0x10e   : > { %v9508_v50 = vpop.permute.xlu1 %3511 }
 0x10f   : > { %8121 = vmatmul.mubr.msk.bf16.vlgmr.msra.gmra.mrb[64].mxu1 %vm374_vm0, %v9474_v16  ;;  %11133 = vst [vmem:[#allocation5_spill] sm:$0xff] %v9508_v50 }
 0x110   : > { %8125 = vmatpush3.bf16.msra.mxu1 %v2806_v45  ;;  %8126 = vmatprep.mubr.msk.bf16.mxu1 %vm374_vm0, %v9479_v21  ;;  %v9534_v45 = vld [vmem:[%s11113_s1 + $0xe0] ss:$0 sps:$4 sm:$0x33]  }
 0x111   : > { %8616 = vmatprep.subr.msk.bf16.mxu1 %vm381_vm1, %v9396_v29 }
 0x112   : > { %7462 = vmatmul.mubr.msk.bf16.vlgmr.msra.gmra.mrb[0].mxu0 %vm374_vm0, %v9196_v19  ;;  %v2950_v19 = vsel %vm381_vm1, %v9396_v29, 0  ;;  %v9526_v28 = vpop.permute.xlu1 %3515 }
 0x113   : > { %1657 = vmatpush1.bf16.msra.mxu0 %v1648_v48  ;;  %1554 = vmatprep.mubr.bf16.mxu0 %v11121_v6  ;;  %v3224_v48 = vpop.permute.xlu0 %3223 }
 0x114   : > { %7481 = vmatprep.subr.msk.bf16.mxu0 %vm381_vm1, %v1784_v5  ;;  %v9539_v5 = vld [vmem:[%s11113_s1 + $0xe4] sm:$0xff]  }
 0x116   : > { %v3371_v3 = vpop.permute.xlu1 %3370 }
 0x117   : > { %8127 = vmatmul.mubr.msk.bf16.vlgmr.msra.gmra.mrb[68].mxu1 %vm374_vm0, %v9506_v7 }
 0x118   : > { %8131 = vmatpush3.bf16.msra.mxu1 %v2950_v19  ;;  %8132 = vmatprep.mubr.msk.bf16.mxu1 %vm374_vm0, %v9514_v17  ;;  %v1783_v19 = vsel %vm1782_vm11, %v9168_v13, %v9175_v15  ;;  %v1928_v13 = vsel %vm1926_vm13, %v9202_v22, %v9208_v23  ;;  %v11135_v15 = vmov 0   ;;  %v9571_v23 = vld [vmem:[%s11113_s1 + $0xf0] sm:$0xff]   ;;  %vm11131_vm11 = vcmask 547840  }
 0x119   : > { %8617 = vmatprep.subr.msk.bf16.mxu1 %vm381_vm1, %v9426_v46  ;;  %v1792_v50 = vsel %vm381_vm1, %v1783_v19, 0  ;;  %v9565_v19 = vpop.permute.xlu0 %3658  ;;  %11137 = vst [vmem:[#allocation8_spill] sm:$0xff] %v9571_v23 }
 0x11a   : > { %7463 = vmatmul.mubr.msk.bf16.gmra.mrb[36].mxu0 %vm374_vm0, %v9220_v25  ;;  %v3094_v25 = vsel %vm381_vm1, %v9426_v46, 0  ;;  %11136 = vst [vmem:[#allocation7_spill] sm:$0xff] %v9565_v19  ;;  %v1927_v19 = vsel %vm1926_vm13, %v9198_v20, %v9202_v22  ;;  %v2072_v20 = vsel %vm2070_vm2, %v9227_v27, %v9234_v30  ;;  %v9619_v22 = vld [vmem:[%s11113_s1 + $0x104] ss:$0 sps:$4 sm:$0x33]   ;;  %v9625_v30 = vld [vmem:[%s11113_s1 + $0x108] sm:$0xff]  }
 0x11b   : > { %1688 = vmatprep.mubr.bf16.mxu0 %v11121_v6  ;;  %v3228_v6 = vsel %vm3225_vm12, %v9460_v63, %v3224_v48  ;;  %v9563_v48 = vld [vmem:[%s11113_s1 + $0xec] ss:$0 sps:$4 sm:$0x33]   ;;  %v1936_v9 = vsel %vm381_vm1, %v1927_v19, 0  ;;  %11139 = vst [vmem:[#allocation10_spill] sm:$0xff] %v9625_v30 }
 0x11f   : > { %8133 = vmatmul.mubr.msk.bf16.vlgmr.msra.gmra.mrb[72].mxu1 %vm374_vm0, %v9534_v45 }
 0x120   : > { %8137 = vmatpush3.bf16.msra.mxu1 %v3094_v25  ;;  %8138 = vmatprep.mubr.msk.bf16.mxu1 %vm374_vm0, %v9539_v5  ;;  %v3375_v25 = vsel %vm3372_vm14, %v9490_v8, %v3371_v3  ;;  %v9591_v3 = vld [vmem:[%s11113_s1 + $0xf8] ss:$0 sps:$4 sm:$0x33]  }
 0x121   : > { %8618 = vmatprep.subr.msk.bf16.mxu1 %vm381_vm1, %v3228_v6 }
 0x122   : > { %7472 = vmatmul.mubr.msk.bf16.vlgmr.msra.gmra.mrb[0].mxu0 %vm374_vm0, %v9225_v26  ;;  %v3242_v26 = vsel %vm381_vm1, %v3228_v6, 0 }
 0x123   : > { %1801 = vmatpush1.bf16.msra.mxu0 %v1792_v50  ;;  %1698 = vmatprep.mubr.bf16.mxu0 %v11135_v15  ;;  %v9574_v50 = vpop.permute.xlu1 %3660 }
 0x124   : > { %7491 = vmatprep.subr.msk.bf16.mxu0 %vm381_vm1, %v1928_v13  ;;  %11138 = vst [vmem:[#allocation9_spill] sm:$0xff] %v9574_v50  ;;  %v9583_v13 = vpop.permute.xlu0 %3662 }
 0x127   : > { %8139 = vmatmul.mubr.msk.bf16.vlgmr.msra.gmra.mrb[76].mxu1 %vm374_vm0, %v9563_v48  ;;  %v3518_v6 = vpop.permute.xlu1 %3517 }
 0x128   : > { %8143 = vmatpush3.bf16.msra.mxu1 %v3242_v26  ;;  %8144 = vmatprep.mubr.msk.bf16.mxu1 %vm374_vm0, %v9571_v23  ;;  %v9596_v26 = vld [vmem:[%s11113_s1 + $0xfc] sm:$0xff]   ;;  %v3522_v50 = vsel %vm3519_vm15, %v9526_v28, %v3518_v6  ;;  %v3665_v23 = vpop.permute.xlu0 %3664 }
 0x129   : > { %8619 = vmatprep.subr.msk.bf16.mxu1 %vm381_vm1, %v3375_v25  ;;  %v3536_v19 = vsel %vm381_vm1, %v3522_v50, 0 }
 0x12a   : > { %7473 = vmatmul.mubr.msk.bf16.gmra.mrb[40].mxu0 %vm374_vm0, %v9256_v35  ;;  %v3389_v35 = vsel %vm381_vm1, %v3375_v25, 0 }
 0x12b   : > { %1832 = vmatprep.mubr.bf16.mxu0 %v11135_v15  ;;  %v9628_v25 = vpop.permute.xlu1 %3805 }
 0x12c   : > { %11140 = vst [vmem:[#allocation11_spill] sm:$0xff] %v9628_v25 }
 0x12f   : > { %8145 = vmatmul.mubr.msk.bf16.vlgmr.msra.gmra.mrb[80].mxu1 %vm374_vm0, %v9591_v3 }
 0x130   : > { %8149 = vmatpush3.bf16.msra.mxu1 %v3389_v35  ;;  %8150 = vmatprep.mubr.msk.bf16.mxu1 %vm374_vm0, %v9596_v26  ;;  %v9652_v35 = vld [vmem:[%s11113_s1 + $0x114] sm:$0xff]  }
 0x131   : > { %8620 = vmatprep.subr.msk.bf16.mxu1 %vm381_vm1, %v3522_v50  ;;  %v9645_v50 = vld [vmem:[%s11113_s1 + $0x110] ss:$0 sps:$4 sm:$0x33]  }
 0x132   : > { %7482 = vmatmul.mubr.msk.bf16.vlgmr.msra.gmra.mrb[0].mxu0 %vm374_vm0, %v9262_v36  ;;  %v9630_v36 = vpop.permute.xlu0 %3807 }
 0x133   : > { %1945 = vmatpush1.bf16.msra.mxu0 %v1936_v9  ;;  %1842 = vmatprep.mubr.bf16.mxu0 %v11135_v15  ;;  %v3669_v9 = vsel %vm3666_vm3, %v9583_v13, %v3665_v23  ;;  %v9647_v23 = vpop.permute.xlu1 %3809 }
 0x134   : > { %7501 = vmatprep.subr.msk.bf16.mxu0 %vm381_vm1, %v2072_v20  ;;  %v3683_v20 = vsel %vm381_vm1, %v3669_v9, 0 }
 0x136   : > { %v3812_v6 = vpop.permute.xlu0 %3811 }
 0x137   : > { %8151 = vmatmul.mubr.msk.bf16.vlgmr.msra.gmra.mrb[84].mxu1 %vm374_vm0, %v9619_v22 }
 0x138   : > { %8155 = vmatpush3.bf16.msra.mxu1 %v3536_v19  ;;  %8156 = vmatprep.mubr.msk.bf16.mxu1 %vm374_vm0, %v9625_v30  ;;  %v3816_v19 = vsel %vm3813_vm4, %v9647_v23, %v3812_v6  ;;  %v2216_v30 = vsel %vm2214_vm5, %v9250_v34, %v9264_v37  ;;  %v2504_v6 = vsel %vm2502_vm10, %v9300_v47, %v9307_v49 }
 0x139   : > { %8621 = vmatprep.subr.msk.bf16.mxu1 %vm381_vm1, %v3669_v9  ;;  %v3830_v37 = vsel %vm381_vm1, %v3816_v19, 0  ;;  %v2360_v9 = vsel %vm2358_vm6, %v9274_v40, %v9280_v41  ;;  %v2359_v41 = vsel %vm2358_vm6, %v9268_v39, %v9274_v40  ;;  %v2503_v39 = vsel %vm2502_vm10, %v9293_v44, %v9300_v47 }
 0x13a   : > { %7483 = vmatmul.mubr.msk.bf16.gmra.mrb[44].mxu0 %vm374_vm0, %v9286_v42  ;;  %v2071_v42 = vsel %vm2070_vm2, %v9214_v24, %v9227_v27  ;;  %v9675_v24 = vld [vmem:[%s11113_s1 + $0x11c] ss:$0 sps:$4 sm:$0x33]   ;;  %v9681_v27 = vld [vmem:[%s11113_s1 + $0x120] sm:$0xff]   ;;  %vm11129_vm6 = vcmask 539648   ;;  %vm11130_vm10 = vcmask 531456  }
 0x13b   : > { %1976 = vmatprep.mubr.bf16.mxu0 %v11135_v15  ;;  %v2080_v25 = vsel %vm381_vm1, %v2071_v42, 0 }
 0x13f   : > { %8157 = vmatmul.mubr.msk.bf16.vlgmr.msra.gmra.mrb[88].mxu1 %vm374_vm0, %v9645_v50 }
 0x140   : > { %8161 = vmatpush3.bf16.msra.mxu1 %v3683_v20  ;;  %8162 = vmatprep.mubr.msk.bf16.mxu1 %vm374_vm0, %v9652_v35 }
 0x141   : > { %8622 = vmatprep.subr.msk.bf16.mxu1 %vm381_vm1, %v3816_v19  ;;  %v2512_v19 = vsel %vm381_vm1, %v2503_v39, 0 }
 0x142   : > { %7492 = vmatmul.mubr.msk.bf16.vlgmr.msra.gmra.mrb[0].mxu0 %vm374_vm0, %v9291_v43  ;;  %v9694_v43 = vld [vmem:[%s11113_s1 + $0x128] ss:$0 sps:$4 sm:$0x33]  }
 0x143   : > { %2089 = vmatpush1.bf16.msra.mxu0 %v2080_v25  ;;  %1986 = vmatprep.mubr.bf16.mxu0 %v11135_v15  ;;  %v3940_v25 = vld [vmem:[%s11114_s2] sm:$0xff] }
 0x144   : > { %7511 = vmatprep.subr.msk.bf16.mxu0 %vm381_vm1, %v2216_v30  ;;  %v2215_v30 = vsel %vm2214_vm5, %v9241_v32, %v9250_v34  ;;  %3945 = vperm.xlu1 %8661, %v3940_v25   ;;  %v3942_v32 = vld [vmem:[%s11114_s2 + $0x10] sm:$0xf]  ;;  %v3941_v34 = vld [vmem:[%s11114_s2 + $0x8] sm:$0xff] }
 0x145   : > { %3950 = vperm.xlu0 %8662, %v3941_v34  }
 0x147   : > { %8163 = vmatmul.mubr.msk.bf16.vlgmr.msra.gmra.mrb[92].mxu1 %vm374_vm0, %v9675_v24 }
 0x148   : > { %8167 = vmatpush3.bf16.msra.mxu1 %v3830_v37  ;;  %8168 = vmatprep.mubr.msk.bf16.mxu1 %vm374_vm0, %v9681_v27 }
 0x149   : > { %3955 = vperm.xlu1 %8661, %v3942_v32  }
 0x14a   : > { %7493 = vmatmul.mubr.msk.bf16.gmra.mrb[48].mxu0 %vm374_vm0, %v9322_v52  ;;  %v2224_v52 = vsel %vm381_vm1, %v2215_v30, 0  ;;  %v2648_v30 = vsel %vm11131_vm11, %v9330_v56, %v9334_v57 }
 0x14b   : > { %2120 = vmatprep.mubr.bf16.mxu0 %v11135_v15 }
 0x14f   : > { %8169 = vmatmul.mubr.msk.bf16.vlgmr.msra.gmra.mrb[96].mxu1 %vm374_vm0, %v9694_v43 }
 0x150   : > { %4209 = vmatprep.mubr.bf16.mxu1 %v11135_v15 }
 0x152   : > { %7502 = vmatmul.mubr.msk.bf16.vlgmr.msra.gmra.mrb[0].mxu0 %vm374_vm0, %v9328_v53  ;;  %v2368_v53 = vsel %vm381_vm1, %v2359_v41, 0 }
 0x153   : > { %2233 = vmatpush1.bf16.msra.mxu0 %v2224_v52  ;;  %2130 = vmatprep.mubr.bf16.mxu0 %v11135_v15 }
 0x154   : > { %7521 = vmatprep.subr.msk.bf16.mxu0 %vm381_vm1, %v2360_v9 }
 0x15a   : > { %7503 = vmatmul.mubr.msk.bf16.gmra.mrb[52].mxu0 %vm374_vm0, %v9352_v61 }
 0x15b   : > { %2264 = vmatprep.mubr.bf16.mxu0 %v11135_v15 }
 0x162   : > { %7512 = vmatmul.mubr.msk.bf16.vlgmr.msra.gmra.mrb[0].mxu0 %vm374_vm0, %v9357_v2  ;;  %v8026_v49 = vpop.f32.mrb[0].mxu1 }
 0x163   : > { %2377 = vmatpush1.bf16.msra.mxu0 %v2368_v53  ;;  %2274 = vmatprep.mubr.bf16.mxu0 %v11135_v15  ;;  %v476_v20 = vpop.f32.mrb[1].mxu1 }
 0x164   : > { %7531 = vmatprep.subr.msk.bf16.mxu0 %vm381_vm1, %v2504_v6  ;;  %v8027_v37 = vpop.f32.mrb[2].mxu1 }
 0x16a   : > { %7513 = vmatmul.mubr.msk.bf16.gmra.mrb[56].mxu0 %vm374_vm0, %v9386_v58  ;;  %v479_v58 = vpop.f32.mrb[3].mxu1 }
 0x16b   : > { %2408 = vmatprep.mubr.bf16.mxu0 %v11135_v15  ;;  %v8032_v25 = vpop.f32.mrb[4].mxu1 }
 0x16c   : > { %v607_v44 = vadd.f32 %v8032_v25, %v8026_v49  ;;  %v598_v47 = vpop.f32.mrb[5].mxu1 }
 0x16d   : > { %v435_v40 = vpop.f32.mrb[4].mxu0  ;;  %v599_v52 = vadd.f32 %v598_v47, %v476_v20  ;;  %v8033_v9 = vpop.f32.mrb[6].mxu1 }
 0x16e   : > { %v437_v61 = vpop.f32.mrb[5].mxu0  ;;  %v601_v32 = vpop.f32.mrb[7].mxu1 }
 0x16f   : > { %v439_v42 = vpop.f32.mrb[6].mxu0  ;;  %v602_v34 = vadd.f32 %v601_v32, %v479_v58 }
 0x170   : > { %v440_v2 = vpop.f32.mrb[7].mxu0 }
 0x172   : > { %7522 = vmatmul.mubr.msk.bf16.vlgmr.msra.gmra.mrb[0].mxu0 %vm374_vm0, %v9392_v4  ;;  %v8038_v41 = vpop.f32.mrb[8].mxu1 }
 0x173   : > { %2521 = vmatpush1.bf16.msra.mxu0 %v2512_v19  ;;  %2418 = vmatprep.mubr.bf16.mxu0 %v11135_v15  ;;  %v755_v53 = vadd.f32 %v8038_v41, %v607_v44  ;;  %v733_v6 = vpop.f32.mrb[9].mxu1  ;;  %v2792_v41 = vsel %vm11129_vm6, %v9346_v60, %v9359_v11 }
 0x174   : > { %7541 = vmatprep.subr.msk.bf16.mxu0 %vm381_vm1, %v2648_v30  ;;  %v749_v57 = vadd.f32 %v733_v6, %v599_v52  ;;  %v8039_v39 = vpop.f32.mrb[10].mxu1  ;;  %v2647_v30 = vsel %vm11131_vm11, %v9316_v51, %v9330_v56 }
 0x175   : > { %v736_v42 = vpop.f32.mrb[11].mxu1  ;;  %v2656_v32 = vsel %vm381_vm1, %v2647_v30, 0 }
 0x176   : > { %v752_v4 = vadd.f32 %v736_v42, %v602_v34 }
 0x17a   : > { %7523 = vmatmul.mubr.msk.bf16.gmra.mrb[60].mxu0 %vm374_vm0, %v9412_v31  ;;  %v8044_v2 = vpop.f32.mrb[12].mxu1 }
 0x17b   : > { %2552 = vmatprep.mubr.bf16.mxu0 %v11135_v15  ;;  %v899_v49 = vadd.f32 %v8044_v2, %v755_v53  ;;  %v877_v19 = vpop.f32.mrb[13].mxu1  ;;  %v2791_v2 = vsel %vm11129_vm6, %v9340_v59, %v9346_v60  ;;  %vm3078_vm6 = vcmask 523264  }
 0x17c   : > { %v893_v37 = vadd.f32 %v877_v19, %v749_v57  ;;  %v8045_v20 = vpop.f32.mrb[14].mxu1 }
 0x17d   : > { %v557_v58 = vpop.f32.mrb[8].mxu0  ;;  %v880_v25 = vpop.f32.mrb[15].mxu1 }
 0x17e   : > { %v558_v44 = vadd.f32 %v557_v58, %v435_v40  ;;  %v559_v47 = vpop.f32.mrb[9].mxu0  ;;  %v896_v52 = vadd.f32 %v880_v25, %v752_v4 }
 0x17f   : > { %v560_v9 = vadd.f32 %v559_v47, %v437_v61  ;;  %v561_v31 = vpop.f32.mrb[10].mxu0  ;;  %v2800_v47 = vsel %vm381_vm1, %v2791_v2, 0 }
 0x180   : > { %v562_v34 = vpop.f32.mrb[11].mxu0 }
 0x182   : > { %7532 = vmatmul.mubr.msk.bf16.vlgmr.msra.gmra.mrb[0].mxu0 %vm374_vm0, %v9419_v38  ;;  %v8050_v53 = vpop.f32.mrb[16].mxu1 }
 0x183   : > { %2665 = vmatpush1.bf16.msra.mxu0 %v2656_v32  ;;  %2562 = vmatprep.mubr.bf16.mxu0 %v11135_v15  ;;  %v1043_v51 = vadd.f32 %v8050_v53, %v899_v49  ;;  %v1021_v56 = vpop.f32.mrb[17].mxu1 }
 0x184   : > { %7551 = vmatprep.subr.msk.bf16.mxu0 %vm381_vm1, %v2792_v41  ;;  %v1037_v40 = vadd.f32 %v1021_v56, %v893_v37  ;;  %v8051_v61 = vpop.f32.mrb[18].mxu1  ;;  %v2935_v56 = vsel %vm11130_vm10, %v9368_v14, %v9378_v55 }
 0x185   : > { %v1024_v6 = vpop.f32.mrb[19].mxu1 }
 0x186   : > { %v1040_v57 = vadd.f32 %v1024_v6, %v896_v52  ;;  %v2936_v52 = vsel %vm11130_vm10, %v9378_v55, %v9396_v29  ;;  %vm318_vm10 = vcmask 160772  }
 0x18a   : > { %7533 = vmatmul.mubr.msk.bf16.gmra.mrb[64].mxu0 %vm374_vm0, %v9446_v1  ;;  %v8056_v39 = vpop.f32.mrb[20].mxu1 }
 0x18b   : > { %2696 = vmatprep.mubr.bf16.mxu0 %v11135_v15  ;;  %v1187_v11 = vadd.f32 %v8056_v39, %v1043_v51  ;;  %v1165_v38 = vpop.f32.mrb[21].mxu1 }
 0x18c   : > { %v1181_v42 = vadd.f32 %v1165_v38, %v1037_v40  ;;  %v8057_v4 = vpop.f32.mrb[22].mxu1 }
 0x18d   : > { %v692_v49 = vpop.f32.mrb[12].mxu0  ;;  %v1168_v19 = vpop.f32.mrb[23].mxu1  ;;  %v3080_v4 = vsel %vm3078_vm6, %v9414_v33, %v9426_v46 }
 0x18e   : > { %v753_v37 = vadd.f32 %v692_v49, %v558_v44  ;;  %v694_v20 = vpop.f32.mrb[13].mxu0  ;;  %v1184_v30 = vadd.f32 %v1168_v19, %v1040_v57 }
 0x18f   : > { %v754_v58 = vadd.f32 %v694_v20, %v560_v9  ;;  %v696_v25 = vpop.f32.mrb[14].mxu0 }
 0x190   : > { %v697_v1 = vpop.f32.mrb[15].mxu0 }
 0x191   : > { %v3079_v1 = vsel %vm3078_vm6, %v9400_v0, %v9414_v33 }
 0x192   : > { %7542 = vmatmul.mubr.msk.bf16.vlgmr.msra.gmra.mrb[0].mxu0 %vm374_vm0, %v9454_v10  ;;  %v8062_v31 = vpop.f32.mrb[24].mxu1 }
 0x193   : > { %2809 = vmatpush1.bf16.msra.mxu0 %v2800_v47  ;;  %2706 = vmatprep.mubr.bf16.mxu0 %v11135_v15  ;;  %v1331_v59 = vadd.f32 %v8062_v31, %v1187_v11  ;;  %v1309_v60 = vpop.f32.mrb[25].mxu1 }
 0x194   : > { %7561 = vmatprep.subr.msk.bf16.mxu0 %vm381_vm1, %v2936_v52  ;;  %v1325_v44 = vadd.f32 %v1309_v60, %v1181_v42  ;;  %v8063_v9 = vpop.f32.mrb[26].mxu1 }
 0x195   : > { %v1312_v32 = vpop.f32.mrb[27].mxu1 }
 0x196   : > { %v1328_v34 = vadd.f32 %v1312_v32, %v1184_v30 }
 0x19a   : > { %7543 = vmatmul.mubr.msk.bf16.gmra.mrb[68].mxu0 %vm374_vm0, %v9474_v16  ;;  %v8068_v41 = vpop.f32.mrb[28].mxu1  ;;  %v2944_v16 = vsel %vm381_vm1, %v2935_v56, 0 }
 0x19b   : > { %2840 = vmatprep.mubr.bf16.mxu0 %v11135_v15  ;;  %v1475_v29 = vadd.f32 %v8068_v41, %v1331_v59  ;;  %v1453_v10 = vpop.f32.mrb[29].mxu1 }
 0x19c   : > { %v1469_v53 = vadd.f32 %v1453_v10, %v1325_v44  ;;  %v8069_v51 = vpop.f32.mrb[30].mxu1 }
 0x19d   : > { %v836_v40 = vpop.f32.mrb[16].mxu0  ;;  %v1456_v61 = vpop.f32.mrb[31].mxu1 }
 0x19e   : > { %v897_v6 = vadd.f32 %v836_v40, %v753_v37  ;;  %v838_v57 = vpop.f32.mrb[17].mxu0  ;;  %v1472_v39 = vadd.f32 %v1456_v61, %v1328_v34  ;;  %v3227_v34 = vsel %vm3225_vm12, %v9448_v54, %v9460_v63 }
 0x19f   : > { %v898_v11 = vadd.f32 %v838_v57, %v754_v58  ;;  %v840_v38 = vpop.f32.mrb[18].mxu0 }
 0x1a0   : > { %v841_v42 = vpop.f32.mrb[19].mxu0 }
 0x1a2   : > { %7552 = vmatmul.mubr.msk.bf16.vlgmr.msra.gmra.mrb[0].mxu0 %vm374_vm0, %v9479_v21  ;;  %v8074_v2 = vpop.f32.mrb[32].mxu1 }
 0x1a3   : > { %2953 = vmatpush1.bf16.msra.mxu0 %v2944_v16  ;;  %2850 = vmatprep.mubr.bf16.mxu0 %v11135_v15  ;;  %v1619_v14 = vadd.f32 %v8074_v2, %v1475_v29  ;;  %v1597_v55 = vpop.f32.mrb[33].mxu1 }
 0x1a4   : > { %7571 = vmatprep.subr.msk.bf16.mxu0 %vm381_vm1, %v3080_v4  ;;  %v1613_v49 = vadd.f32 %v1597_v55, %v1469_v53  ;;  %v8075_v19 = vpop.f32.mrb[34].mxu1 }
 0x1a5   : > { %v1600_v37 = vpop.f32.mrb[35].mxu1 }
 0x1a6   : > { %v1616_v20 = vadd.f32 %v1600_v37, %v1472_v39 }
 0x1aa   : > { %7553 = vmatmul.mubr.msk.bf16.gmra.mrb[72].mxu0 %vm374_vm0, %v9506_v7  ;;  %v8080_v30 = vpop.f32.mrb[36].mxu1  ;;  %v3088_v7 = vsel %vm381_vm1, %v3079_v1, 0 }
 0x1ab   : > { %2984 = vmatprep.mubr.bf16.mxu0 %v11135_v15  ;;  %v1763_v46 = vadd.f32 %v8080_v30, %v1619_v14  ;;  %v1741_v21 = vpop.f32.mrb[37].mxu1  ;;  %v3374_v14 = vsel %vm3372_vm14, %v9486_v18, %v9490_v8 }
 0x1ac   : > { %v1757_v58 = vadd.f32 %v1741_v21, %v1613_v49  ;;  %v8081_v25 = vpop.f32.mrb[38].mxu1 }
 0x1ad   : > { %v980_v47 = vpop.f32.mrb[20].mxu0  ;;  %v1744_v52 = vpop.f32.mrb[39].mxu1 }
 0x1ae   : > { %v1041_v31 = vadd.f32 %v980_v47, %v897_v6  ;;  %v982_v59 = vpop.f32.mrb[21].mxu0  ;;  %v1760_v60 = vadd.f32 %v1744_v52, %v1616_v20  ;;  %v3226_v6 = vsel %vm3225_vm12, %v9438_v62, %v9448_v54  ;;  %vm307_vm12 = vcmask 338944  }
 0x1af   : > { %v1042_v44 = vadd.f32 %v982_v59, %v898_v11  ;;  %v984_v9 = vpop.f32.mrb[22].mxu0  ;;  %308 = vst.msk [vmem:[#allocation2] sm:$0xf] %vm307_vm12, %v11135_v15  ;;  %309 = vst.msk [vmem:[#allocation2 + $0x10] sm:$0xf] %vm307_vm12, %v11135_v15 }
 0x1b0   : > { %v985_v32 = vpop.f32.mrb[23].mxu0  ;;  %v11141_v9 = vld [vmem:[#allocation6_spill] sm:$0xff]  ;;  %321 = vst.msk [vmem:[#allocation3] sm:$0xf] %vm307_vm12, %v11135_v15  ;;  %322 = vst.msk [vmem:[#allocation3 + $0x10] sm:$0xf] %vm307_vm12, %v11135_v15 }
 0x1b1   : > { %v3521_v32 = vsel %vm3519_vm15, %v11141_v9, %v9526_v28  ;;  %323 = vst.msk [vmem:[#allocation3 + $0x20] sm:$0xf] %vm307_vm12, %v11135_v15  ;;  %324 = vst.msk [vmem:[#allocation3 + $0x30] sm:$0xf] %vm307_vm12, %v11135_v15 }
 0x1b2   : > { %7562 = vmatmul.mubr.msk.bf16.vlgmr.msra.gmra.mrb[0].mxu0 %vm374_vm0, %v9514_v17  ;;  %v8086_v41 = vpop.f32.mrb[40].mxu1  ;;  %325 = vst.msk [vmem:[#allocation3 + $0x40] sm:$0xf] %vm307_vm12, %v11135_v15 }
 0x1b3   : > { %3097 = vmatpush1.bf16.msra.mxu0 %v3088_v7  ;;  %2994 = vmatprep.mubr.bf16.mxu0 %v11135_v15  ;;  %v1907_v0 = vadd.f32 %v8086_v41, %v1763_v46  ;;  %v1885_v33 = vpop.f32.mrb[41].mxu1  ;;  %v11142_v7 = vld [vmem:[#allocation8_spill] sm:$0xff] }
 0x1b4   : > { %7581 = vmatprep.subr.msk.bf16.mxu0 %vm381_vm1, %v3227_v34  ;;  %v1901_v29 = vadd.f32 %v1885_v33, %v1757_v58  ;;  %v8087_v10 = vpop.f32.mrb[42].mxu1  ;;  %v3373_v58 = vsel %vm3372_vm14, %v9466_v12, %v9486_v18  ;;  %vm312_vm14 = vcmask 1044304  }
 0x1b5   : > { %v1888_v53 = vpop.f32.mrb[43].mxu1 }
 0x1b6   : > { %v1904_v51 = vadd.f32 %v1888_v53, %v1760_v60 }
 0x1ba   : > { %7563 = vmatmul.mubr.msk.bf16.gmra.mrb[76].mxu0 %vm374_vm0, %v9534_v45  ;;  %v8092_v56 = vpop.f32.mrb[44].mxu1  ;;  %v3236_v45 = vsel %vm381_vm1, %v3226_v6, 0 }
 0x1bb   : > { %3128 = vmatprep.mubr.bf16.mxu0 %v11135_v15  ;;  %v2051_v63 = vadd.f32 %v8092_v56, %v1907_v0  ;;  %v2029_v17 = vpop.f32.mrb[45].mxu1 }
 0x1bc   : > { %v2045_v40 = vadd.f32 %v2029_v17, %v1901_v29  ;;  %v8093_v61 = vpop.f32.mrb[46].mxu1 }
 0x1bd   : > { %v1124_v57 = vpop.f32.mrb[24].mxu0  ;;  %v2032_v39 = vpop.f32.mrb[47].mxu1 }
 0x1be   : > { %v1185_v11 = vadd.f32 %v1124_v57, %v1041_v31  ;;  %v1126_v38 = vpop.f32.mrb[25].mxu0  ;;  %v2048_v16 = vadd.f32 %v2032_v39, %v1904_v51 }
 0x1bf   : > { %v1186_v42 = vadd.f32 %v1126_v38, %v1042_v44  ;;  %v1128_v4 = vpop.f32.mrb[26].mxu0 }
 0x1c0   : > { %v1129_v2 = vpop.f32.mrb[27].mxu0 }
 0x1c2   : > { %7572 = vmatmul.mubr.msk.bf16.vlgmr.msra.gmra.mrb[0].mxu0 %vm374_vm0, %v9539_v5  ;;  %v8098_v55 = vpop.f32.mrb[48].mxu1 }
 0x1c3   : > { %3245 = vmatpush1.bf16.msra.mxu0 %v3236_v45  ;;  %3138 = vmatprep.mubr.bf16.mxu0 %v11135_v15  ;;  %v2195_v62 = vadd.f32 %v8098_v55, %v2051_v63  ;;  %v2173_v54 = vpop.f32.mrb[49].mxu1  ;;  %v11143_v63 = vld [vmem:[#allocation5_spill] sm:$0xff] }
 0x1c4   : > { %7591 = vmatprep.subr.msk.bf16.mxu0 %vm381_vm1, %v3374_v14  ;;  %v2189_v49 = vadd.f32 %v2173_v54, %v2045_v40  ;;  %v8099_v19 = vpop.f32.mrb[50].mxu1  ;;  %v3520_v17 = vsel %vm3519_vm15, %v11143_v63, %v11141_v9  ;;  %vm313_vm15 = vcmask 162820  }
 0x1c5   : > { %v2176_v37 = vpop.f32.mrb[51].mxu1 }
 0x1c6   : > { %v2192_v20 = vadd.f32 %v2176_v37, %v2048_v16 }
 0x1ca   : > { %7573 = vmatmul.mubr.msk.bf16.gmra.mrb[80].mxu0 %vm374_vm0, %v9563_v48  ;;  %v8104_v30 = vpop.f32.mrb[52].mxu1  ;;  %v3383_v48 = vsel %vm381_vm1, %v3373_v58, 0 }
 0x1cb   : > { %3276 = vmatprep.mubr.bf16.mxu0 %v11135_v15  ;;  %v2339_v8 = vadd.f32 %v8104_v30, %v2195_v62  ;;  %v2317_v5 = vpop.f32.mrb[53].mxu1  ;;  %v11145_v30 = vld [vmem:[#allocation7_spill] sm:$0xff] }
 0x1cc   : > { %v2333_v46 = vadd.f32 %v2317_v5, %v2189_v49  ;;  %v8105_v21 = vpop.f32.mrb[54].mxu1 }
 0x1cd   : > { %v1268_v25 = vpop.f32.mrb[28].mxu0  ;;  %v2320_v1 = vpop.f32.mrb[55].mxu1 }
 0x1ce   : > { %v1329_v47 = vadd.f32 %v1268_v25, %v1185_v11  ;;  %v1270_v52 = vpop.f32.mrb[29].mxu0  ;;  %v2336_v31 = vadd.f32 %v2320_v1, %v2192_v20 }
 0x1cf   : > { %v1330_v59 = vadd.f32 %v1270_v52, %v1186_v42  ;;  %v1272_v60 = vpop.f32.mrb[30].mxu0  ;;  %v11144_v42 = vld [vmem:[#allocation9_spill] sm:$0xff] }
 0x1d0   : > { %v1273_v44 = vpop.f32.mrb[31].mxu0  ;;  %v3668_v4 = vsel %vm3666_vm3, %v11144_v42, %v9583_v13 }
 0x1d2   : > { %7582 = vmatmul.mubr.msk.bf16.vlgmr.msra.gmra.mrb[0].mxu0 %vm374_vm0, %v11142_v7  ;;  %v8110_v34 = vpop.f32.mrb[56].mxu1 }
 0x1d3   : > { %3392 = vmatpush1.bf16.msra.mxu0 %v3383_v48  ;;  %3286 = vmatprep.mubr.bf16.mxu0 %v11135_v15  ;;  %v2483_v12 = vadd.f32 %v8110_v34, %v2339_v8  ;;  %v2461_v18 = vpop.f32.mrb[57].mxu1  ;;  %v3667_v8 = vsel %vm3666_vm3, %v11145_v30, %v11144_v42  ;;  %vm314_vm3 = vmor %vm313_vm15, %vm312_vm14 }
 0x1d4   : > { %7601 = vmatprep.subr.msk.bf16.mxu0 %vm381_vm1, %v3521_v32  ;;  %v2477_v41 = vadd.f32 %v2461_v18, %v2333_v46  ;;  %v8111_v0 = vpop.f32.mrb[58].mxu1  ;;  %315 = vst.msk [vmem:[#allocation2 + $0x8] sm:$0xff] %vm314_vm3, %v11135_v15  ;;  %316 = vst.msk [vmem:[#allocation2 + $0x18] sm:$0xff] %vm314_vm3, %v11135_v15 }
 0x1d5   : > { %v2464_v33 = vpop.f32.mrb[59].mxu1  ;;  %326 = vst.msk [vmem:[#allocation3 + $0x8] sm:$0xff] %vm314_vm3, %v11135_v15  ;;  %327 = vst.msk [vmem:[#allocation3 + $0x18] sm:$0xff] %vm314_vm3, %v11135_v15 }
 0x1d6   : > { %v2480_v29 = vadd.f32 %v2464_v33, %v2336_v31  ;;  %v3815_v31 = vsel %vm3813_vm4, %v9630_v36, %v9647_v23  ;;  %v11147_v33 = vld [vmem:[#allocation11_spill] sm:$0xff]  ;;  %328 = vst.msk [vmem:[#allocation3 + $0x28] sm:$0xff] %vm314_vm3, %v11135_v15  ;;  %329 = vst.msk [vmem:[#allocation3 + $0x38] sm:$0xff] %vm314_vm3, %v11135_v15 }
 0x1d7   : > { %330 = vst.msk [vmem:[#allocation3 + $0x48] sm:$0xff] %vm314_vm3, %v11135_v15  ;;  %vm317_vm3 = vcmask 1042256  }
 0x1da   : > { %7583 = vmatmul.mubr.msk.bf16.gmra.mrb[84].mxu0 %vm374_vm0, %v9591_v3  ;;  %v8116_v10 = vpop.f32.mrb[60].mxu1  ;;  %v3530_v3 = vsel %vm381_vm1, %v3520_v17, 0 }
 0x1db   : > { %3423 = vmatprep.mubr.bf16.mxu0 %v11135_v15  ;;  %v2627_v28 = vadd.f32 %v8116_v10, %v2483_v12  ;;  %v2605_v53 = vpop.f32.mrb[61].mxu1 }
 0x1dc   : > { %v2621_v51 = vadd.f32 %v2605_v53, %v2477_v41  ;;  %v8117_v56 = vpop.f32.mrb[62].mxu1 }
 0x1dd   : > { %v1412_v40 = vpop.f32.mrb[32].mxu0  ;;  %v2608_v61 = vpop.f32.mrb[63].mxu1 }
 0x1de   : > { %v1473_v6 = vadd.f32 %v1412_v40, %v1329_v47  ;;  %v1414_v57 = vpop.f32.mrb[33].mxu0  ;;  %v2624_v39 = vadd.f32 %v2608_v61, %v2480_v29  ;;  %v3814_v29 = vsel %vm3813_vm4, %v11147_v33, %v9630_v36 }
 0x1df   : > { %v1474_v11 = vadd.f32 %v1414_v57, %v1330_v59  ;;  %v1416_v38 = vpop.f32.mrb[34].mxu0  ;;  %v11146_v59 = vld [vmem:[#allocation10_spill] sm:$0xff] }
 0x1e0   : > { %v1417_v16 = vpop.f32.mrb[35].mxu0 }
 0x1e2   : > { %7592 = vmatmul.mubr.msk.bf16.vlgmr.msra.gmra.mrb[0].mxu0 %vm374_vm0, %v9596_v26  ;;  %v8122_v45 = vpop.f32.mrb[64].mxu1 }
 0x1e3   : > { %3539 = vmatpush1.bf16.msra.mxu0 %v3530_v3  ;;  %3433 = vmatprep.mubr.bf16.mxu0 %v11135_v15  ;;  %v2771_v2 = vadd.f32 %v8122_v45, %v2627_v28  ;;  %v2749_v14 = vpop.f32.mrb[65].mxu1 }
 0x1e4   : > { %7611 = vmatprep.subr.msk.bf16.mxu0 %vm381_vm1, %v3668_v4  ;;  %v2765_v55 = vadd.f32 %v2749_v14, %v2621_v51  ;;  %v8123_v62 = vpop.f32.mrb[66].mxu1 }
 0x1e5   : > { %v2752_v54 = vpop.f32.mrb[67].mxu1 }
 0x1e6   : > { %v2768_v49 = vadd.f32 %v2752_v54, %v2624_v39 }
 0x1ea   : > { %7593 = vmatmul.mubr.msk.bf16.gmra.mrb[88].mxu0 %vm374_vm0, %v9619_v22  ;;  %v8128_v19 = vpop.f32.mrb[68].mxu1  ;;  %v3677_v22 = vsel %vm381_vm1, %v3667_v8, 0 }
 0x1eb   : > { %3570 = vmatprep.mubr.bf16.mxu0 %v11135_v15  ;;  %v2915_v13 = vadd.f32 %v8128_v19, %v2771_v2  ;;  %v2893_v26 = vpop.f32.mrb[69].mxu1 }
 0x1ec   : > { %v2909_v37 = vadd.f32 %v2893_v26, %v2765_v55  ;;  %v8129_v20 = vpop.f32.mrb[70].mxu1 }
 0x1ed   : > { %v1556_v5 = vpop.f32.mrb[36].mxu0  ;;  %v2896_v46 = vpop.f32.mrb[71].mxu1 }
 0x1ee   : > { %v1617_v21 = vadd.f32 %v1556_v5, %v1473_v6  ;;  %v1558_v58 = vpop.f32.mrb[37].mxu0  ;;  %v2912_v25 = vadd.f32 %v2896_v46, %v2768_v49 }
 0x1ef   : > { %v1618_v1 = vadd.f32 %v1558_v58, %v1474_v11  ;;  %v1560_v47 = vpop.f32.mrb[38].mxu0 }
 0x1f0   : > { %v1561_v52 = vpop.f32.mrb[39].mxu0 }
 0x1f2   : > { %7602 = vmatmul.mubr.msk.bf16.vlgmr.msra.gmra.mrb[0].mxu0 %vm374_vm0, %v11146_v59  ;;  %v8134_v60 = vpop.f32.mrb[72].mxu1 }
 0x1f3   : > { %3686 = vmatpush1.bf16.msra.mxu0 %v3677_v22  ;;  %3580 = vmatprep.mubr.bf16.mxu0 %v11135_v15  ;;  %v3059_v44 = vadd.f32 %v8134_v60, %v2915_v13  ;;  %v3037_v48 = vpop.f32.mrb[73].mxu1 }
 0x1f4   : > { %7621 = vmatprep.subr.msk.bf16.mxu0 %vm381_vm1, %v3815_v31  ;;  %v3053_v9 = vadd.f32 %v3037_v48, %v2909_v37  ;;  %v8135_v32 = vpop.f32.mrb[74].mxu1 }
 0x1f5   : > { %v3040_v7 = vpop.f32.mrb[75].mxu1  ;;  %v11148_v32 = vld [vmem:[#allocation4_spill] sm:$0xff] }
 0x1f6   : > { %v3056_v34 = vadd.f32 %v3040_v7, %v2912_v25  ;;  %v4005_v7 = vsub.s32 2, %v11148_v32 }
 0x1fa   : > { %7603 = vmatmul.mubr.msk.bf16.gmra.mrb[92].mxu0 %vm374_vm0, %v9645_v50  ;;  %v8140_v12 = vpop.f32.mrb[76].mxu1  ;;  %v3824_v50 = vsel %vm381_vm1, %v3814_v29, 0 }
 0x1fb   : > { %3717 = vmatprep.mubr.bf16.mxu0 %v11135_v15  ;;  %v3203_v23 = vadd.f32 %v8140_v12, %v3059_v44  ;;  %v3181_v18 = vpop.f32.mrb[77].mxu1  ;;  %v9881_v12 = vld [vmem:[%s11119_s7] sm:$0x7] }
 0x1fc   : > { %v3197_v41 = vadd.f32 %v3181_v18, %v3053_v9  ;;  %v8141_v0 = vpop.f32.mrb[78].mxu1  ;;  %v9889_v33 = vrot.slane %v9881_v12, %v4005_v7 }
 0x1fd   : > { %v1700_v10 = vpop.f32.mrb[40].mxu0  ;;  %v3184_v28 = vpop.f32.mrb[79].mxu1 }
 0x1fe   : > { %v1761_v53 = vadd.f32 %v1700_v10, %v1617_v21  ;;  %v1702_v51 = vpop.f32.mrb[41].mxu0  ;;  %v3200_v56 = vadd.f32 %v3184_v28, %v3056_v34 }
 0x1ff   : > { %v1762_v63 = vadd.f32 %v1702_v51, %v1618_v1  ;;  %v1704_v17 = vpop.f32.mrb[42].mxu0 }
 0x200   : > { %v1705_v40 = vpop.f32.mrb[43].mxu0 }
 0x202   : > { %7612 = vmatmul.mubr.msk.bf16.vlgmr.msra.gmra.mrb[0].mxu0 %vm374_vm0, %v9652_v35  ;;  %v8146_v61 = vpop.f32.mrb[80].mxu1 }
 0x203   : > { %3833 = vmatpush1.bf16.msra.mxu0 %v3824_v50  ;;  %3727 = vmatprep.mubr.bf16.mxu0 %v11135_v15  ;;  %v3351_v6 = vadd.f32 %v8146_v61, %v3203_v23  ;;  %v3329_v57 = vpop.f32.mrb[81].mxu1  ;;  %v9883_v23 = vpop.permute.xlu1 %3945 }
 0x204   : > { %v3345_v36 = vadd.f32 %v3329_v57, %v3197_v41  ;;  %v8147_v39 = vpop.f32.mrb[82].mxu1 }
 0x205   : > { %v3332_v11 = vpop.f32.mrb[83].mxu1 }
 0x206   : > { %v3348_v38 = vadd.f32 %v3332_v11, %v3200_v56 }
 0x20a   : > { %7613 = vmatmul.mubr.msk.bf16.gmra.mrb[96].mxu0 %vm374_vm0, %v9675_v24  ;;  %v8152_v3 = vpop.f32.mrb[84].mxu1 }
 0x20b   : > { %3864 = vmatprep.mubr.bf16.mxu0 %v11135_v15  ;;  %v3498_v16 = vadd.f32 %v8152_v3, %v3351_v6  ;;  %v3476_v42 = vpop.f32.mrb[85].mxu1 }
 0x20c   : > { %v3492_v4 = vadd.f32 %v3476_v42, %v3345_v36  ;;  %v8153_v35 = vpop.f32.mrb[86].mxu1 }
 0x20d   : > { %v1844_v45 = vpop.f32.mrb[44].mxu0  ;;  %v3479_v2 = vpop.f32.mrb[87].mxu1 }
 0x20e   : > { %v1905_v14 = vadd.f32 %v1844_v45, %v1761_v53  ;;  %v1846_v55 = vpop.f32.mrb[45].mxu0  ;;  %v3495_v62 = vadd.f32 %v3479_v2, %v3348_v38 }
 0x20f   : > { %v1906_v54 = vadd.f32 %v1846_v55, %v1762_v63  ;;  %v1848_v49 = vpop.f32.mrb[46].mxu0 }
 0x210   : > { %v1849_v19 = vpop.f32.mrb[47].mxu0 }
 0x212   : > { %7622 = vmatmul.mubr.msk.bf16.vlgmr.msra.gmra.mrb[0].mxu0 %vm374_vm0, %v9681_v27  ;;  %v8158_v13 = vpop.f32.mrb[88].mxu1 }
 0x213   : > { %3874 = vmatprep.mubr.bf16.mxu0 %v11135_v15  ;;  %v3645_v24 = vadd.f32 %v8158_v13, %v3498_v16  ;;  %v3623_v26 = vpop.f32.mrb[89].mxu1 }
 0x214   : > { %v3639_v37 = vadd.f32 %v3623_v26, %v3492_v4  ;;  %v8159_v20 = vpop.f32.mrb[90].mxu1 }
 0x215   : > { %v3626_v30 = vpop.f32.mrb[91].mxu1 }
 0x216   : > { %v3642_v8 = vadd.f32 %v3626_v30, %v3495_v62 }
 0x21a   : > { %7623 = vmatmul.mubr.msk.bf16.gmra.mrb[100].mxu0 %vm374_vm0, %v9694_v43  ;;  %v8164_v5 = vpop.f32.mrb[92].mxu1 }
 0x21b   : > { %v3792_v46 = vadd.f32 %v8164_v5, %v3645_v24  ;;  %v3770_v21 = vpop.f32.mrb[93].mxu1 }
 0x21c   : > { %v3786_v58 = vadd.f32 %v3770_v21, %v3639_v37  ;;  %v8165_v25 = vpop.f32.mrb[94].mxu1 }
 0x21d   : > { %v1988_v1 = vpop.f32.mrb[48].mxu0  ;;  %v3773_v47 = vpop.f32.mrb[95].mxu1 }
 0x21e   : > { %v2049_v27 = vadd.f32 %v1988_v1, %v1905_v14  ;;  %v1990_v22 = vpop.f32.mrb[49].mxu0  ;;  %v3789_v52 = vadd.f32 %v3773_v47, %v3642_v8 }
 0x21f   : > { %v2050_v31 = vadd.f32 %v1990_v22, %v1906_v54  ;;  %v1992_v59 = vpop.f32.mrb[50].mxu0 }
 0x220   : > { %v1993_v60 = vpop.f32.mrb[51].mxu0 }
 0x222   : > { %v8170_v44 = vpop.f32.mrb[96].mxu1 }
 0x223   : > { %v9875_v48 = vadd.f32 %v8170_v44, %v3792_v46  ;;  %v3917_v9 = vpop.f32.mrb[97].mxu1 }
 0x224   : > { %v3933_v43 = vadd.f32 %v3917_v9, %v3786_v58  ;;  %v8171_v34 = vpop.f32.mrb[98].mxu1 }
 0x225   : > { %v3920_v18 = vpop.f32.mrb[99].mxu1 }
 0x226   : > { %v3960_v41 = vadd.f32 %v9883_v23, %v3933_v43  ;;  %v9886_v0 = vadd.f32 %v3920_v18, %v3789_v52 }
 0x228   : > { %vm3969_vm0 = vcmp.gt.f32.partialorder %v3960_v41, 0.0  ;;  %v3978_v29 = vmul.f32 0.01, %v3960_v41 }
 0x22a   : > { %v3987_v10 = vsel %vm3969_vm0, %v3960_v41, %v3978_v29 }
 0x22b   : > { %v4012_v28 = vmul.f32 %v9889_v33, %v3987_v10 }
 0x22d   : > { %v2132_v53 = vpop.f32.mrb[52].mxu0  ;;  %v7847_v51 = vpack.c.bf16 %v4012_v28, %v4012_v28 }
 0x22e   : > { %v2193_v56 = vadd.f32 %v2132_v53, %v2049_v27  ;;  %v2134_v63 = vpop.f32.mrb[53].mxu0 }
 0x22f   : > { %v2194_v17 = vadd.f32 %v2134_v63, %v2050_v31  ;;  %v2136_v40 = vpop.f32.mrb[54].mxu0  ;;  %4048 = vrot.lane.b32.xlu1 %v7847_v51, %s8791_s14 }
 0x230   : > { %v2137_v50 = vpop.f32.mrb[55].mxu0 }
 0x23d   : > { %v2276_v61 = vpop.f32.mrb[56].mxu0 }
 0x23e   : > { %v2337_v6 = vadd.f32 %v2276_v61, %v2193_v56  ;;  %v2278_v57 = vpop.f32.mrb[57].mxu0 }
 0x23f   : > { %v2338_v36 = vadd.f32 %v2278_v57, %v2194_v17  ;;  %v2280_v39 = vpop.f32.mrb[58].mxu0 }
 0x240   : > { %v2281_v11 = vpop.f32.mrb[59].mxu0 }
 0x24d   : > { %v2420_v38 = vpop.f32.mrb[60].mxu0 }
 0x24e   : > { %v2481_v3 = vadd.f32 %v2420_v38, %v2337_v6  ;;  %v2422_v16 = vpop.f32.mrb[61].mxu0 }
 0x24f   : > { %v2482_v42 = vadd.f32 %v2422_v16, %v2338_v36  ;;  %v2424_v4 = vpop.f32.mrb[62].mxu0  ;;  %v3951_v16 = vpop.permute.xlu0 %3950 }
 0x250   : > { %v2425_v35 = vpop.f32.mrb[63].mxu0  ;;  %v3956_v4 = vpop.permute.xlu1 %3955 }
 0x251   : > { %v3963_v35 = vadd.f32 %v3951_v16, %v9886_v0 }
 0x253   : > { %vm3972_vm0 = vcmp.gt.f32.partialorder %v3963_v35, 0.0 }
 0x25d   : > { %v2564_v45 = vpop.f32.mrb[64].mxu0 }
 0x25e   : > { %v2625_v2 = vadd.f32 %v2564_v45, %v2481_v3  ;;  %v2566_v14 = vpop.f32.mrb[65].mxu0  ;;  %v3997_v45 = vsub.s32 0, %v11148_v32 }
 0x25f   : > { %v2626_v55 = vadd.f32 %v2566_v14, %v2482_v42  ;;  %v2568_v62 = vpop.f32.mrb[66].mxu0 }
 0x260   : > { %v2569_v54 = vpop.f32.mrb[67].mxu0 }
 0x26d   : > { %v2708_v49 = vpop.f32.mrb[68].mxu0 }
 0x26e   : > { %v2769_v19 = vadd.f32 %v2708_v49, %v2625_v2  ;;  %v2710_v13 = vpop.f32.mrb[69].mxu0  ;;  %v4001_v2 = vsub.s32 1, %v11148_v32 }
 0x26f   : > { %v2770_v24 = vadd.f32 %v2710_v13, %v2626_v55  ;;  %v2712_v26 = vpop.f32.mrb[70].mxu0  ;;  %v3966_v55 = vadd.f32 %v3956_v4, %v9875_v48  ;;  %v9914_v13 = vrot.slane %v9881_v12, %v3997_v45 }
 0x270   : > { %v2713_v37 = vpop.f32.mrb[71].mxu0 }
 0x271   : > { %vm3975_vm14 = vcmp.gt.f32.partialorder %v3966_v55, 0.0 }
 0x27d   : > { %v2852_v20 = vpop.f32.mrb[72].mxu0 }
 0x27e   : > { %v2913_v30 = vadd.f32 %v2852_v20, %v2769_v19  ;;  %v2854_v8 = vpop.f32.mrb[73].mxu0  ;;  %v9917_v20 = vrot.slane %v9881_v12, %v4001_v2 }
 0x27f   : > { %v2914_v5 = vadd.f32 %v2854_v8, %v2770_v24  ;;  %v2856_v46 = vpop.f32.mrb[74].mxu0  ;;  %v3981_v24 = vmul.f32 0.01, %v3963_v35 }
 0x280   : > { %v2857_v21 = vpop.f32.mrb[75].mxu0 }
 0x28d   : > { %v2996_v58 = vpop.f32.mrb[76].mxu0 }
 0x28e   : > { %v3057_v25 = vadd.f32 %v2996_v58, %v2913_v30  ;;  %v2998_v1 = vpop.f32.mrb[77].mxu0 }
 0x28f   : > { %v3058_v47 = vadd.f32 %v2998_v1, %v2914_v5  ;;  %v3000_v27 = vpop.f32.mrb[78].mxu0  ;;  %v3984_v1 = vmul.f32 0.01, %v3966_v55 }
 0x290   : > { %v3001_v22 = vpop.f32.mrb[79].mxu0 }
 0x29d   : > { %v3140_v52 = vpop.f32.mrb[80].mxu0 }
 0x29e   : > { %v3201_v31 = vadd.f32 %v3140_v52, %v3057_v25  ;;  %v3142_v59 = vpop.f32.mrb[81].mxu0  ;;  %v3990_v25 = vsel %vm3972_vm0, %v3963_v35, %v3981_v24 }
 0x29f   : > { %v3202_v60 = vadd.f32 %v3142_v59, %v3058_v47  ;;  %v3144_v44 = vpop.f32.mrb[82].mxu0 }
 0x2a0   : > { %v3145_v9 = vpop.f32.mrb[83].mxu0 }
 0x2ad   : > { %v3288_v7 = vpop.f32.mrb[84].mxu0 }
 0x2ae   : > { %v3349_v43 = vadd.f32 %v3288_v7, %v3201_v31  ;;  %v3290_v34 = vpop.f32.mrb[85].mxu0 }
 0x2af   : > { %v3350_v18 = vadd.f32 %v3290_v34, %v3202_v60  ;;  %v3292_v41 = vpop.f32.mrb[86].mxu0  ;;  %v4015_v34 = vmul.f32 %v9889_v33, %v3990_v25 }
 0x2b0   : > { %v3293_v29 = vpop.f32.mrb[87].mxu0  ;;  %v3993_v41 = vsel %vm3975_vm14, %v3966_v55, %v3984_v1  ;;  %vm4075_vm14 = vcmask 1047556  }
 0x2bd   : > { %v3435_v10 = vpop.f32.mrb[88].mxu0 }
 0x2be   : > { %v3496_v28 = vadd.f32 %v3435_v10, %v3349_v43  ;;  %v3437_v53 = vpop.f32.mrb[89].mxu0 }
 0x2bf   : > { %v3497_v51 = vadd.f32 %v3437_v53, %v3350_v18  ;;  %v3439_v56 = vpop.f32.mrb[90].mxu0  ;;  %v4018_v53 = vmul.f32 %v9889_v33, %v3993_v41 }
 0x2c0   : > { %v3440_v63 = vpop.f32.mrb[91].mxu0 }
 0x2cd   : > { %v3582_v17 = vpop.f32.mrb[92].mxu0 }
 0x2ce   : > { %v3643_v40 = vadd.f32 %v3582_v17, %v3496_v28  ;;  %v3584_v50 = vpop.f32.mrb[93].mxu0  ;;  %v7849_v28 = vpack.c.bf16 %v4015_v34, %v4015_v34  ;;  %v8719_v34 = vld [vmem:[%s11115_s3 + $0x1c] sm:$0xff]  }
 0x2cf   : > { %v3644_v61 = vadd.f32 %v3584_v50, %v3497_v51  ;;  %v3586_v6 = vpop.f32.mrb[94].mxu0 }
 0x2d0   : > { %v3587_v57 = vpop.f32.mrb[95].mxu0 }
 0x2dd   : > { %v3729_v36 = vpop.f32.mrb[96].mxu0 }
 0x2de   : > { %v3790_v39 = vadd.f32 %v3729_v36, %v3643_v40  ;;  %v3731_v11 = vpop.f32.mrb[97].mxu0  ;;  %v7851_v40 = vpack.c.bf16 %v4018_v53, %v4018_v53 }
 0x2df   : > { %v3791_v38 = vadd.f32 %v3731_v11, %v3644_v61  ;;  %v3733_v3 = vpop.f32.mrb[98].mxu0  ;;  %v4049_v61 = vpop.permute.xlu1 %4048 }
 0x2e0   : > { %v3734_v42 = vpop.f32.mrb[99].mxu0 }
 0x2e5   : > { %v3866_v14 = vpop.f32.mrb[0].mxu0 }
 0x2e6   : > { %v3958_v62 = vadd.f32 %v9883_v23, %v3866_v14  ;;  %v3868_v54 = vpop.f32.mrb[1].mxu0 }
 0x2e7   : > { %v3959_v49 = vadd.f32 %v9883_v23, %v3868_v54  ;;  %v3870_v19 = vpop.f32.mrb[2].mxu0 }
 0x2e8   : > { %vm3967_vm4 = vcmp.gt.f32.partialorder %v3958_v62, 0.0  ;;  %v3976_v26 = vmul.f32 0.01, %v3958_v62  ;;  %v3961_v0 = vadd.f32 %v3951_v16, %v3870_v19  ;;  %v3872_v37 = vpop.f32.mrb[3].mxu0 }
 0x2e9   : > { %vm3968_vm6 = vcmp.gt.f32.partialorder %v3959_v49, 0.0  ;;  %v3977_v32 = vmul.f32 0.01, %v3959_v49  ;;  %v3962_v48 = vadd.f32 %v3951_v16, %v3872_v37 }
 0x2ea   : > { %v3985_v30 = vsel %vm3967_vm4, %v3958_v62, %v3976_v26  ;;  %vm3970_vm12 = vcmp.gt.f32.partialorder %v3961_v0, 0.0  ;;  %v3979_v8 = vmul.f32 0.01, %v3961_v0  ;;  %vm310_vm4 = vcmask 336896  }
 0x2eb   : > { %v3986_v23 = vsel %vm3968_vm6, %v3959_v49, %v3977_v32  ;;  %vm3971_vm15 = vcmp.gt.f32.partialorder %v3962_v48, 0.0  ;;  %v3980_v5 = vmul.f32 0.01, %v3962_v48  ;;  %v4010_v46 = vmul.f32 %v9914_v13, %v3985_v30  ;;  %vm319_vm6 = vmor %vm318_vm10, %vm317_vm3  ;;  %311 = vst.msk [vmem:[#allocation2 + $0x20] sm:$0x3] %vm310_vm4, %v11135_v15  ;;  %v5777_v30 = vld [vmem:[%s11116_s4] sm:$0xff] }
 0x2ec   : > { %v3988_v21 = vsel %vm3970_vm12, %v3961_v0, %v3979_v8  ;;  %v4011_v58 = vmul.f32 %v9917_v20, %v3986_v23  ;;  %320 = vst.msk [vmem:[#allocation2 + $0x28] sm:$0x33] %vm319_vm6, %v11135_v15  ;;  %vm4074_vm12 = vcmask 1043792   ;;  %vm4078_vm4 = vcmask 863232   ;;  %v5779_v8 = vld [vmem:[%s11116_s4 + $0x10] sm:$0xff]  ;;  %v5778_v23 = vld [vmem:[%s11116_s4 + $0x8] sm:$0xff] }
 0x2ed   : > { %v3989_v12 = vsel %vm3971_vm15, %v3962_v48, %v3980_v5  ;;  %v3876_v47 = vpop.f32.mrb[100].mxu0  ;;  %v4013_v27 = vmul.f32 %v9914_v13, %v3988_v21  ;;  %vm4061_vm15 = vcmask 343040   ;;  %vm9935_vm3 = vmor %vm4075_vm14, %vm4074_vm12  ;;  %vm4082_vm6 = vcmask 1041744   ;;  %v5781_v5 = vld [vmem:[%s11116_s4 + $0x20] sm:$0xff] }
 0x2ee   : > { %v3937_v22 = vadd.f32 %v3876_v47, %v3790_v39  ;;  %v3878_v52 = vpop.f32.mrb[101].mxu0  ;;  %v7846_v31 = vpack.c.bf16 %v4011_v58, %v4010_v46  ;;  %v4014_v59 = vmul.f32 %v9917_v20, %v3989_v12  ;;  %vm4086_vm12 = vcmask 861184   ;;  %v5780_v46 = vld [vmem:[%s11116_s4 + $0x18] sm:$0xff] }
 0x2ef   : > { %v3938_v60 = vadd.f32 %v3878_v52, %v3791_v38  ;;  %v3880_v44 = vpop.f32.mrb[102].mxu0  ;;  %v8792_v0 = vmov 0.0   ;;  %vm8793_vm14 = vmmov 0  }
 0x2f0   : > { %v3964_v9 = vadd.f32 %v3956_v4, %v3937_v22  ;;  %v3881_v7 = vpop.f32.mrb[103].mxu0  ;;  %4046 = vrot.lane.b32.xlu1 %v7846_v31, %s8791_s14  ;;  %v7848_v43 = vpack.c.bf16 %v4014_v59, %v4013_v27  ;;  %8236 = vmatprep.subr.bf16.mxu0 %v8792_v0 }
 0x2f1   : > { %v3965_v18 = vadd.f32 %v3956_v4, %v3938_v60  ;;  %8240 = vmatprep.mubr.msk.bf16.mxu0 %vm8793_vm14, %v8792_v0  ;;  %v8718_v60 = vld [vmem:[%s11115_s3 + $0x14] sm:$0xff]  }
 0x2f2   : > { %vm3973_vm0 = vcmp.gt.f32.partialorder %v3964_v9, 0.0  ;;  %v3982_v29 = vmul.f32 0.01, %v3964_v9  ;;  %4050 = vrot.lane.b32.xlu0 %v7848_v43, %s8791_s14 }
 0x2f3   : > { %vm3974_vm10 = vcmp.gt.f32.partialorder %v3965_v18, 0.0  ;;  %v3983_v10 = vmul.f32 0.01, %v3965_v18 }
 0x2f4   : > { %v3991_v51 = vsel %vm3973_vm0, %v3964_v9, %v3982_v29  ;;  %vm4083_vm0 = vcmask 1045508  }
 0x2f5   : > { %v3992_v56 = vsel %vm3974_vm10, %v3965_v18, %v3983_v10  ;;  %v4016_v63 = vmul.f32 %v9914_v13, %v3991_v51  ;;  %vm4084_vm10 = vmor %vm4083_vm0, %vm4082_vm6  ;;  %vm4158_vm6 = vcmask 162816   ;;  %v8720_v10 = vld [vmem:[%s11115_s3 + $0x24] ss:$0 sps:$4 sm:$0xff]   ;;  %vm11151_vm0 = vcmask 539648  }
 0x2f6   : > { %4052 = vrot.lane.b32.xlu0 %v7849_v28, %s8791_s14  ;;  %v4017_v17 = vmul.f32 %v9917_v20, %v3992_v56 }
 0x2f8   : > { %v7850_v50 = vpack.c.bf16 %v4017_v17, %v4016_v63 }
 0x2fa   : > { %4056 = vrot.lane.b32.xlu0 %v7851_v40, %s8791_s14  ;;  %4054 = vrot.lane.b32.xlu1 %v7850_v50, %s8791_s14 }
 0x362   : > { %v4047_v6 = vpop.permute.xlu1 %4046 }
 0x363   : > { %v4058_v36 = vrot.slane %v4047_v6, 4 }
 0x364   : > { %v4051_v39 = vpop.permute.xlu0 %4050 }
 0x365   : > { %v4062_v11 = vsel %vm4061_vm15, %v4058_v36, %v4047_v6  ;;  %v4063_v38 = vsel %vm4061_vm15, %v4058_v36, %v4049_v61  ;;  %v4059_v3 = vrot.slane %v4051_v39, 4 }
 0x366   : > { %4077 = vst.msk [vmem:[#allocation2] sm:$0xff] %vm9935_vm3, %v4062_v11 }
 0x367   : > { %4079 = vst.msk [vmem:[#allocation2 + $0x8] sm:$0xf] %vm4078_vm4, %v4063_v38  ;;  %v4064_v16 = vsel %vm4061_vm15, %v4059_v3, %v4051_v39 }
 0x368   : > { %4080 = vst.msk [vmem:[#allocation2 + $0x10] sm:$0xff] %vm9935_vm3, %v4064_v16  ;;  %v4053_v42 = vpop.permute.xlu0 %4052  ;;  %v10088_v16 = vld [vmem:[%s11115_s3 + $0x50] sm:$0xff]  }
 0x369   : > { %v4065_v4 = vsel %vm4061_vm15, %v4059_v3, %v4053_v42  ;;  %v8722_v42 = vld [vmem:[%s11115_s3] sm:$0xff]  }
 0x36a   : > { %4081 = vst.msk [vmem:[#allocation2 + $0x18] sm:$0xf] %vm4078_vm4, %v4065_v4 }
 0x36c   : > { %v4055_v35 = vpop.permute.xlu1 %4054  ;;  %v4057_v2 = vpop.permute.xlu0 %4056 }
 0x36d   : > { %v4060_v45 = vrot.slane %v4055_v35, 4  ;;  %v4093_v14 = vld [vmem:[#allocation2] sm:$0xff] }
 0x36f   : > { %v4095_v55 = vld [vmem:[#allocation2 + $0x10] sm:$0xff]  ;;  %v4066_v62 = vsel %vm4061_vm15, %v4060_v45, %v4055_v35  ;;  %v4067_v54 = vsel %vm4061_vm15, %v4060_v45, %v4057_v2  ;;  %v10109_v45 = vld [vmem:[%s11115_s3 + $0x58] sm:$0xff]  }
 0x370   : > { %v7641_v49 = vcombine.high %v4093_v14, %v4095_v55  ;;  %4085 = vst.msk [vmem:[#allocation2 + $0x20] sm:$0x33] %vm4084_vm10, %v4066_v62  ;;  %v7640_v24 = vcombine.low %v4093_v14, %v4095_v55  ;;  %v8724_v55 = vld [vmem:[%s11115_s3 + $0x8] sm:$0xff]   ;;  %vm11152_vm10 = vmmov %vm11151_vm0 }
 0x371   : > { %4087 = vst.msk [vmem:[#allocation2 + $0x28] sm:$0x3] %vm4086_vm12, %v4067_v54  ;;  %v8714_v19 = vld [vmem:[#allocation2 + $0x8] ss:$16 sps:$4 sm:$0xff]   ;;  %vm11153_vm12 = vmmov %vm11151_vm0 }
 0x372   : > { %4141 = vrot.lane.b32.xlu1 %v7641_v49, %s8773_s19  ;;  %4143 = vrot.lane.b32.xlu0 %v8714_v19, %s8773_s19 }
 0x376   : > { %4139 = vrot.lane.b32.xlu1 %v7640_v24, %s8773_s19 }
 0x377   : > { %v4097_v26 = vld [vmem:[#allocation2 + $0x20] sm:$0x33] }
 0x378   : > { %v7643_v37 = vcombine.low %v4097_v26, %v4097_v26  ;;  %v7644_v32 = vcombine.high %v4097_v26, %v4097_v26  ;;  %v8717_v48 = vld [vmem:[#allocation2 + $0x28] ss:$0 sps:$4 sm:$0x33]   ;;  %v8726_v26 = vld [vmem:[%s11115_s3 + $0x10] ss:$0 sps:$4 sm:$0xff]  }
 0x37a   : > { %4147 = vrot.lane.b32.xlu1 %v7644_v32, %s8773_s19  ;;  %4145 = vrot.lane.b32.xlu0 %v7643_v37, %s8773_s19 }
 0x37e   : > { %4309 = vrot.lane.b32.xlu1 %v7641_v49, %s8772_s18  ;;  %4149 = vrot.lane.b32.xlu0 %v8717_v48, %s8773_s19 }
 0x382   : > { %4307 = vrot.lane.b32.xlu1 %v7640_v24, %s8772_s18  ;;  %4311 = vrot.lane.b32.xlu0 %v8714_v19, %s8772_s18 }
 0x386   : > { %4315 = vrot.lane.b32.xlu1 %v7644_v32, %s8772_s18  ;;  %4313 = vrot.lane.b32.xlu0 %v7643_v37, %s8772_s18 }
 0x38a   : > { %4482 = vrot.lane.b32.xlu1 %v7641_v49, %s8774_s20  ;;  %4317 = vrot.lane.b32.xlu0 %v8717_v48, %s8772_s18 }
 0x38e   : > { %4480 = vrot.lane.b32.xlu1 %v7640_v24, %s8774_s20  ;;  %4484 = vrot.lane.b32.xlu0 %v8714_v19, %s8774_s20 }
 0x392   : > { %4488 = vrot.lane.b32.xlu1 %v7644_v32, %s8774_s20  ;;  %4486 = vrot.lane.b32.xlu0 %v7643_v37, %s8774_s20 }
 0x396   : > { %4670 = vrot.lane.b32.xlu1 %v7641_v49, %s8777_s23  ;;  %4490 = vrot.lane.b32.xlu0 %v8717_v48, %s8774_s20 }
 0x39a   : > { %4668 = vrot.lane.b32.xlu1 %v7640_v24, %s8777_s23  ;;  %4672 = vrot.lane.b32.xlu0 %v8714_v19, %s8777_s23 }
 0x39e   : > { %4676 = vrot.lane.b32.xlu1 %v7644_v32, %s8777_s23  ;;  %4674 = vrot.lane.b32.xlu0 %v7643_v37, %s8777_s23 }
 0x3a2   : > { %4858 = vrot.lane.b32.xlu1 %v7641_v49, %s8778_s24  ;;  %4678 = vrot.lane.b32.xlu0 %v8717_v48, %s8777_s23 }
 0x3a6   : > { %4856 = vrot.lane.b32.xlu1 %v7640_v24, %s8778_s24  ;;  %4860 = vrot.lane.b32.xlu0 %v8714_v19, %s8778_s24 }
 0x3aa   : > { %4864 = vrot.lane.b32.xlu1 %v7644_v32, %s8778_s24  ;;  %4862 = vrot.lane.b32.xlu0 %v7643_v37, %s8778_s24 }
 0x3ae   : > { %5046 = vrot.lane.b32.xlu1 %v7641_v49, %s8779_s25  ;;  %4866 = vrot.lane.b32.xlu0 %v8717_v48, %s8778_s24 }
 0x3b2   : > { %5044 = vrot.lane.b32.xlu1 %v7640_v24, %s8779_s25  ;;  %5048 = vrot.lane.b32.xlu0 %v8714_v19, %s8779_s25 }
 0x3b6   : > { %5052 = vrot.lane.b32.xlu1 %v7644_v32, %s8779_s25  ;;  %5050 = vrot.lane.b32.xlu0 %v7643_v37, %s8779_s25 }
 0x3ba   : > { %5234 = vrot.lane.b32.xlu1 %v7641_v49, %s8782_s30  ;;  %5054 = vrot.lane.b32.xlu0 %v8717_v48, %s8779_s25 }
 0x3be   : > { %5232 = vrot.lane.b32.xlu1 %v7640_v24, %s8782_s30  ;;  %5236 = vrot.lane.b32.xlu0 %v8714_v19, %s8782_s30 }
 0x3c2   : > { %5240 = vrot.lane.b32.xlu1 %v7644_v32, %s8782_s30  ;;  %5238 = vrot.lane.b32.xlu0 %v7643_v37, %s8782_s30 }
 0x3c6   : > { %5422 = vrot.lane.b32.xlu1 %v7641_v49, %s8783_s9  ;;  %5242 = vrot.lane.b32.xlu0 %v8717_v48, %s8782_s30 }
 0x3ca   : > { %5420 = vrot.lane.b32.xlu1 %v7640_v24, %s8783_s9  ;;  %5424 = vrot.lane.b32.xlu0 %v8714_v19, %s8783_s9 }
 0x3ce   : > { %5428 = vrot.lane.b32.xlu1 %v7644_v32, %s8783_s9  ;;  %5426 = vrot.lane.b32.xlu0 %v7643_v37, %s8783_s9 }
 0x3d2   : > { %5610 = vrot.lane.b32.xlu1 %v7641_v49, %s8784_s10  ;;  %5430 = vrot.lane.b32.xlu0 %v8717_v48, %s8783_s9 }
 0x3d6   : > { %5608 = vrot.lane.b32.xlu1 %v7640_v24, %s8784_s10  ;;  %5612 = vrot.lane.b32.xlu0 %v8714_v19, %s8784_s10  ;;  %v10132_v19 = vld [vmem:[%s11115_s3 + $0x60] ss:$0 sps:$4 sm:$0xff]  }
 0x3da   : > { %5616 = vrot.lane.b32.xlu1 %v7644_v32, %s8784_s10  ;;  %5614 = vrot.lane.b32.xlu0 %v7643_v37, %s8784_s10 }
 0x3de   : > { %5784 = vperm.xlu1 %8661, %v5777_v30   ;;  %5618 = vrot.lane.b32.xlu0 %v8717_v48, %s8784_s10  ;;  %v10151_v48 = vld [vmem:[%s11115_s3 + $0x64] sm:$0xff]  }
 0x3e2   : > { %5794 = vperm.xlu1 %8661, %v5779_v8   ;;  %5789 = vperm.xlu0 %8662, %v5778_v23  }
 0x3e4   : > { %v4142_v21 = vpop.permute.xlu1 %4141  ;;  %v4144_v58 = vpop.permute.xlu0 %4143 }
 0x3e5   : > { %v4152_v25 = vsel %vm1350_vm8, %v4142_v21, %v4144_v58 }
 0x3e6   : > { %5804 = vperm.xlu1 %8661, %v5781_v5   ;;  %5799 = vperm.xlu0 %8662, %v5780_v46  }
 0x3e7   : > { %4177 = vmatprep.subr.bf16.mxu1 %v4152_v25 }
 0x3e8   : > { %v4140_v1 = vpop.permute.xlu1 %4139 }
 0x3e9   : > { %v4151_v12 = vsel %vm1350_vm8, %v4140_v1, %v4142_v21  ;;  %v10190_v1 = vld [vmem:[%s11115_s3 + $0x74] ss:$0 sps:$4 sm:$0xff]  }
 0x3ea   : > { %4178 = vmatpush1.bf16.msra.mxu1 %v4151_v12 }
 0x3ec   : > { %v4146_v47 = vpop.permute.xlu0 %4145  ;;  %v4148_v27 = vpop.permute.xlu1 %4147 }
 0x3ed   : > { %v4153_v22 = vsel %vm1350_vm8, %v4146_v47, %v4148_v27 }
 0x3ee   : > { %v4169_v59 = vsel %vm381_vm1, %v4153_v22, 0  ;;  %v8731_v22 = vld [vmem:[%s11115_s3 + $0x28] sm:$0xff]  }
 0x3f0   : > { %v4150_v52 = vpop.permute.xlu0 %4149  ;;  %v4310_v7 = vpop.permute.xlu1 %4309 }
 0x3f1   : > { %v4154_v31 = vsel %vm1350_vm8, %v4148_v27, %v4150_v52  ;;  %v4175_v43 = vsel %vm381_vm1, %v4150_v52, 0  ;;  %v10205_v27 = vld [vmem:[%s11115_s3 + $0x78] sm:$0xff]  }
 0x3f2   : > { %7646 = vmatprep.subr.msk.bf16.mxu1 %vm381_vm1, %v4154_v31 }
 0x3f3   : > { %4180 = vmatpush1.bf16.msra.mxu1 %v4169_v59  ;;  %v10227_v59 = vld [vmem:[%s11115_s3 + $0x80] sm:$0xff]  }
 0x3f4   : > { %v4312_v44 = vpop.permute.xlu0 %4311  ;;  %8172 = vmatprep.subr.bf16.mxu1 %v8792_v0  ;;  %v4308_v53 = vpop.permute.xlu1 %4307 }
 0x3f5   : > { %v4320_v18 = vsel %vm1206_vm7, %v4310_v7, %v4312_v44  ;;  %v4319_v17 = vsel %vm1206_vm7, %v4308_v53, %v4310_v7 }
 0x3f6   : > { %7647 = vmatmul.mubr.msk.bf16.vlgmr.msra.gmra.mrb[100].mxu1 %vm4158_vm6, %v8718_v60 }
 0x3f7   : > { %8173 = vmatpush3.bf16.msra.mxu1 %v4144_v58  ;;  %4219 = vmatprep.mubr.bf16.mxu1 %v11135_v15  ;;  %v10175_v58 = vld [vmem:[%s11115_s3 + $0x6c] sm:$0xff]  }
 0x3f8   : > { %v4314_v9 = vpop.permute.xlu0 %4313  ;;  %8174 = vmatprep.subr.bf16.mxu1 %v8792_v0  ;;  %v4316_v56 = vpop.permute.xlu1 %4315 }
 0x3f9   : > { %v4321_v40 = vsel %vm1206_vm7, %v4314_v9, %v4316_v56  ;;  %v8733_v9 = vld [vmem:[%s11115_s3 + $0x30] sm:$0xff]  }
 0x3fa   : > { %v4336_v6 = vsel %vm381_vm1, %v4321_v40, 0 }
 0x3fb   : > { %8175 = vmatpush3.bf16.msra.mxu1 %v4175_v43  ;;  %v10246_v43 = vld [vmem:[%s11115_s3 + $0x88] ss:$0 sps:$4 sm:$0xff]  }
 0x3fc   : > { %v4318_v41 = vpop.permute.xlu0 %4317  ;;  %4344 = vmatprep.subr.bf16.mxu1 %v4320_v18  ;;  %v4483_v2 = vpop.permute.xlu1 %4482  ;;  %v8735_v18 = vld [vmem:[%s11115_s3 + $0x38] ss:$0 sps:$4 sm:$0xff]  }
 0x3fd   : > { %v4322_v50 = vsel %vm1206_vm7, %v4316_v56, %v4318_v41  ;;  %v4342_v14 = vsel %vm381_vm1, %v4318_v41, 0 }
 0x3fe   : > { %7648 = vmatmul.mubr.msk.bf16.gmra.mrb[104].mxu1 %vm4158_vm6, %v8719_v34 }
 0x3ff   : > { %4229 = vmatprep.mubr.bf16.mxu1 %v11135_v15 }
 0x400   : > { %v10043_v29 = vpop.permute.xlu0 %4484  ;;  %v4481_v37 = vpop.permute.xlu1 %4480 }
 0x401   : > { %v4493_v62 = vsel %vm1494_vm9, %v4483_v2, %v10043_v29  ;;  %v4492_v8 = vsel %vm1494_vm9, %v4481_v37, %v4483_v2  ;;  %v10331_v2 = vld [vmem:[%s11115_s3 + $0xa8] sm:$0xff]  }
 0x404   : > { %v10048_v28 = vpop.permute.xlu0 %4486  ;;  %v4489_v30 = vpop.permute.xlu1 %4488 }
 0x405   : > { %v4494_v5 = vsel %vm1494_vm9, %v10048_v28, %v4489_v30 }
 0x406   : > { %7649 = vmatmul.mubr.msk.bf16.gmra.mrb[108].mxu1 %vm4158_vm6, %v8720_v10  ;;  %v4509_v25 = vsel %vm381_vm1, %v4494_v5, 0 }
 0x407   : > { %8176 = vmatprep.mubr.msk.bf16.mxu1 %vm8793_vm14, %v8792_v0 }
 0x408   : > { %v10053_v51 = vpop.permute.xlu0 %4490 }
 0x409   : > { %v4495_v46 = vsel %vm1494_vm9, %v4489_v30, %v10053_v51 }
 0x40c   : > { %v10055_v63 = vpop.permute.xlu0 %4672 }
 0x40e   : > { %8177 = vmatmul.mubr.msk.bf16.vlgmr.msra.gmra.mrb[112].mxu1 %vm4158_vm6, %v8718_v60  ;;  %v4671_v60 = vpop.permute.xlu1 %4670 }
 0x40f   : > { %4345 = vmatpush1.bf16.msra.mxu1 %v4319_v17  ;;  %8180 = vmatprep.mubr.msk.bf16.mxu1 %vm8793_vm14, %v8792_v0  ;;  %v4681_v7 = vsel %vm1926_vm13, %v4671_v60, %v10055_v63 }
 0x410   : > { %7656 = vmatprep.subr.msk.bf16.mxu1 %vm381_vm1, %v4322_v50  ;;  %v10064_v61 = vpop.permute.xlu0 %4674  ;;  %v10289_v50 = vld [vmem:[%s11115_s3 + $0x94] sm:$0xff]  }
 0x412   : > { %v4669_v41 = vpop.permute.xlu1 %4668 }
 0x413   : > { %4347 = vmatpush1.bf16.msra.mxu1 %v4336_v6  ;;  %v4680_v53 = vsel %vm1926_vm13, %v4669_v41, %v4671_v60  ;;  %v10304_v6 = vld [vmem:[%s11115_s3 + $0x9c] ss:$0 sps:$4 sm:$0xff]  }
 0x414   : > { %v10067_v36 = vpop.permute.xlu0 %4678  ;;  %8188 = vmatprep.subr.bf16.mxu1 %v8792_v0 }
 0x416   : > { %8181 = vmatmul.mubr.msk.bf16.gmra.mrb[116].mxu1 %vm4158_vm6, %v8719_v34  ;;  %v4677_v28 = vpop.permute.xlu1 %4676 }
 0x417   : > { %8184 = vmatprep.mubr.msk.bf16.mxu1 %vm8793_vm14, %v8792_v0  ;;  %v4682_v56 = vsel %vm1926_vm13, %v10064_v61, %v4677_v28  ;;  %v4683_v17 = vsel %vm1926_vm13, %v4677_v28, %v10067_v36 }
 0x418   : > { %v10073_v39 = vpop.permute.xlu0 %4860  ;;  %v4697_v61 = vsel %vm381_vm1, %v4682_v56, 0 }
 0x419   : > { %8237 = vmatpush3.bf16.msra.mxu0 %v10073_v39 }
 0x41a   : > { %8238 = vmatprep.subr.bf16.mxu0 %v8792_v0 }
 0x41c   : > { %v10077_v11 = vpop.permute.xlu0 %4862 }
 0x41e   : > { %8185 = vmatmul.mubr.msk.bf16.gmra.mrb[120].mxu1 %vm4158_vm6, %v8720_v10  ;;  %v10265_v10 = vld [vmem:[%s11115_s3 + $0x8c] sm:$0xff]  }
 0x41f   : > { %4376 = vmatprep.mubr.bf16.mxu1 %v11135_v15 }
 0x420   : > { %v10081_v38 = vpop.permute.xlu0 %4866 }
 0x421   : > { %v4891_v3 = vsel %vm381_vm1, %v10081_v38, 0 }
 0x422   : > { %8239 = vmatpush3.bf16.msra.mxu0 %v4891_v3  ;;  %v10315_v3 = vld [vmem:[%s11115_s3 + $0xa0] sm:$0xff]  }
 0x423   : > { %8252 = vmatprep.subr.bf16.mxu0 %v8792_v0 }
 0x424   : > { %v10094_v4 = vpop.permute.xlu0 %5048 }
 0x425   : > { %8241 = vmatmul.mubr.msk.bf16.vlgmr.msra.gmra.mrb[104].mxu0 %vm4158_vm6, %v10088_v16 }
 0x426   : > { %7657 = vmatmul.mubr.msk.bf16.vlgmr.msra.gmra.mrb[100].mxu1 %vm4158_vm6, %v8722_v42  ;;  %8253 = vmatpush3.bf16.msra.mxu0 %v10094_v4 }
 0x427   : > { %8189 = vmatpush3.bf16.msra.mxu1 %v4312_v44  ;;  %8244 = vmatprep.mubr.msk.bf16.mxu0 %vm8793_vm14, %v8792_v0  ;;  %v4515_v44 = vsel %vm381_vm1, %v10053_v51, 0 }
 0x428   : > { %v10102_v35 = vpop.permute.xlu0 %5050  ;;  %8190 = vmatprep.subr.bf16.mxu1 %v8792_v0  ;;  %4386 = vmatprep.mubr.bf16.mxu1 %v11135_v15 }
 0x429   : > { %8254 = vmatprep.subr.bf16.mxu0 %v8792_v0 }
 0x42b   : > { %8191 = vmatpush3.bf16.msra.mxu1 %v4342_v14  ;;  %v4859_v14 = vpop.permute.xlu1 %4858 }
 0x42c   : > { %4517 = vmatprep.subr.bf16.mxu1 %v4493_v62  ;;  %v10118_v54 = vpop.permute.xlu0 %5054  ;;  %v8738_v62 = vld [vmem:[%s11115_s3 + $0x44] sm:$0xff]  }
 0x42d   : > { %8245 = vmatmul.mubr.msk.bf16.gmra.mrb[108].mxu0 %vm4158_vm6, %v10109_v45  ;;  %v5079_v49 = vsel %vm381_vm1, %v10118_v54, 0 }
 0x42e   : > { %7658 = vmatmul.mubr.msk.bf16.gmra.mrb[104].mxu1 %vm4158_vm6, %v8724_v55  ;;  %8255 = vmatpush3.bf16.msra.mxu0 %v5079_v49 }
 0x42f   : > { %8248 = vmatprep.mubr.msk.bf16.mxu0 %vm8793_vm14, %v8792_v0  ;;  %4396 = vmatprep.mubr.bf16.mxu1 %v11135_v15  ;;  %v4857_v49 = vpop.permute.xlu1 %4856 }
 0x430   : > { %8268 = vmatprep.subr.bf16.mxu0 %v8792_v0  ;;  %v10134_v24 = vpop.permute.xlu0 %5236  ;;  %v4868_v37 = vsel %vm2070_vm2, %v4857_v49, %v4859_v14 }
 0x434   : > { %v10146_v32 = vpop.permute.xlu0 %5238 }
 0x435   : > { %8249 = vmatmul.mubr.msk.bf16.gmra.mrb[112].mxu0 %vm4158_vm6, %v10132_v19 }
 0x436   : > { %7659 = vmatmul.mubr.msk.bf16.gmra.mrb[124].mxu1 %vm4158_vm6, %v8726_v26  ;;  %8256 = vmatprep.mubr.msk.bf16.mxu0 %vm8793_vm14, %v8792_v0 }
 0x437   : > { %8192 = vmatprep.mubr.msk.bf16.mxu1 %vm8793_vm14, %v8792_v0 }
 0x438   : > { %v10156_v23 = vpop.permute.xlu0 %5242 }
 0x439   : > { %v5267_v21 = vsel %vm381_vm1, %v10156_v23, 0 }
 0x43c   : > { %v10192_v12 = vpop.permute.xlu0 %5424 }
 0x43d   : > { %8257 = vmatmul.mubr.msk.bf16.vlgmr.msra.gmra.mrb[116].mxu0 %vm4158_vm6, %v10151_v48 }
 0x43e   : > { %8269 = vmatpush3.bf16.msra.mxu0 %v10134_v24  ;;  %8193 = vmatmul.mubr.msk.bf16.vlgmr.msra.gmra.mrb[128].mxu1 %vm4158_vm6, %v8722_v42  ;;  %v8737_v42 = vld [vmem:[%s11115_s3 + $0x3c] sm:$0xff]  }
 0x43f   : > { %4518 = vmatpush1.bf16.msra.mxu1 %v4492_v8  ;;  %8270 = vmatprep.subr.bf16.mxu0 %v8792_v0 }
 0x440   : > { %7671 = vmatprep.subr.msk.bf16.mxu1 %vm381_vm1, %v4495_v46  ;;  %8260 = vmatprep.mubr.msk.bf16.mxu0 %vm8793_vm14, %v8792_v0  ;;  %v10200_v47 = vpop.permute.xlu0 %5426 }
 0x441   : > { %8196 = vmatprep.mubr.msk.bf16.mxu1 %vm8793_vm14, %v8792_v0 }
 0x442   : > { %8271 = vmatpush3.bf16.msra.mxu0 %v5267_v21 }
 0x443   : > { %4520 = vmatpush1.bf16.msra.mxu1 %v4509_v25  ;;  %8284 = vmatprep.subr.bf16.mxu0 %v8792_v0 }
 0x444   : > { %8204 = vmatprep.subr.bf16.mxu1 %v8792_v0  ;;  %v10212_v52 = vpop.permute.xlu0 %5430 }
 0x445   : > { %8261 = vmatmul.mubr.msk.bf16.gmra.mrb[120].mxu0 %vm4158_vm6, %v10175_v58  ;;  %v5455_v31 = vsel %vm381_vm1, %v10212_v52, 0 }
 0x446   : > { %8197 = vmatmul.mubr.msk.bf16.gmra.mrb[132].mxu1 %vm4158_vm6, %v8724_v55  ;;  %8264 = vmatprep.mubr.msk.bf16.mxu0 %vm8793_vm14, %v8792_v0  ;;  %v4703_v55 = vsel %vm381_vm1, %v10067_v36, 0  ;;  %v10349_v36 = vld [vmem:[%s11115_s3 + $0xb0] ss:$0 sps:$4 sm:$0xff]  }
 0x447   : > { %8200 = vmatprep.mubr.msk.bf16.mxu1 %vm8793_vm14, %v8792_v0 }
 0x448   : > { %v10248_v34 = vpop.permute.xlu0 %5612 }
 0x44d   : > { %8265 = vmatmul.mubr.msk.bf16.gmra.mrb[124].mxu0 %vm4158_vm6, %v10190_v1 }
 0x44e   : > { %8201 = vmatmul.mubr.msk.bf16.gmra.mrb[136].mxu1 %vm4158_vm6, %v8726_v26  ;;  %8272 = vmatprep.mubr.msk.bf16.mxu0 %vm8793_vm14, %v8792_v0  ;;  %v4865_v26 = vpop.permute.xlu1 %4864 }
 0x44f   : > { %4549 = vmatprep.mubr.bf16.mxu1 %v11135_v15  ;;  %v4870_v30 = vsel %vm2070_vm2, %v10077_v11, %v4865_v26  ;;  %v4871_v8 = vsel %vm2070_vm2, %v4865_v26, %v10081_v38 }
 0x450   : > { %v4885_v46 = vsel %vm381_vm1, %v4870_v30, 0 }
 0x452   : > { %v5047_v5 = vpop.permute.xlu1 %5046 }
 0x453   : > { %v5057_v21 = vsel %vm2214_vm5, %v5047_v5, %v10094_v4 }
 0x455   : > { %8273 = vmatmul.mubr.msk.bf16.vlgmr.msra.gmra.mrb[128].mxu0 %vm4158_vm6, %v10205_v27 }
 0x456   : > { %8285 = vmatpush3.bf16.msra.mxu0 %v10192_v12  ;;  %7672 = vmatmul.mubr.msk.bf16.vlgmr.msra.gmra.mrb[100].mxu1 %vm4158_vm6, %v8731_v22  ;;  %v5045_v11 = vpop.permute.xlu1 %5044 }
 0x457   : > { %8205 = vmatpush3.bf16.msra.mxu1 %v10043_v29  ;;  %8286 = vmatprep.subr.bf16.mxu0 %v8792_v0  ;;  %v10260_v29 = vpop.permute.xlu0 %5614  ;;  %v5056_v25 = vsel %vm2214_vm5, %v5045_v11, %v5047_v5 }
 0x458   : > { %8206 = vmatprep.subr.bf16.mxu1 %v8792_v0  ;;  %8276 = vmatprep.mubr.msk.bf16.mxu0 %vm8793_vm14, %v8792_v0 }
 0x459   : > { %4559 = vmatprep.mubr.bf16.mxu1 %v11135_v15 }
 0x45a   : > { %8287 = vmatpush3.bf16.msra.mxu0 %v5455_v31  ;;  %v5053_v38 = vpop.permute.xlu1 %5052 }
 0x45b   : > { %8207 = vmatpush3.bf16.msra.mxu1 %v4515_v44  ;;  %8300 = vmatprep.subr.bf16.mxu0 %v8792_v0  ;;  %v10270_v51 = vpop.permute.xlu0 %5618  ;;  %v5058_v4 = vsel %vm2214_vm5, %v10102_v35, %v5053_v38 }
 0x45c   : > { %4705 = vmatprep.subr.bf16.mxu1 %v4681_v7  ;;  %v5643_v40 = vsel %vm381_vm1, %v10270_v51, 0  ;;  %v5073_v60 = vsel %vm381_vm1, %v5058_v4, 0 }
 0x45d   : > { %8277 = vmatmul.mubr.msk.bf16.gmra.mrb[132].mxu0 %vm4158_vm6, %v10227_v59 }
 0x45e   : > { %7673 = vmatmul.mubr.msk.bf16.gmra.mrb[104].mxu1 %vm4158_vm6, %v8733_v9  ;;  %8280 = vmatprep.mubr.msk.bf16.mxu0 %vm8793_vm14, %v8792_v0  ;;  %v5235_v31 = vpop.permute.xlu1 %5234 }
 0x45f   : > { %4569 = vmatprep.mubr.bf16.mxu1 %v11135_v15  ;;  %v5245_v44 = vsel %vm11131_vm11, %v5235_v31, %v10134_v24 }
 0x465   : > { %8281 = vmatmul.mubr.msk.bf16.gmra.mrb[136].mxu0 %vm4158_vm6, %v10246_v43 }
 0x466   : > { %7674 = vmatmul.mubr.msk.bf16.gmra.mrb[140].mxu1 %vm4158_vm6, %v8735_v18  ;;  %8288 = vmatprep.mubr.msk.bf16.mxu0 %vm8793_vm14, %v8792_v0 }
 0x467   : > { %8208 = vmatprep.mubr.msk.bf16.mxu1 %vm8793_vm14, %v8792_v0 }
 0x46d   : > { %8289 = vmatmul.mubr.msk.bf16.vlgmr.msra.gmra.mrb[140].mxu0 %vm4158_vm6, %v10265_v10 }
 0x46e   : > { %8301 = vmatpush3.bf16.msra.mxu0 %v10248_v34  ;;  %8209 = vmatmul.mubr.msk.bf16.vlgmr.msra.gmra.mrb[144].mxu1 %vm4158_vm6, %v8731_v22  ;;  %v5059_v22 = vsel %vm2214_vm5, %v5053_v38, %v10118_v54 }
 0x46f   : > { %4706 = vmatpush1.bf16.msra.mxu1 %v4680_v53  ;;  %8302 = vmatprep.subr.bf16.mxu0 %v8792_v0 }
 0x470   : > { %7686 = vmatprep.subr.msk.bf16.mxu1 %vm381_vm1, %v4683_v17  ;;  %8212 = vmatprep.mubr.msk.bf16.mxu1 %vm8793_vm14, %v8792_v0 }
 0x471   : > { %8292 = vmatprep.mubr.msk.bf16.mxu0 %vm8793_vm14, %v8792_v0 }
 0x472   : > { %8303 = vmatpush3.bf16.msra.mxu0 %v5643_v40 }
 0x473   : > { %4708 = vmatpush1.bf16.msra.mxu1 %v4697_v61  ;;  %8316 = vmatprep.subr.bf16.mxu0 %v8792_v0 }
 0x474   : > { %8220 = vmatprep.subr.bf16.mxu1 %v8792_v0 }
 0x475   : > { %8293 = vmatmul.mubr.msk.bf16.gmra.mrb[144].mxu0 %vm4158_vm6, %v10289_v50 }
 0x476   : > { %8213 = vmatmul.mubr.msk.bf16.gmra.mrb[148].mxu1 %vm4158_vm6, %v8733_v9  ;;  %8296 = vmatprep.mubr.msk.bf16.mxu0 %vm8793_vm14, %v8792_v0 }
 0x477   : > { %8216 = vmatprep.mubr.msk.bf16.mxu1 %vm8793_vm14, %v8792_v0 }
 0x47d   : > { %8297 = vmatmul.mubr.msk.bf16.gmra.mrb[148].mxu0 %vm4158_vm6, %v10304_v6 }
 0x47e   : > { %8217 = vmatmul.mubr.msk.bf16.gmra.mrb[152].mxu1 %vm4158_vm6, %v8735_v18  ;;  %8304 = vmatprep.mubr.msk.bf16.mxu0 %vm8793_vm14, %v8792_v0 }
 0x47f   : > { %4737 = vmatprep.mubr.bf16.mxu1 %v11135_v15 }
 0x485   : > { %8305 = vmatmul.mubr.msk.bf16.vlgmr.msra.gmra.mrb[152].mxu0 %vm4158_vm6, %v10315_v3 }
 0x486   : > { %7687 = vmatmul.mubr.msk.bf16.vlgmr.msra.gmra.mrb[100].mxu1 %vm4158_vm6, %v8737_v42  ;;  %8308 = vmatprep.mubr.msk.bf16.mxu0 %vm8793_vm14, %v8792_v0 }
 0x487   : > { %8221 = vmatpush3.bf16.msra.mxu1 %v10055_v63  ;;  %4747 = vmatprep.mubr.bf16.mxu1 %v11135_v15  ;;  %v4869_v63 = vsel %vm2070_vm2, %v4859_v14, %v10073_v39  ;;  %v8739_v39 = vld [vmem:[%s11115_s3 + $0x4c] ss:$0 sps:$4 sm:$0xff]  }
 0x488   : > { %8222 = vmatprep.subr.bf16.mxu1 %v8792_v0 }
 0x48b   : > { %8223 = vmatpush3.bf16.msra.mxu1 %v4703_v55 }
 0x48c   : > { %4893 = vmatprep.subr.bf16.mxu1 %v4869_v63 }
 0x48d   : > { %8309 = vmatmul.mubr.msk.bf16.gmra.mrb[156].mxu0 %vm4158_vm6, %v10331_v2 }
 0x48e   : > { %7688 = vmatmul.mubr.msk.bf16.gmra.mrb[104].mxu1 %vm4158_vm6, %v8738_v62  ;;  %8312 = vmatprep.mubr.msk.bf16.mxu0 %vm8793_vm14, %v8792_v0 }
 0x48f   : > { %4757 = vmatprep.mubr.bf16.mxu1 %v11135_v15 }
 0x495   : > { %8313 = vmatmul.mubr.msk.bf16.gmra.mrb[160].mxu0 %vm4158_vm6, %v10349_v36 }
 0x496   : > { %7689 = vmatmul.mubr.msk.bf16.gmra.mrb[156].mxu1 %vm4158_vm6, %v8739_v39  ;;  %8322 = vmatprep.mubr.msk.bf16.mxu0 %vm8793_vm14, %v8792_v0 }
 0x497   : > { %8224 = vmatprep.mubr.msk.bf16.mxu1 %vm8793_vm14, %v8792_v0 }
 0x49e   : > { %8225 = vmatmul.mubr.msk.bf16.vlgmr.msra.gmra.mrb[160].mxu1 %vm4158_vm6, %v8737_v42 }
 0x49f   : > { %4894 = vmatpush1.bf16.msra.mxu1 %v4868_v37  ;;  %8228 = vmatprep.mubr.msk.bf16.mxu1 %vm8793_vm14, %v8792_v0 }
 0x4a0   : > { %7701 = vmatprep.subr.msk.bf16.mxu1 %vm381_vm1, %v4871_v8 }
 0x4a3   : > { %4896 = vmatpush1.bf16.msra.mxu1 %v4885_v46 }
 0x4a4   : > { %5081 = vmatprep.subr.bf16.mxu1 %v5057_v21 }
 0x4a6   : > { %8229 = vmatmul.mubr.msk.bf16.gmra.mrb[164].mxu1 %vm4158_vm6, %v8738_v62 }
 0x4a7   : > { %8232 = vmatprep.mubr.msk.bf16.mxu1 %vm8793_vm14, %v8792_v0 }
 0x4ae   : > { %8233 = vmatmul.mubr.msk.bf16.gmra.mrb[168].mxu1 %vm4158_vm6, %v8739_v39 }
 0x4af   : > { %4925 = vmatprep.mubr.bf16.mxu1 %v11135_v15 }
 0x4b6   : > { %7702 = vmatmul.mubr.msk.bf16.vlgmr.msra.gmra.mrb[100].mxu1 %vm4158_vm6, %v10088_v16  ;;  %v5233_v16 = vpop.permute.xlu1 %5232 }
 0x4b7   : > { %5082 = vmatpush1.bf16.msra.mxu1 %v5056_v25  ;;  %4935 = vmatprep.mubr.bf16.mxu1 %v11135_v15  ;;  %v5244_v54 = vsel %vm11131_vm11, %v5233_v16, %v5235_v31 }
 0x4b8   : > { %7716 = vmatprep.subr.msk.bf16.mxu1 %vm381_vm1, %v5059_v22 }
 0x4ba   : > { %v5241_v35 = vpop.permute.xlu1 %5240 }
 0x4bb   : > { %5084 = vmatpush1.bf16.msra.mxu1 %v5073_v60  ;;  %v5246_v24 = vsel %vm11131_vm11, %v10146_v32, %v5241_v35 }
 0x4bc   : > { %5269 = vmatprep.subr.bf16.mxu1 %v5245_v44  ;;  %v5261_v9 = vsel %vm381_vm1, %v5246_v24, 0 }
 0x4be   : > { %7703 = vmatmul.mubr.msk.bf16.gmra.mrb[104].mxu1 %vm4158_vm6, %v10109_v45  ;;  %v5247_v45 = vsel %vm11131_vm11, %v5241_v35, %v10156_v23 }
 0x4bf   : > { %4945 = vmatprep.mubr.bf16.mxu1 %v11135_v15 }
 0x4c6   : > { %7704 = vmatmul.mubr.msk.bf16.gmra.mrb[172].mxu1 %vm4158_vm6, %v10132_v19  ;;  %v5423_v19 = vpop.permute.xlu1 %5422 }
 0x4c7   : > { %5113 = vmatprep.mubr.bf16.mxu1 %v11135_v15  ;;  %v5433_v7 = vsel %vm11151_vm0, %v5423_v19, %v10192_v12 }
 0x4ca   : > { %v5421_v41 = vpop.permute.xlu1 %5420 }
 0x4ce   : > { %7717 = vmatmul.mubr.msk.bf16.vlgmr.msra.gmra.mrb[100].mxu1 %vm4158_vm6, %v10151_v48  ;;  %v5429_v56 = vpop.permute.xlu1 %5428 }
 0x4cf   : > { %5270 = vmatpush1.bf16.msra.mxu1 %v5244_v54  ;;  %5123 = vmatprep.mubr.bf16.mxu1 %v11135_v15  ;;  %v5434_v40 = vsel %vm11153_vm12, %v10200_v47, %v5429_v56 }
 0x4d0   : > { %7731 = vmatprep.subr.msk.bf16.mxu1 %vm381_vm1, %v5247_v45  ;;  %v5449_v55 = vsel %vm381_vm1, %v5434_v40, 0 }
 0x4d2   : > { %v5611_v42 = vpop.permute.xlu1 %5610 }
 0x4d3   : > { %5272 = vmatpush1.bf16.msra.mxu1 %v5261_v9 }
 0x4d4   : > { %5457 = vmatprep.subr.bf16.mxu1 %v5433_v7 }
 0x4d6   : > { %7718 = vmatmul.mubr.msk.bf16.gmra.mrb[104].mxu1 %vm4158_vm6, %v10175_v58  ;;  %v5432_v58 = vsel %vm11152_vm10, %v5421_v41, %v5423_v19  ;;  %vm11154_vm10 = vcmask 531456   ;;  %v5609_v26 = vpop.permute.xlu1 %5608 }
 0x4d7   : > { %5133 = vmatprep.mubr.bf16.mxu1 %v11135_v15  ;;  %v5621_v47 = vsel %vm11154_vm10, %v5611_v42, %v10248_v34  ;;  %vm11155_vm12 = vmmov %vm11154_vm10 }
 0x4d8   : > { %v5620_v5 = vsel %vm11155_vm12, %v5609_v26, %v5611_v42 }
 0x4d9   : > { %v4231_v32 = vpop.f32.mrb[108].mxu1 }
 0x4da   : > { %v4233_v48 = vpop.f32.mrb[109].mxu1 }
 0x4db   : > { %v4235_v23 = vpop.f32.mrb[110].mxu1 }
 0x4dc   : > { %v4236_v18 = vpop.f32.mrb[111].mxu1 }
 0x4de   : > { %7719 = vmatmul.mubr.msk.bf16.gmra.mrb[176].mxu1 %vm4158_vm6, %v10190_v1  ;;  %v5435_v1 = vsel %vm11151_vm0, %v5429_v56, %v10212_v52  ;;  %vm11156_vm0 = vmmov %vm11154_vm10 }
 0x4df   : > { %5301 = vmatprep.mubr.bf16.mxu1 %v11135_v15  ;;  %vm11157_vm10 = vmmov %vm11156_vm0 }
 0x4e1   : > { %v10414_v28 = vpop.f32.mrb[112].mxu1 }
 0x4e2   : > { %v8178_v53 = vpop.f32.mrb[113].mxu1 }
 0x4e3   : > { %v10416_v12 = vpop.f32.mrb[114].mxu1 }
 0x4e4   : > { %v8179_v17 = vpop.f32.mrb[115].mxu1 }
 0x4e6   : > { %7732 = vmatmul.mubr.msk.bf16.vlgmr.msra.gmra.mrb[100].mxu1 %vm4158_vm6, %v10205_v27 }
 0x4e7   : > { %5458 = vmatpush1.bf16.msra.mxu1 %v5432_v58  ;;  %5311 = vmatprep.mubr.bf16.mxu1 %v11135_v15 }
 0x4e8   : > { %7746 = vmatprep.subr.msk.bf16.mxu1 %vm381_vm1, %v5435_v1 }
 0x4e9   : > { %v10427_v61 = vpop.f32.mrb[116].mxu1 }
 0x4ea   : > { %v8182_v14 = vpop.f32.mrb[117].mxu1 }
 0x4eb   : > { %5460 = vmatpush1.bf16.msra.mxu1 %v5449_v55  ;;  %v10430_v62 = vpop.f32.mrb[118].mxu1 }
 0x4ec   : > { %5645 = vmatprep.subr.bf16.mxu1 %v5621_v47  ;;  %v8183_v27 = vpop.f32.mrb[119].mxu1 }
 0x4ee   : > { %7733 = vmatmul.mubr.msk.bf16.gmra.mrb[104].mxu1 %vm4158_vm6, %v10227_v59  ;;  %v5617_v59 = vpop.permute.xlu1 %5616 }
 0x4ef   : > { %5321 = vmatprep.mubr.bf16.mxu1 %v11135_v15  ;;  %v5622_v46 = vsel %vm11156_vm0, %v10260_v29, %v5617_v59 }
 0x4f0   : > { %v5637_v38 = vsel %vm381_vm1, %v5622_v46, 0 }
 0x4f1   : > { %v10437_v52 = vpop.f32.mrb[120].mxu1 }
 0x4f2   : > { %v8186_v63 = vpop.f32.mrb[121].mxu1 }
 0x4f3   : > { %v4291_v39 = vpop.f32.mrb[122].mxu1 }
 0x4f4   : > { %v8187_v49 = vpop.f32.mrb[123].mxu1 }
 0x4f6   : > { %7734 = vmatmul.mubr.msk.bf16.gmra.mrb[180].mxu1 %vm4158_vm6, %v10246_v43  ;;  %v5623_v43 = vsel %vm11157_vm10, %v5617_v59, %v10270_v51 }
 0x4f7   : > { %5489 = vmatprep.mubr.bf16.mxu1 %v11135_v15 }
 0x4f8   : > { %v10442_v37 = vpop.f32.mrb[104].mxu0 }
 0x4f9   : > { %v8242_v34 = vpop.f32.mrb[105].mxu0 }
 0x4fa   : > { %v10444_v30 = vpop.f32.mrb[106].mxu0 }
 0x4fb   : > { %v8243_v8 = vpop.f32.mrb[107].mxu0 }
 0x4fe   : > { %7747 = vmatmul.mubr.msk.bf16.vlgmr.msra.gmra.mrb[100].mxu1 %vm4158_vm6, %v10265_v10 }
 0x4ff   : > { %5646 = vmatpush1.bf16.msra.mxu1 %v5620_v5  ;;  %5499 = vmatprep.mubr.bf16.mxu1 %v11135_v15 }
 0x500   : > { %7761 = vmatprep.subr.msk.bf16.mxu1 %vm381_vm1, %v5623_v43  ;;  %v10455_v21 = vpop.f32.mrb[108].mxu0 }
 0x501   : > { %v8246_v11 = vpop.f32.mrb[109].mxu0 }
 0x502   : > { %v10458_v25 = vpop.f32.mrb[110].mxu0 }
 0x503   : > { %5648 = vmatpush1.bf16.msra.mxu1 %v5637_v38  ;;  %v8247_v10 = vpop.f32.mrb[111].mxu0 }
 0x506   : > { %7748 = vmatmul.mubr.msk.bf16.gmra.mrb[104].mxu1 %vm4158_vm6, %v10289_v50 }
 0x507   : > { %5509 = vmatprep.mubr.bf16.mxu1 %v11135_v15 }
 0x508   : > { %v10463_v29 = vpop.f32.mrb[112].mxu0 }
 0x509   : > { %v4398_v51 = vpop.f32.mrb[124].mxu1  ;;  %v8250_v4 = vpop.f32.mrb[113].mxu0 }
 0x50a   : > { %v4399_v22 = vadd.f32 %v4398_v51, %v4231_v32  ;;  %v4400_v31 = vpop.f32.mrb[125].mxu1  ;;  %v5007_v60 = vpop.f32.mrb[114].mxu0 }
 0x50b   : > { %v4401_v44 = vadd.f32 %v4400_v31, %v4233_v48  ;;  %v4402_v16 = vpop.f32.mrb[126].mxu1  ;;  %v8251_v35 = vpop.f32.mrb[115].mxu0 }
 0x50c   : > { %v4403_v54 = vpop.f32.mrb[127].mxu1 }
 0x50e   : > { %7749 = vmatmul.mubr.msk.bf16.gmra.mrb[184].mxu1 %vm4158_vm6, %v10304_v6 }
 0x50f   : > { %5677 = vmatprep.mubr.bf16.mxu1 %v11135_v15 }
 0x510   : > { %v10468_v24 = vpop.f32.mrb[116].mxu0 }
 0x511   : > { %v4439_v50 = vpop.f32.mrb[128].mxu1  ;;  %v8258_v45 = vpop.f32.mrb[117].mxu0 }
 0x512   : > { %v4440_v19 = vadd.f32 %v4439_v50, %v10414_v28  ;;  %v8194_v9 = vpop.f32.mrb[129].mxu1  ;;  %v10471_v7 = vpop.f32.mrb[118].mxu0 }
 0x513   : > { %v4442_v32 = vpop.f32.mrb[130].mxu1  ;;  %v8259_v23 = vpop.f32.mrb[119].mxu0 }
 0x514   : > { %v4443_v48 = vadd.f32 %v4442_v32, %v10416_v12  ;;  %v8195_v18 = vpop.f32.mrb[131].mxu1 }
 0x516   : > { %7762 = vmatmul.mubr.msk.bf16.vlgmr.msra.gmra.mrb[100].mxu1 %vm4158_vm6, %v10315_v3 }
 0x517   : > { %5687 = vmatprep.mubr.bf16.mxu1 %v11135_v15 }
 0x518   : > { %v10477_v6 = vpop.f32.mrb[120].mxu0 }
 0x519   : > { %v4447_v41 = vpop.f32.mrb[132].mxu1  ;;  %v8262_v53 = vpop.f32.mrb[121].mxu0 }
 0x51a   : > { %v4448_v56 = vadd.f32 %v4447_v41, %v10427_v61  ;;  %v8198_v28 = vpop.f32.mrb[133].mxu1  ;;  %v10480_v17 = vpop.f32.mrb[122].mxu0 }
 0x51b   : > { %v4450_v58 = vpop.f32.mrb[134].mxu1  ;;  %v8263_v40 = vpop.f32.mrb[123].mxu0 }
 0x51c   : > { %v4451_v1 = vadd.f32 %v4450_v58, %v10430_v62  ;;  %v8199_v12 = vpop.f32.mrb[135].mxu1 }
 0x51e   : > { %7763 = vmatmul.mubr.msk.bf16.gmra.mrb[104].mxu1 %vm4158_vm6, %v10331_v2 }
 0x51f   : > { %5697 = vmatprep.mubr.bf16.mxu1 %v11135_v15 }
 0x520   : > { %v10486_v3 = vpop.f32.mrb[124].mxu0 }
 0x521   : > { %v4455_v42 = vpop.f32.mrb[136].mxu1  ;;  %v8266_v14 = vpop.f32.mrb[125].mxu0 }
 0x522   : > { %v4456_v55 = vadd.f32 %v4455_v42, %v10437_v52  ;;  %v8202_v61 = vpop.f32.mrb[137].mxu1  ;;  %v5195_v47 = vpop.f32.mrb[126].mxu0 }
 0x523   : > { %v4458_v27 = vpop.f32.mrb[138].mxu1  ;;  %v8267_v63 = vpop.f32.mrb[127].mxu0 }
 0x524   : > { %v8203_v39 = vpop.f32.mrb[139].mxu1 }
 0x526   : > { %7764 = vmatmul.mubr.msk.bf16.gmra.mrb[188].mxu1 %vm4158_vm6, %v10349_v36 }
 0x527   : > { %6110 = vmatprep.mubr.bf16.mxu1 %v11135_v15 }
 0x528   : > { %v10492_v62 = vpop.f32.mrb[128].mxu0 }
 0x529   : > { %v8274_v2 = vpop.f32.mrb[129].mxu0 }
 0x52a   : > { %v10494_v49 = vpop.f32.mrb[130].mxu0 }
 0x52b   : > { %v8275_v26 = vpop.f32.mrb[131].mxu0 }
 0x530   : > { %v10496_v34 = vpop.f32.mrb[132].mxu0 }
 0x531   : > { %v8278_v8 = vpop.f32.mrb[133].mxu0 }
 0x532   : > { %v10498_v52 = vpop.f32.mrb[134].mxu0 }
 0x533   : > { %v8279_v59 = vpop.f32.mrb[135].mxu0 }
 0x538   : > { %v10500_v5 = vpop.f32.mrb[136].mxu0 }
 0x539   : > { %v4571_v46 = vpop.f32.mrb[140].mxu1  ;;  %v8282_v43 = vpop.f32.mrb[137].mxu0 }
 0x53a   : > { %v4646_v11 = vadd.f32 %v4571_v46, %v4399_v22  ;;  %v4573_v36 = vpop.f32.mrb[141].mxu1  ;;  %v5383_v38 = vpop.f32.mrb[138].mxu0 }
 0x53b   : > { %v4647_v10 = vadd.f32 %v4573_v36, %v4401_v44  ;;  %v4575_v51 = vpop.f32.mrb[142].mxu1  ;;  %v8283_v4 = vpop.f32.mrb[139].mxu0 }
 0x53c   : > { %v4576_v31 = vpop.f32.mrb[143].mxu1 }
 0x540   : > { %v5552_v60 = vpop.f32.mrb[140].mxu0 }
 0x541   : > { %v4612_v16 = vpop.f32.mrb[144].mxu1  ;;  %v8290_v35 = vpop.f32.mrb[141].mxu0 }
 0x542   : > { %v4636_v54 = vadd.f32 %v4612_v16, %v4440_v19  ;;  %v8210_v50 = vpop.f32.mrb[145].mxu1  ;;  %v10502_v45 = vpop.f32.mrb[142].mxu0 }
 0x543   : > { %v4615_v9 = vpop.f32.mrb[146].mxu1  ;;  %v8291_v32 = vpop.f32.mrb[143].mxu0 }
 0x544   : > { %v4639_v23 = vadd.f32 %v4615_v9, %v4443_v48  ;;  %v8211_v18 = vpop.f32.mrb[147].mxu1 }
 0x548   : > { %v10504_v41 = vpop.f32.mrb[144].mxu0 }
 0x549   : > { %v4620_v22 = vpop.f32.mrb[148].mxu1  ;;  %v8294_v53 = vpop.f32.mrb[145].mxu0 }
 0x54a   : > { %v4642_v28 = vadd.f32 %v4620_v22, %v4448_v56  ;;  %v8214_v44 = vpop.f32.mrb[149].mxu1  ;;  %v10506_v58 = vpop.f32.mrb[146].mxu0 }
 0x54b   : > { %v4623_v40 = vpop.f32.mrb[150].mxu1  ;;  %v8295_v12 = vpop.f32.mrb[147].mxu0 }
 0x54c   : > { %v4645_v42 = vadd.f32 %v4623_v40, %v4451_v1  ;;  %v8215_v14 = vpop.f32.mrb[151].mxu1 }
 0x550   : > { %v10508_v19 = vpop.f32.mrb[148].mxu0 }
 0x551   : > { %v4628_v61 = vpop.f32.mrb[152].mxu1  ;;  %v8298_v47 = vpop.f32.mrb[149].mxu0 }
 0x552   : > { %v4648_v27 = vadd.f32 %v4628_v61, %v4456_v55  ;;  %v8218_v63 = vpop.f32.mrb[153].mxu1  ;;  %v5571_v48 = vpop.f32.mrb[150].mxu0 }
 0x553   : > { %v4631_v39 = vpop.f32.mrb[154].mxu1  ;;  %v8299_v2 = vpop.f32.mrb[151].mxu0 }
 0x554   : > { %v8219_v26 = vpop.f32.mrb[155].mxu1 }
 0x558   : > { %v5740_v8 = vpop.f32.mrb[152].mxu0 }
 0x559   : > { %v8306_v59 = vpop.f32.mrb[153].mxu0 }
 0x55a   : > { %v5743_v56 = vpop.f32.mrb[154].mxu0 }
 0x55b   : > { %v8307_v46 = vpop.f32.mrb[155].mxu0 }
 0x560   : > { %v5748_v43 = vpop.f32.mrb[156].mxu0 }
 0x561   : > { %v8310_v36 = vpop.f32.mrb[157].mxu0 }
 0x562   : > { %v10510_v38 = vpop.f32.mrb[158].mxu0 }
 0x563   : > { %v8311_v1 = vpop.f32.mrb[159].mxu0 }
 0x564   : > { %v10526_v1 = vpop.permute.xlu1 %5784 }
 0x568   : > { %v10512_v51 = vpop.f32.mrb[160].mxu0 }
 0x569   : > { %v4759_v4 = vpop.f32.mrb[156].mxu1  ;;  %v8314_v31 = vpop.f32.mrb[161].mxu0 }
 0x56a   : > { %v10514_v16 = vadd.f32 %v4759_v4, %v4646_v11  ;;  %v4761_v55 = vpop.f32.mrb[157].mxu1  ;;  %v5759_v35 = vpop.f32.mrb[162].mxu0 }
 0x56b   : > { %v10516_v50 = vadd.f32 %v4761_v55, %v4647_v10  ;;  %v4763_v9 = vpop.f32.mrb[158].mxu1  ;;  %v8315_v32 = vpop.f32.mrb[163].mxu0 }
 0x56c   : > { %v4764_v18 = vpop.f32.mrb[159].mxu1 }
 0x571   : > { %v4800_v22 = vpop.f32.mrb[160].mxu1 }
 0x572   : > { %v4824_v53 = vadd.f32 %v4800_v22, %v4636_v54  ;;  %v8226_v44 = vpop.f32.mrb[161].mxu1 }
 0x573   : > { %v4803_v40 = vpop.f32.mrb[162].mxu1 }
 0x574   : > { %v5012_v12 = vadd.f32 %v10442_v37, %v4824_v53  ;;  %v4827_v14 = vadd.f32 %v4803_v40, %v4639_v23  ;;  %v8227_v61 = vpop.f32.mrb[163].mxu1  ;;  %v10542_v40 = vpop.permute.xlu1 %5794 }
 0x576   : > { %v5200_v47 = vadd.f32 %v10468_v24, %v5012_v12  ;;  %v5015_v11 = vadd.f32 %v10444_v30, %v4827_v14 }
 0x578   : > { %v5203_v63 = vadd.f32 %v10471_v7, %v5015_v11  ;;  %v5388_v10 = vadd.f32 %v10492_v62, %v5200_v47 }
 0x579   : > { %v4808_v48 = vpop.f32.mrb[164].mxu1 }
 0x57a   : > { %v4830_v39 = vadd.f32 %v4808_v48, %v4642_v28  ;;  %v8230_v2 = vpop.f32.mrb[165].mxu1  ;;  %v5576_v26 = vadd.f32 %v5552_v60, %v5388_v10  ;;  %v5391_v54 = vadd.f32 %v10494_v49, %v5203_v63  ;;  %v10531_v60 = vpop.permute.xlu0 %5789 }
 0x57b   : > { %v4811_v59 = vpop.f32.mrb[166].mxu1 }
 0x57c   : > { %v5018_v46 = vadd.f32 %v10455_v21, %v4830_v39  ;;  %v4833_v37 = vadd.f32 %v4811_v59, %v4645_v42  ;;  %v5764_v23 = vadd.f32 %v5740_v8, %v5576_v26  ;;  %v8231_v36 = vpop.f32.mrb[167].mxu1  ;;  %v5579_v24 = vadd.f32 %v10502_v45, %v5391_v54 }
 0x57e   : > { %v5206_v30 = vadd.f32 %v10477_v6, %v5018_v46  ;;  %v5021_v7 = vadd.f32 %v10458_v25, %v4833_v37  ;;  %v5809_v62 = vadd.f32 %v10526_v1, %v5764_v23  ;;  %v5767_v28 = vadd.f32 %v5743_v56, %v5579_v24 }
 0x580   : > { %v5209_v49 = vadd.f32 %v10480_v17, %v5021_v7  ;;  %vm5824_vm1 = vcmp.gt.f32.partialorder %v5809_v62, 0.0  ;;  %v5839_v21 = vmul.f32 0.01, %v5809_v62  ;;  %v5812_v42 = vadd.f32 %v10531_v60, %v5767_v28 }
 0x581   : > { %v4816_v8 = vpop.f32.mrb[168].mxu1  ;;  %v5394_v45 = vadd.f32 %v10496_v34, %v5206_v30 }
 0x582   : > { %v5854_v4 = vsel %vm5824_vm1, %v5809_v62, %v5839_v21  ;;  %vm5827_vm6 = vcmp.gt.f32.partialorder %v5812_v42, 0.0  ;;  %v5842_v31 = vmul.f32 0.01, %v5812_v42  ;;  %v4836_v6 = vadd.f32 %v4816_v8, %v4648_v27  ;;  %v8234_v55 = vpop.f32.mrb[169].mxu1 }
 0x583   : > { %v4819_v25 = vpop.f32.mrb[170].mxu1  ;;  %v5582_v35 = vadd.f32 %v10504_v41, %v5394_v45  ;;  %v5397_v56 = vadd.f32 %v10498_v52, %v5209_v49  ;;  %v5869_v9 = vmul.f32 %v5854_v4, %v9889_v33  ;;  %v5800_v55 = vpop.permute.xlu0 %5799 }
 0x584   : > { %v5857_v17 = vsel %vm5827_vm6, %v5812_v42, %v5842_v31  ;;  %v5024_v32 = vadd.f32 %v10463_v29, %v4836_v6  ;;  %v8235_v18 = vpop.f32.mrb[171].mxu1 }
 0x585   : > { %v5770_v22 = vadd.f32 %v5748_v43, %v5582_v35  ;;  %v5585_v53 = vadd.f32 %v10506_v58, %v5397_v56  ;;  %v7853_v34 = vpack.c.bf16 %v5869_v9, %v5869_v9  ;;  %v5872_v44 = vmul.f32 %v5857_v17, %v9889_v33 }
 0x586   : > { %v5212_v27 = vadd.f32 %v10486_v3, %v5024_v32 }
 0x587   : > { %v5815_v41 = vadd.f32 %v10542_v40, %v5770_v22  ;;  %v5773_v52 = vadd.f32 %v10510_v38, %v5585_v53  ;;  %5927 = vrot.lane.b32.xlu0 %v7853_v34, %s8791_s14  ;;  %v7855_v12 = vpack.c.bf16 %v5872_v44, %v5872_v44 }
 0x588   : > { %v5400_v29 = vadd.f32 %v10500_v5, %v5212_v27 }
 0x589   : > { %vm5830_vm12 = vcmp.gt.f32.partialorder %v5815_v41, 0.0  ;;  %v5845_v43 = vmul.f32 0.01, %v5815_v41  ;;  %5931 = vrot.lane.b32.xlu1 %v7855_v12, %s8791_s14  ;;  %v5818_v56 = vadd.f32 %v5800_v55, %v5773_v52 }
 0x58a   : > { %v5588_v58 = vadd.f32 %v10508_v19, %v5400_v29 }
 0x58b   : > { %v5860_v14 = vsel %vm5830_vm12, %v5815_v41, %v5845_v43  ;;  %v5848_v29 = vmul.f32 0.01, %v5818_v56 }
 0x58c   : > { %v10552_v61 = vadd.f32 %v10512_v51, %v5588_v58  ;;  %v5875_v3 = vmul.f32 %v5860_v14, %v9889_v33  ;;  %v5805_v14 = vpop.permute.xlu1 %5804 }
 0x58e   : > { %v7857_v47 = vpack.c.bf16 %v5875_v3, %v5875_v3 }
 0x590   : > { %5935 = vrot.lane.b32.xlu0 %v7857_v47, %s8791_s14 }
 0x599   : > { %v4947_v38 = vpop.f32.mrb[172].mxu1 }
 0x59a   : > { %v5022_v11 = vadd.f32 %v4947_v38, %v10514_v16  ;;  %v4949_v63 = vpop.f32.mrb[173].mxu1 }
 0x59b   : > { %v5023_v5 = vadd.f32 %v4949_v63, %v10516_v50  ;;  %v4951_v10 = vpop.f32.mrb[174].mxu1  ;;  %v5821_v63 = vadd.f32 %v5805_v14, %v10552_v61 }
 0x59c   : > { %v4952_v48 = vpop.f32.mrb[175].mxu1 }
 0x59d   : > { %vm5836_vm11 = vcmp.gt.f32.partialorder %v5821_v63, 0.0 }
 0x5b1   : > { %v5135_v39 = vpop.f32.mrb[176].mxu1 }
 0x5b2   : > { %v5210_v2 = vadd.f32 %v5135_v39, %v5022_v11  ;;  %v5137_v19 = vpop.f32.mrb[177].mxu1 }
 0x5b3   : > { %v5211_v26 = vadd.f32 %v5137_v19, %v5023_v5  ;;  %v5139_v54 = vpop.f32.mrb[178].mxu1 }
 0x5b4   : > { %v5140_v51 = vpop.f32.mrb[179].mxu1 }
 0x5c9   : > { %v5323_v59 = vpop.f32.mrb[180].mxu1 }
 0x5ca   : > { %v5398_v46 = vadd.f32 %v5323_v59, %v5210_v2  ;;  %v5325_v37 = vpop.f32.mrb[181].mxu1  ;;  %v5851_v59 = vmul.f32 0.01, %v5821_v63 }
 0x5cb   : > { %v5399_v23 = vadd.f32 %v5325_v37, %v5211_v26  ;;  %v5327_v36 = vpop.f32.mrb[182].mxu1 }
 0x5cc   : > { %v5328_v24 = vpop.f32.mrb[183].mxu1 }
 0x5e1   : > { %v5511_v30 = vpop.f32.mrb[184].mxu1 }
 0x5e2   : > { %v10558_v7 = vadd.f32 %v5511_v30, %v5398_v46  ;;  %v5513_v16 = vpop.f32.mrb[185].mxu1 }
 0x5e3   : > { %v10560_v62 = vadd.f32 %v5513_v16, %v5399_v23  ;;  %v5515_v50 = vpop.f32.mrb[186].mxu1 }
 0x5e4   : > { %v5516_v28 = vpop.f32.mrb[187].mxu1 }
 0x5e9   : > { %v5679_v49 = vpop.f32.mrb[100].mxu1 }
 0x5ea   : > { %v5807_v21 = vadd.f32 %v10526_v1, %v5679_v49  ;;  %v5681_v42 = vpop.f32.mrb[101].mxu1 }
 0x5eb   : > { %v5808_v8 = vadd.f32 %v10526_v1, %v5681_v42  ;;  %v5683_v45 = vpop.f32.mrb[102].mxu1 }
 0x5ec   : > { %vm5822_vm0 = vcmp.gt.f32.partialorder %v5807_v21, 0.0  ;;  %v5837_v4 = vmul.f32 0.01, %v5807_v21  ;;  %v5810_v31 = vadd.f32 %v10531_v60, %v5683_v45  ;;  %v5685_v6 = vpop.f32.mrb[103].mxu1 }
 0x5ed   : > { %vm5823_vm10 = vcmp.gt.f32.partialorder %v5808_v8, 0.0  ;;  %v5838_v25 = vmul.f32 0.01, %v5808_v8  ;;  %v5811_v35 = vadd.f32 %v10531_v60, %v5685_v6 }
 0x5ee   : > { %v5852_v9 = vsel %vm5822_vm0, %v5807_v21, %v5837_v4  ;;  %vm5825_vm1 = vcmp.gt.f32.partialorder %v5810_v31, 0.0  ;;  %v5840_v17 = vmul.f32 0.01, %v5810_v31 }
 0x5ef   : > { %v5867_v32 = vmul.f32 %v5852_v9, %v9914_v13  ;;  %v5853_v18 = vsel %vm5823_vm10, %v5808_v8, %v5838_v25  ;;  %vm5826_vm6 = vcmp.gt.f32.partialorder %v5811_v35, 0.0  ;;  %v5841_v1 = vmul.f32 0.01, %v5811_v35 }
 0x5f0   : > { %v5868_v22 = vmul.f32 %v5853_v18, %v9917_v20  ;;  %v5855_v53 = vsel %vm5825_vm1, %v5810_v31, %v5840_v17  ;;  %vm5833_vm10 = vcmp.gt.f32.partialorder %v5818_v56, 0.0  ;;  %v5866_v8 = vsel %vm5836_vm11, %v5821_v63, %v5851_v59 }
 0x5f1   : > { %v5870_v34 = vmul.f32 %v5855_v53, %v9914_v13  ;;  %v5856_v44 = vsel %vm5826_vm6, %v5811_v35, %v5841_v1  ;;  %v5689_v27 = vpop.f32.mrb[104].mxu1  ;;  %v5863_v51 = vsel %vm5833_vm10, %v5818_v56, %v5848_v29  ;;  %vm6068_vm11 = vcmask 1043456  }
 0x5f2   : > { %v5871_v41 = vmul.f32 %v5856_v44, %v9917_v20  ;;  %v5813_v60 = vadd.f32 %v10542_v40, %v5689_v27  ;;  %v5691_v52 = vpop.f32.mrb[105].mxu1  ;;  %v7852_v12 = vpack.c.bf16 %v5868_v22, %v5867_v32  ;;  %v5878_v21 = vmul.f32 %v5863_v51, %v9889_v33 }
 0x5f3   : > { %v5814_v43 = vadd.f32 %v10542_v40, %v5691_v52  ;;  %v5693_v58 = vpop.f32.mrb[106].mxu1 }
 0x5f4   : > { %vm5828_vm12 = vcmp.gt.f32.partialorder %v5813_v60, 0.0  ;;  %v5843_v3 = vmul.f32 0.01, %v5813_v60  ;;  %v5816_v47 = vadd.f32 %v5800_v55, %v5693_v58  ;;  %v5695_v38 = vpop.f32.mrb[107].mxu1  ;;  %5925 = vrot.lane.b32.xlu0 %v7852_v12, %s8791_s14  ;;  %v7854_v11 = vpack.c.bf16 %v5871_v41, %v5870_v34 }
 0x5f5   : > { %vm5829_vm0 = vcmp.gt.f32.partialorder %v5814_v43, 0.0  ;;  %v5844_v5 = vmul.f32 0.01, %v5814_v43  ;;  %v5817_v10 = vadd.f32 %v5800_v55, %v5695_v38  ;;  %v7859_v6 = vpack.c.bf16 %v5878_v21, %v5878_v21 }
 0x5f6   : > { %v5858_v48 = vsel %vm5828_vm12, %v5813_v60, %v5843_v3  ;;  %vm5831_vm1 = vcmp.gt.f32.partialorder %v5816_v47, 0.0  ;;  %v5846_v39 = vmul.f32 0.01, %v5816_v47  ;;  %5929 = vrot.lane.b32.xlu1 %v7854_v11, %s8791_s14 }
 0x5f7   : > { %v5873_v40 = vmul.f32 %v5858_v48, %v9914_v13  ;;  %v5859_v2 = vsel %vm5829_vm0, %v5814_v43, %v5844_v5  ;;  %vm5832_vm6 = vcmp.gt.f32.partialorder %v5817_v10, 0.0  ;;  %v5847_v19 = vmul.f32 0.01, %v5817_v10 }
 0x5f8   : > { %v5874_v26 = vmul.f32 %v5859_v2, %v9917_v20  ;;  %v5861_v54 = vsel %vm5831_vm1, %v5816_v47, %v5846_v39 }
 0x5f9   : > { %v5876_v61 = vmul.f32 %v5861_v54, %v9914_v13  ;;  %v5862_v46 = vsel %vm5832_vm6, %v5817_v10, %v5847_v19  ;;  %v5699_v37 = vpop.f32.mrb[188].mxu1  ;;  %v5928_v17 = vpop.permute.xlu0 %5927 }
 0x5fa   : > { %v5877_v23 = vmul.f32 %v5862_v46, %v9917_v20  ;;  %v5774_v36 = vadd.f32 %v5699_v37, %v10558_v7  ;;  %v5701_v24 = vpop.f32.mrb[189].mxu1  ;;  %v7856_v30 = vpack.c.bf16 %v5874_v26, %v5873_v40 }
 0x5fb   : > { %v5775_v16 = vadd.f32 %v5701_v24, %v10560_v62  ;;  %v5703_v50 = vpop.f32.mrb[190].mxu1  ;;  %v5881_v62 = vmul.f32 %v5866_v8, %v9889_v33  ;;  %v5932_v18 = vpop.permute.xlu1 %5931 }
 0x5fc   : > { %v5819_v28 = vadd.f32 %v5805_v14, %v5774_v36  ;;  %5933 = vrot.lane.b32.xlu0 %v7856_v30, %s8791_s14  ;;  %v7858_v49 = vpack.c.bf16 %v5877_v23, %v5876_v61  ;;  %v5704_v42 = vpop.f32.mrb[191].mxu1 }
 0x5fd   : > { %v5820_v45 = vadd.f32 %v5805_v14, %v5775_v16  ;;  %v7861_v56 = vpack.c.bf16 %v5881_v62, %v5881_v62 }
 0x5fe   : > { %vm5834_vm12 = vcmp.gt.f32.partialorder %v5819_v28, 0.0  ;;  %v5849_v4 = vmul.f32 0.01, %v5819_v28  ;;  %5937 = vrot.lane.b32.xlu1 %v7858_v49, %s8791_s14 }
 0x5ff   : > { %vm5835_vm0 = vcmp.gt.f32.partialorder %v5820_v45, 0.0  ;;  %v5850_v7 = vmul.f32 0.01, %v5820_v45 }
 0x600   : > { %v5864_v31 = vsel %vm5834_vm12, %v5819_v28, %v5849_v4 }
 0x601   : > { %v5879_v55 = vmul.f32 %v5864_v31, %v9914_v13  ;;  %v5865_v25 = vsel %vm5835_vm0, %v5820_v45, %v5850_v7  ;;  %vm11170_vm0 = vcmask 531456  }
 0x602   : > { %v5880_v35 = vmul.f32 %v5865_v25, %v9917_v20  ;;  %5939 = vrot.lane.b32.xlu1 %v7859_v6, %s8791_s14  ;;  %v5936_v32 = vpop.permute.xlu0 %5935 }
 0x604   : > { %v7860_v9 = vpack.c.bf16 %v5880_v35, %v5879_v55 }
 0x606   : > { %5943 = vrot.lane.b32.xlu1 %v7861_v56, %s8791_s14  ;;  %5941 = vrot.lane.b32.xlu0 %v7860_v9, %s8791_s14 }
 0x666   : > { %v5926_v1 = vpop.permute.xlu0 %5925 }
 0x667   : > { %v5945_v22 = vrot.slane %v5926_v1, 4 }
 0x668   : > { %v5930_v53 = vpop.permute.xlu1 %5929 }
 0x669   : > { %v5950_v33 = vsel %vm4061_vm15, %v5945_v22, %v5926_v1  ;;  %v5951_v13 = vsel %vm4061_vm15, %v5945_v22, %v5928_v17  ;;  %v5946_v34 = vrot.slane %v5930_v53, 4 }
 0x66a   : > { %5970 = vst.msk [vmem:[#allocation3] sm:$0xff] %vm9935_vm3, %v5950_v33 }
 0x66b   : > { %5971 = vst.msk [vmem:[#allocation3 + $0x8] sm:$0xf] %vm4078_vm4, %v5951_v13  ;;  %v5952_v20 = vsel %vm4061_vm15, %v5946_v34, %v5930_v53  ;;  %v5953_v44 = vsel %vm4061_vm15, %v5946_v34, %v5932_v18 }
 0x66c   : > { %5972 = vst.msk [vmem:[#allocation3 + $0x10] sm:$0xff] %vm9935_vm3, %v5952_v20 }
 0x66d   : > { %5973 = vst.msk [vmem:[#allocation3 + $0x18] sm:$0xf] %vm4078_vm4, %v5953_v44 }
 0x66e   : > { %v5934_v27 = vpop.permute.xlu0 %5933 }
 0x66f   : > { %v5947_v41 = vrot.slane %v5934_v27, 4 }
 0x670   : > { %v5938_v60 = vpop.permute.xlu1 %5937 }
 0x671   : > { %v5954_v52 = vsel %vm4061_vm15, %v5947_v41, %v5934_v27  ;;  %v5955_v12 = vsel %vm4061_vm15, %v5947_v41, %v5936_v32  ;;  %v5948_v29 = vrot.slane %v5938_v60, 4  ;;  %v5982_v43 = vld [vmem:[#allocation3] sm:$0xff]  ;;  %v7273_v27 = vld [vmem:[%s11118_s6] sm:$0xff] }
 0x672   : > { %5974 = vst.msk [vmem:[#allocation3 + $0x20] sm:$0xff] %vm9935_vm3, %v5954_v52  ;;  %v5983_v58 = vld [vmem:[#allocation3 + $0x8] sm:$0xf]  ;;  %v7274_v52 = vld [vmem:[%s11118_s6 + $0x8] sm:$0xff] }
 0x673   : > { %5975 = vst.msk [vmem:[#allocation3 + $0x28] sm:$0xf] %vm4078_vm4, %v5955_v12  ;;  %v5984_v14 = vld [vmem:[#allocation3 + $0x10] sm:$0xff]  ;;  %v5956_v47 = vsel %vm4061_vm15, %v5948_v29, %v5938_v60 }
 0x674   : > { %v5985_v3 = vld [vmem:[#allocation3 + $0x18] sm:$0xf]  ;;  %v10606_v38 = vcombine.high %v5982_v43, %v5984_v14  ;;  %5976 = vst.msk [vmem:[#allocation3 + $0x30] sm:$0xff] %vm9935_vm3, %v5956_v47  ;;  %v5940_v11 = vpop.permute.xlu1 %5939  ;;  %v10618_v10 = vcombine.low %v5982_v43, %v5984_v14 }
 0x675   : > { %v10610_v63 = vcombine.low %v5983_v58, %v5985_v3  ;;  %v5957_v5 = vsel %vm4061_vm15, %v5948_v29, %v5940_v11 }
 0x676   : > { %5977 = vst.msk [vmem:[#allocation3 + $0x38] sm:$0xf] %vm4078_vm4, %v5957_v5  ;;  %6036 = vrot.lane.b32.xlu0 %v10606_v38, %s8773_s19 }
 0x677   : > { %6038 = vrot.lane.b32.xlu1 %v10610_v63, %s8773_s19 }
 0x678   : > { %v5942_v48 = vpop.permute.xlu0 %5941  ;;  %v5944_v40 = vpop.permute.xlu1 %5943 }
 0x679   : > { %v5949_v39 = vrot.slane %v5942_v48, 4  ;;  %v5986_v26 = vld [vmem:[#allocation3 + $0x20] sm:$0xff] }
 0x67a   : > { %6034 = vrot.lane.b32.xlu0 %v10618_v10, %s8773_s19  ;;  %v5987_v59 = vld [vmem:[#allocation3 + $0x28] sm:$0xf] }
 0x67b   : > { %6169 = vrot.lane.b32.xlu1 %v10606_v38, %s8772_s18  ;;  %v5958_v2 = vsel %vm4061_vm15, %v5949_v39, %v5942_v48  ;;  %v5959_v19 = vsel %vm4061_vm15, %v5949_v39, %v5944_v40  ;;  %v5988_v57 = vld [vmem:[#allocation3 + $0x30] sm:$0xff]  ;;  %v8748_v39 = vld [vmem:[%s11117_s5 + $0x8] sm:$0xff]   ;;  %vm6064_vm15 = vcmask 326656  }
 0x67c   : > { %5978 = vst.msk [vmem:[#allocation3 + $0x40] sm:$0xff] %vm9935_vm3, %v5958_v2  ;;  %v10649_v54 = vcombine.high %v5986_v26, %v5988_v57  ;;  %v10655_v61 = vcombine.low %v5986_v26, %v5988_v57  ;;  %vm11164_vm3 = vcmask 539648  }
 0x67d   : > { %5979 = vst.msk [vmem:[#allocation3 + $0x48] sm:$0xf] %vm4078_vm4, %v5959_v19  ;;  %v5989_v51 = vld [vmem:[#allocation3 + $0x38] sm:$0xf]  ;;  %vm11165_vm4 = vmmov %vm11164_vm3 }
 0x67e   : > { %6171 = vrot.lane.b32.xlu0 %v10610_v63, %s8772_s18  ;;  %v10657_v46 = vcombine.low %v5987_v59, %v5989_v51  ;;  %vm11166_vm10 = vmmov %vm11164_vm3 }
 0x67f   : > { %6167 = vrot.lane.b32.xlu1 %v10618_v10, %s8772_s18  ;;  %vm11167_vm1 = vmmov %vm11164_vm3 }
 0x680   : > { %vm11168_vm6 = vmmov %vm11167_vm1 }
 0x681   : > { %vm11169_vm12 = vmmov %vm11167_vm1 }
 0x682   : > { %6303 = vrot.lane.b32.xlu0 %v10606_v38, %s8774_s20 }
 0x683   : > { %6305 = vrot.lane.b32.xlu1 %v10610_v63, %s8774_s20  ;;  %v5990_v37 = vld [vmem:[#allocation3 + $0x40] sm:$0xff] }
 0x684   : > { %v10687_v23 = vcombine.low %v5990_v37, %v5990_v37  ;;  %v10689_v36 = vcombine.high %v5990_v37, %v5990_v37  ;;  %v10695_v24 = vld [vmem:[#allocation3 + $0x48] ss:$0 sps:$4 sm:$0xff]  }
 0x686   : > { %6301 = vrot.lane.b32.xlu0 %v10618_v10, %s8774_s20 }
 0x687   : > { %6443 = vrot.lane.b32.xlu1 %v10606_v38, %s8777_s23 }
 0x68a   : > { %6445 = vrot.lane.b32.xlu0 %v10610_v63, %s8777_s23 }
 0x68b   : > { %6441 = vrot.lane.b32.xlu1 %v10618_v10, %s8777_s23 }
 0x68e   : > { %6583 = vrot.lane.b32.xlu0 %v10606_v38, %s8778_s24 }
 0x68f   : > { %6585 = vrot.lane.b32.xlu1 %v10610_v63, %s8778_s24 }
 0x692   : > { %6581 = vrot.lane.b32.xlu0 %v10618_v10, %s8778_s24 }
 0x693   : > { %6042 = vrot.lane.b32.xlu1 %v10649_v54, %s8773_s19 }
 0x696   : > { %6044 = vrot.lane.b32.xlu0 %v10657_v46, %s8773_s19 }
 0x697   : > { %6040 = vrot.lane.b32.xlu1 %v10655_v61, %s8773_s19 }
 0x69a   : > { %6175 = vrot.lane.b32.xlu0 %v10649_v54, %s8772_s18 }
 0x69b   : > { %6177 = vrot.lane.b32.xlu1 %v10657_v46, %s8772_s18 }
 0x69e   : > { %6173 = vrot.lane.b32.xlu0 %v10655_v61, %s8772_s18 }
 0x69f   : > { %6309 = vrot.lane.b32.xlu1 %v10649_v54, %s8774_s20 }
 0x6a2   : > { %6311 = vrot.lane.b32.xlu0 %v10657_v46, %s8774_s20 }
 0x6a3   : > { %6307 = vrot.lane.b32.xlu1 %v10655_v61, %s8774_s20 }
 0x6a6   : > { %6449 = vrot.lane.b32.xlu0 %v10649_v54, %s8777_s23 }
 0x6a7   : > { %6451 = vrot.lane.b32.xlu1 %v10657_v46, %s8777_s23 }
 0x6aa   : > { %6447 = vrot.lane.b32.xlu0 %v10655_v61, %s8777_s23 }
 0x6ab   : > { %6589 = vrot.lane.b32.xlu1 %v10649_v54, %s8778_s24 }
 0x6ae   : > { %6591 = vrot.lane.b32.xlu0 %v10657_v46, %s8778_s24 }
 0x6af   : > { %6587 = vrot.lane.b32.xlu1 %v10655_v61, %s8778_s24 }
 0x6b2   : > { %6046 = vrot.lane.b32.xlu0 %v10687_v23, %s8773_s19 }
 0x6b3   : > { %6048 = vrot.lane.b32.xlu1 %v10689_v36, %s8773_s19 }
 0x6b6   : > { %6050 = vrot.lane.b32.xlu0 %v10695_v24, %s8773_s19 }
 0x6b7   : > { %6723 = vrot.lane.b32.xlu1 %v10606_v38, %s8779_s25 }
 0x6ba   : > { %6725 = vrot.lane.b32.xlu0 %v10610_v63, %s8779_s25 }
 0x6bb   : > { %6179 = vrot.lane.b32.xlu1 %v10687_v23, %s8772_s18 }
 0x6be   : > { %6181 = vrot.lane.b32.xlu0 %v10689_v36, %s8772_s18 }
 0x6bf   : > { %6183 = vrot.lane.b32.xlu1 %v10695_v24, %s8772_s18 }
 0x6c2   : > { %6729 = vrot.lane.b32.xlu0 %v10649_v54, %s8779_s25 }
 0x6c3   : > { %6721 = vrot.lane.b32.xlu1 %v10618_v10, %s8779_s25 }
 0x6c6   : > { %6727 = vrot.lane.b32.xlu0 %v10655_v61, %s8779_s25 }
 0x6c7   : > { %6731 = vrot.lane.b32.xlu1 %v10657_v46, %s8779_s25 }
 0x6ca   : > { %6313 = vrot.lane.b32.xlu0 %v10687_v23, %s8774_s20 }
 0x6cb   : > { %6315 = vrot.lane.b32.xlu1 %v10689_v36, %s8774_s20 }
 0x6ce   : > { %6317 = vrot.lane.b32.xlu0 %v10695_v24, %s8774_s20  ;;  %s8623_s20 = smul.u32 24, %s11177_s28 }
 0x6cf   : > { %6865 = vrot.lane.b32.xlu1 %v10610_v63, %s8782_s30 }
 0x6d2   : > { %6863 = vrot.lane.b32.xlu0 %v10606_v38, %s8782_s30 }
 0x6d3   : > { %6453 = vrot.lane.b32.xlu1 %v10687_v23, %s8777_s23 }
 0x6d6   : > { %6861 = vrot.lane.b32.xlu0 %v10618_v10, %s8782_s30 }
 0x6d7   : > { %6457 = vrot.lane.b32.xlu1 %v10695_v24, %s8777_s23 }
 0x6da   : > { %6455 = vrot.lane.b32.xlu0 %v10689_v36, %s8777_s23 }
 0x6db   : > { %6869 = vrot.lane.b32.xlu1 %v10649_v54, %s8782_s30 }
 0x6de   : > { %6871 = vrot.lane.b32.xlu0 %v10657_v46, %s8782_s30 }
 0x6df   : > { %6867 = vrot.lane.b32.xlu1 %v10655_v61, %s8782_s30 }
 0x6e2   : > { %6593 = vrot.lane.b32.xlu0 %v10687_v23, %s8778_s24 }
 0x6e3   : > { %6595 = vrot.lane.b32.xlu1 %v10689_v36, %s8778_s24 }
 0x6e6   : > { %6597 = vrot.lane.b32.xlu0 %v10695_v24, %s8778_s24 }
 0x6e7   : > { %7003 = vrot.lane.b32.xlu1 %v10606_v38, %s8783_s9 }
 0x6e8   : > { %v6037_v30 = vpop.permute.xlu0 %6036 }
 0x6e9   : > { %v6039_v16 = vpop.permute.xlu1 %6038 }
 0x6ea   : > { %8317 = vmatpush3.bf16.msra.mxu0 %v6039_v16  ;;  %v6053_v50 = vsel %vm1350_vm8, %v6037_v30, %v6039_v16  ;;  %7005 = vrot.lane.b32.xlu0 %v10610_v63, %s8783_s9 }
 0x6eb   : > { %6733 = vrot.lane.b32.xlu1 %v10687_v23, %s8779_s25  ;;  %6078 = vmatprep.subr.bf16.mxu1 %v6053_v50 }
 0x6ec   : > { %8318 = vmatprep.subr.bf16.mxu0 %v8792_v0  ;;  %v6035_v28 = vpop.permute.xlu0 %6034 }
 0x6ed   : > { %v10755_v49 = vpop.permute.xlu1 %6169  ;;  %v6052_v21 = vsel %vm1350_vm8, %v6035_v28, %v6037_v30  ;;  %v8749_v30 = vld [vmem:[%s11117_s5] sm:$0xff]  }
 0x6ee   : > { %6735 = vrot.lane.b32.xlu0 %v10689_v36, %s8779_s25  ;;  %6079 = vmatpush1.bf16.msra.mxu1 %v6052_v21 }
 0x6ef   : > { %6737 = vrot.lane.b32.xlu1 %v10695_v24, %s8779_s25  ;;  %s305_s25 = scalar_lea.vmem %s11120_s8, %s8623_s20 }
 0x6f0   : > { %v10762_v42 = vpop.permute.xlu0 %6171 }
 0x6f1   : > { %v10764_v8 = vpop.permute.xlu1 %6167  ;;  %v6186_v2 = vsel %vm1206_vm7, %v10755_v49, %v10762_v42 }
 0x6f2   : > { %7009 = vrot.lane.b32.xlu0 %v10649_v54, %s8783_s9  ;;  %v6185_v26 = vsel %vm1206_vm7, %v10764_v8, %v10755_v49 }
 0x6f3   : > { %7001 = vrot.lane.b32.xlu1 %v10618_v10, %s8783_s9 }
 0x6f4   : > { %v6304_v45 = vpop.permute.xlu0 %6303 }
 0x6f5   : > { %v10770_v4 = vpop.permute.xlu1 %6305 }
 0x6f6   : > { %v10774_v7 = vsel %vm1494_vm9, %v6304_v45, %v10770_v4  ;;  %7007 = vrot.lane.b32.xlu0 %v10655_v61, %s8783_s9 }
 0x6f7   : > { %7011 = vrot.lane.b32.xlu1 %v10657_v46, %s8783_s9 }
 0x6f8   : > { %v6302_v31 = vpop.permute.xlu0 %6301 }
 0x6f9   : > { %v10780_v6 = vpop.permute.xlu1 %6443  ;;  %v10783_v62 = vsel %vm1494_vm9, %v6302_v31, %v6304_v45 }
 0x6fa   : > { %6873 = vrot.lane.b32.xlu0 %v10687_v23, %s8782_s30 }
 0x6fb   : > { %6875 = vrot.lane.b32.xlu1 %v10689_v36, %s8782_s30 }
 0x6fc   : > { %v10789_v55 = vpop.permute.xlu0 %6445 }
 0x6fd   : > { %v6442_v25 = vpop.permute.xlu1 %6441 }
 0x6fe   : > { %v10793_v35 = vsel %vm1926_vm13, %v6442_v25, %v10780_v6  ;;  %6877 = vrot.lane.b32.xlu0 %v10695_v24, %s8782_s30  ;;  %v8750_v25 = vld [vmem:[%s11117_s5 + $0x10] sm:$0xff]  }
 0x6ff   : > { %7145 = vrot.lane.b32.xlu1 %v10610_v63, %s8784_s10 }
 0x700   : > { %v10799_v56 = vpop.permute.xlu0 %6583 }
 0x701   : > { %v10801_v9 = vpop.permute.xlu1 %6585 }
 0x702   : > { %7143 = vrot.lane.b32.xlu0 %v10606_v38, %s8784_s10 }
 0x703   : > { %7013 = vrot.lane.b32.xlu1 %v10687_v23, %s8783_s9 }
 0x704   : > { %v6582_v17 = vpop.permute.xlu0 %6581 }
 0x705   : > { %v6043_v32 = vpop.permute.xlu1 %6042  ;;  %v10809_v18 = vsel %vm2070_vm2, %v6582_v17, %v10799_v56 }
 0x706   : > { %7141 = vrot.lane.b32.xlu0 %v10618_v10, %s8784_s10 }
 0x707   : > { %7017 = vrot.lane.b32.xlu1 %v10695_v24, %s8783_s9 }
 0x708   : > { %v6045_v1 = vpop.permute.xlu0 %6044 }
 0x709   : > { %v6041_v22 = vpop.permute.xlu1 %6040  ;;  %8319 = vmatpush3.bf16.msra.mxu0 %v6045_v1  ;;  %v6055_v33 = vsel %vm1350_vm8, %v6043_v32, %v6045_v1 }
 0x70a   : > { %v6054_v53 = vsel %vm1350_vm8, %v6041_v22, %v6043_v32  ;;  %7015 = vrot.lane.b32.xlu0 %v10689_v36, %s8783_s9  ;;  %6080 = vmatprep.subr.bf16.mxu1 %v6055_v33  ;;  %v6460_v32 = vsel %vm1926_vm13, %v10780_v6, %v10789_v55 }
 0x70b   : > { %7149 = vrot.lane.b32.xlu1 %v10649_v54, %s8784_s10  ;;  %8320 = vmatprep.subr.bf16.mxu0 %v8792_v0 }
 0x70c   : > { %6081 = vmatpush1.bf16.msra.mxu1 %v6054_v53  ;;  %v6176_v13 = vpop.permute.xlu0 %6175 }
 0x70d   : > { %v6178_v34 = vpop.permute.xlu1 %6177 }
 0x70e   : > { %7151 = vrot.lane.b32.xlu0 %v10657_v46, %s8784_s10  ;;  %v6188_v54 = vsel %vm1206_vm7, %v6176_v13, %v6178_v34 }
 0x70f   : > { %7147 = vrot.lane.b32.xlu1 %v10655_v61, %s8784_s10 }
 0x710   : > { %v6174_v20 = vpop.permute.xlu0 %6173 }
 0x711   : > { %v10826_v44 = vpop.permute.xlu1 %6309  ;;  %v6187_v61 = vsel %vm1206_vm7, %v6174_v20, %v6176_v13 }
 0x712   : > { %7153 = vrot.lane.b32.xlu0 %v10687_v23, %s8784_s10 }
 0x713   : > { %7155 = vrot.lane.b32.xlu1 %v10689_v36, %s8784_s10 }
 0x714   : > { %v10835_v41 = vpop.permute.xlu0 %6311 }
 0x715   : > { %v10837_v60 = vpop.permute.xlu1 %6307  ;;  %v6322_v49 = vsel %vm1494_vm9, %v10826_v44, %v10835_v41 }
 0x716   : > { %7157 = vrot.lane.b32.xlu0 %v10695_v24, %s8784_s10  ;;  %v6321_v8 = vsel %vm1494_vm9, %v10837_v60, %v10826_v44  ;;  %v6600_v60 = vsel %vm2070_vm2, %v10799_v56, %v10801_v9 }
 0x717   : > { %7277 = vperm.xlu1 %8661, %v7273_v27   ;;  %v8751_v27 = vld [vmem:[%s11117_s5 + $0x18] sm:$0xff]  }
 0x718   : > { %v10844_v12 = vpop.permute.xlu0 %6449 }
 0x719   : > { %v10846_v29 = vpop.permute.xlu1 %6451 }
 0x71a   : > { %7282 = vperm.xlu0 %8662, %v7274_v52   ;;  %v6462_v53 = vsel %vm1926_vm13, %v10844_v12, %v10846_v29 }
 0x71c   : > { %v10848_v43 = vpop.permute.xlu0 %6447 }
 0x71d   : > { %v10850_v58 = vpop.permute.xlu1 %6589 }
 0x720   : > { %v10852_v14 = vpop.permute.xlu0 %6591 }
 0x721   : > { %v10854_v3 = vpop.permute.xlu1 %6587 }
 0x724   : > { %v6047_v47 = vpop.permute.xlu0 %6046 }
 0x725   : > { %v6049_v38 = vpop.permute.xlu1 %6048 }
 0x726   : > { %v6056_v11 = vsel %vm1350_vm8, %v6047_v47, %v6049_v38 }
 0x727   : > { %v6070_v40 = vsel %vm6068_vm11, %v6056_v11, 0 }
 0x728   : > { %v6051_v63 = vpop.permute.xlu0 %6050 }
 0x729   : > { %v10857_v5 = vpop.permute.xlu1 %6723  ;;  %v6057_v10 = vsel %vm1350_vm8, %v6049_v38, %v6051_v63  ;;  %v6076_v48 = vsel %vm6068_vm11, %v6051_v63, 0 }
 0x72a   : > { %7790 = vmatprep.subr.msk.bf16.mxu1 %vm6068_vm11, %v6057_v10  ;;  %8321 = vmatpush3.bf16.msra.mxu0 %v6076_v48  ;;  %v8752_v10 = vld [vmem:[%s11117_s5 + $0x20] sm:$0xff]  }
 0x72b   : > { %6083 = vmatpush1.bf16.msra.mxu1 %v6070_v40  ;;  %8326 = vmatprep.subr.bf16.mxu0 %v8792_v0 }
 0x72c   : > { %v10870_v19 = vpop.permute.xlu0 %6725  ;;  %6209 = vmatprep.subr.bf16.mxu1 %v6186_v2 }
 0x72d   : > { %v6180_v57 = vpop.permute.xlu1 %6179  ;;  %8323 = vmatmul.mubr.msk.bf16.vlgmr.msra.gmra.mrb[164].mxu0 %vm6064_vm15, %v8748_v39 }
 0x72e   : > { %7791 = vmatmul.mubr.msk.bf16.vlgmr.msra.gmra.mrb[192].mxu1 %vm6064_vm15, %v8748_v39  ;;  %8327 = vmatpush3.bf16.msra.mxu0 %v10762_v42 }
 0x72f   : > { %6210 = vmatpush1.bf16.msra.mxu1 %v6185_v26  ;;  %8328 = vmatprep.subr.bf16.mxu0 %v8792_v0 }
 0x730   : > { %v6182_v51 = vpop.permute.xlu0 %6181  ;;  %6211 = vmatprep.subr.bf16.mxu1 %v6188_v54  ;;  %8332 = vmatprep.mubr.msk.bf16.mxu0 %vm8793_vm14, %v8792_v0 }
 0x731   : > { %v6184_v59 = vpop.permute.xlu1 %6183  ;;  %6241 = vmatprep.mubr.bf16.mxu1 %v11135_v15  ;;  %v6189_v46 = vsel %vm1206_vm7, %v6180_v57, %v6182_v51 }
 0x732   : > { %8329 = vmatpush3.bf16.msra.mxu0 %v6178_v34  ;;  %v6190_v37 = vsel %vm1206_vm7, %v6182_v51, %v6184_v59  ;;  %v6207_v24 = vsel %vm6068_vm11, %v6184_v59, 0  ;;  %v6201_v16 = vsel %vm6068_vm11, %v6189_v46, 0  ;;  %vm11158_vm7 = vcmask 547840  }
 0x733   : > { %6212 = vmatpush1.bf16.msra.mxu1 %v6187_v61  ;;  %8330 = vmatprep.subr.bf16.mxu0 %v8792_v0  ;;  %v8753_v61 = vld [vmem:[%s11117_s5 + $0x28] sm:$0xff]   ;;  %vm11159_vm8 = vmmov %vm11158_vm7 }
 0x734   : > { %v10887_v23 = vpop.permute.xlu0 %6729  ;;  %7794 = vmatprep.subr.msk.bf16.mxu1 %vm6068_vm11, %v6190_v37 }
 0x735   : > { %v10890_v36 = vpop.permute.xlu1 %6721 }
 0x736   : > { %8331 = vmatpush3.bf16.msra.mxu0 %v6207_v24  ;;  %v6739_v39 = vsel %vm2214_vm5, %v10890_v36, %v10857_v5 }
 0x737   : > { %6214 = vmatpush1.bf16.msra.mxu1 %v6201_v16  ;;  %8336 = vmatprep.subr.bf16.mxu0 %v8792_v0 }
 0x738   : > { %v10898_v50 = vpop.permute.xlu0 %6727  ;;  %6343 = vmatprep.subr.bf16.mxu1 %v10774_v7 }
 0x739   : > { %v10901_v28 = vpop.permute.xlu1 %6731  ;;  %8333 = vmatmul.mubr.msk.bf16.vlgmr.msra.gmra.mrb[168].mxu0 %vm6064_vm15, %v8749_v30 }
 0x73a   : > { %7795 = vmatmul.mubr.msk.bf16.vlgmr.msra.gmra.mrb[192].mxu1 %vm6064_vm15, %v8749_v30  ;;  %8337 = vmatpush3.bf16.msra.mxu0 %v10770_v4  ;;  %v6742_v40 = vsel %vm2214_vm5, %v10887_v23, %v10901_v28 }
 0x73b   : > { %6344 = vmatpush1.bf16.msra.mxu1 %v10783_v62  ;;  %8338 = vmatprep.subr.bf16.mxu0 %v8792_v0 }
 0x73c   : > { %v6314_v21 = vpop.permute.xlu0 %6313  ;;  %6345 = vmatprep.subr.bf16.mxu1 %v6322_v49  ;;  %8342 = vmatprep.mubr.msk.bf16.mxu0 %vm8793_vm14, %v8792_v0 }
 0x73d   : > { %v6316_v42 = vpop.permute.xlu1 %6315  ;;  %6375 = vmatprep.mubr.bf16.mxu1 %v11135_v15 }
 0x73e   : > { %8339 = vmatpush3.bf16.msra.mxu0 %v10835_v41  ;;  %v6323_v45 = vsel %vm1494_vm9, %v6314_v21, %v6316_v42 }
 0x73f   : > { %6346 = vmatpush1.bf16.msra.mxu1 %v6321_v8  ;;  %8340 = vmatprep.subr.bf16.mxu0 %v8792_v0  ;;  %v6335_v17 = vsel %vm6068_vm11, %v6323_v45, 0 }
 0x740   : > { %v6318_v4 = vpop.permute.xlu0 %6317 }
 0x741   : > { %v10920_v7 = vpop.permute.xlu1 %6865  ;;  %v6324_v31 = vsel %vm1494_vm9, %v6316_v42, %v6318_v4  ;;  %v6341_v62 = vsel %vm6068_vm11, %v6318_v4, 0  ;;  %vm11160_vm9 = vmmov %vm11158_vm7  ;;  %v8754_v4 = vld [vmem:[%s11117_s5 + $0x30] sm:$0xff]  }
 0x742   : > { %7800 = vmatprep.subr.msk.bf16.mxu1 %vm6068_vm11, %v6324_v31  ;;  %8341 = vmatpush3.bf16.msra.mxu0 %v6341_v62 }
 0x743   : > { %6348 = vmatpush1.bf16.msra.mxu1 %v6335_v17  ;;  %8346 = vmatprep.subr.bf16.mxu0 %v8792_v0 }
 0x744   : > { %v10933_v1 = vpop.permute.xlu0 %6863  ;;  %6483 = vmatprep.subr.bf16.mxu1 %v6460_v32 }
 0x745   : > { %v6454_v22 = vpop.permute.xlu1 %6453  ;;  %8343 = vmatmul.mubr.msk.bf16.vlgmr.msra.gmra.mrb[172].mxu0 %vm6064_vm15, %v8750_v25  ;;  %v6880_v37 = vsel %vm11158_vm7, %v10933_v1, %v10920_v7 }
 0x746   : > { %7801 = vmatmul.mubr.msk.bf16.vlgmr.msra.gmra.mrb[192].mxu1 %vm6064_vm15, %v8750_v25  ;;  %8347 = vmatpush3.bf16.msra.mxu0 %v10789_v55  ;;  %v6461_v55 = vsel %vm1926_vm13, %v10848_v43, %v10844_v12 }
 0x747   : > { %6484 = vmatpush1.bf16.msra.mxu1 %v10793_v35  ;;  %8348 = vmatprep.subr.bf16.mxu0 %v8792_v0 }
 0x748   : > { %v10943_v6 = vpop.permute.xlu0 %6861  ;;  %6485 = vmatprep.subr.bf16.mxu1 %v6462_v53  ;;  %8352 = vmatprep.mubr.msk.bf16.mxu0 %vm8793_vm14, %v8792_v0 }
 0x749   : > { %v6458_v33 = vpop.permute.xlu1 %6457  ;;  %6515 = vmatprep.mubr.bf16.mxu1 %v11135_v15  ;;  %v6879_v24 = vsel %vm11159_vm8, %v10943_v6, %v10933_v1  ;;  %vm11172_vm8 = vmmov %vm11170_vm0 }
 0x74a   : > { %8349 = vmatpush3.bf16.msra.mxu0 %v10846_v29  ;;  %v6481_v34 = vsel %vm6068_vm11, %v6458_v33, 0  ;;  %v6602_v29 = vsel %vm2070_vm2, %v10850_v58, %v10852_v14 }
 0x74b   : > { %6486 = vmatpush1.bf16.msra.mxu1 %v6461_v55  ;;  %8350 = vmatprep.subr.bf16.mxu0 %v8792_v0 }
 0x74c   : > { %v6456_v35 = vpop.permute.xlu0 %6455 }
 0x74d   : > { %v10953_v13 = vpop.permute.xlu1 %6869  ;;  %v6463_v20 = vsel %vm1926_vm13, %v6454_v22, %v6456_v35  ;;  %v6464_v44 = vsel %vm1926_vm13, %v6456_v35, %v6458_v33  ;;  %vm11161_vm13 = vmmov %vm11158_vm7 }
 0x74e   : > { %v6475_v41 = vsel %vm6068_vm11, %v6463_v20, 0  ;;  %7806 = vmatprep.subr.msk.bf16.mxu1 %vm6068_vm11, %v6464_v44  ;;  %8351 = vmatpush3.bf16.msra.mxu0 %v6481_v34  ;;  %v8755_v34 = vld [vmem:[%s11117_s5 + $0x38] sm:$0xff]  }
 0x74f   : > { %6488 = vmatpush1.bf16.msra.mxu1 %v6475_v41  ;;  %8356 = vmatprep.subr.bf16.mxu0 %v8792_v0 }
 0x750   : > { %v10967_v52 = vpop.permute.xlu0 %6871  ;;  %6623 = vmatprep.subr.bf16.mxu1 %v6600_v60 }
 0x751   : > { %v10969_v12 = vpop.permute.xlu1 %6867  ;;  %8353 = vmatmul.mubr.msk.bf16.vlgmr.msra.gmra.mrb[176].mxu0 %vm6064_vm15, %v8751_v27  ;;  %v6882_v30 = vsel %vm11160_vm9, %v10953_v13, %v10967_v52  ;;  %vm11173_vm9 = vmmov %vm11170_vm0 }
 0x752   : > { %7807 = vmatmul.mubr.msk.bf16.vlgmr.msra.gmra.mrb[192].mxu1 %vm6064_vm15, %v8751_v27  ;;  %8357 = vmatpush3.bf16.msra.mxu0 %v10801_v9  ;;  %v6601_v9 = vsel %vm2070_vm2, %v10854_v3, %v10850_v58 }
 0x753   : > { %6624 = vmatpush1.bf16.msra.mxu1 %v10809_v18  ;;  %8358 = vmatprep.subr.bf16.mxu0 %v8792_v0 }
 0x754   : > { %v6594_v56 = vpop.permute.xlu0 %6593  ;;  %6625 = vmatprep.subr.bf16.mxu1 %v6602_v29  ;;  %8362 = vmatprep.mubr.msk.bf16.mxu0 %vm8793_vm14, %v8792_v0 }
 0x755   : > { %v6596_v43 = vpop.permute.xlu1 %6595  ;;  %6655 = vmatprep.mubr.bf16.mxu1 %v11135_v15 }
 0x756   : > { %8359 = vmatpush3.bf16.msra.mxu0 %v10852_v14  ;;  %v6603_v18 = vsel %vm2070_vm2, %v6594_v56, %v6596_v43  ;;  %v6740_v14 = vsel %vm2214_vm5, %v10857_v5, %v10870_v19  ;;  %v6741_v5 = vsel %vm2214_vm5, %v10898_v50, %v10887_v23 }
 0x757   : > { %6626 = vmatpush1.bf16.msra.mxu1 %v6601_v9  ;;  %8360 = vmatprep.subr.bf16.mxu0 %v8792_v0  ;;  %v6615_v58 = vsel %vm6068_vm11, %v6603_v18, 0 }
 0x758   : > { %v6598_v47 = vpop.permute.xlu0 %6597 }
 0x759   : > { %v10988_v38 = vpop.permute.xlu1 %7003  ;;  %v6604_v11 = vsel %vm2070_vm2, %v6596_v43, %v6598_v47  ;;  %v6621_v63 = vsel %vm6068_vm11, %v6598_v47, 0  ;;  %vm11162_vm2 = vmmov %vm11158_vm7 }
 0x75a   : > { %7812 = vmatprep.subr.msk.bf16.mxu1 %vm6068_vm11, %v6604_v11  ;;  %8361 = vmatpush3.bf16.msra.mxu0 %v6621_v63  ;;  %vm11171_vm7 = vmmov %vm11170_vm0 }
 0x75b   : > { %6628 = vmatpush1.bf16.msra.mxu1 %v6615_v58  ;;  %8366 = vmatprep.subr.bf16.mxu0 %v8792_v0 }
 0x75c   : > { %v11001_v3 = vpop.permute.xlu0 %7005  ;;  %6763 = vmatprep.subr.bf16.mxu1 %v6740_v14 }
 0x75d   : > { %v6734_v48 = vpop.permute.xlu1 %6733  ;;  %8363 = vmatmul.mubr.msk.bf16.vlgmr.msra.gmra.mrb[180].mxu0 %vm6064_vm15, %v8752_v10  ;;  %v7020_v31 = vsel %vm11164_vm3, %v10988_v38, %v11001_v3 }
 0x75e   : > { %7813 = vmatmul.mubr.msk.bf16.vlgmr.msra.gmra.mrb[192].mxu1 %vm6064_vm15, %v8752_v10  ;;  %8367 = vmatpush3.bf16.msra.mxu0 %v10870_v19 }
 0x75f   : > { %6764 = vmatpush1.bf16.msra.mxu1 %v6739_v39  ;;  %8368 = vmatprep.subr.bf16.mxu0 %v8792_v0 }
 0x760   : > { %v6736_v2 = vpop.permute.xlu0 %6735  ;;  %6765 = vmatprep.subr.bf16.mxu1 %v6742_v40  ;;  %8372 = vmatprep.mubr.msk.bf16.mxu0 %vm8793_vm14, %v8792_v0 }
 0x761   : > { %v6738_v57 = vpop.permute.xlu1 %6737  ;;  %6795 = vmatprep.mubr.bf16.mxu1 %v11135_v15  ;;  %v6743_v19 = vsel %vm2214_vm5, %v6734_v48, %v6736_v2 }
 0x762   : > { %8369 = vmatpush3.bf16.msra.mxu0 %v10901_v28  ;;  %v6744_v26 = vsel %vm2214_vm5, %v6736_v2, %v6738_v57  ;;  %v6761_v59 = vsel %vm6068_vm11, %v6738_v57, 0  ;;  %v6755_v46 = vsel %vm6068_vm11, %v6743_v19, 0  ;;  %v6881_v28 = vsel %vm11161_vm13, %v10969_v12, %v10953_v13  ;;  %vm11163_vm5 = vmmov %vm11162_vm2 }
 0x763   : > { %6766 = vmatpush1.bf16.msra.mxu1 %v6741_v5  ;;  %8370 = vmatprep.subr.bf16.mxu0 %v8792_v0  ;;  %vm11174_vm13 = vmmov %vm11170_vm0 }
 0x764   : > { %v7010_v54 = vpop.permute.xlu0 %7009  ;;  %7818 = vmatprep.subr.msk.bf16.mxu1 %vm6068_vm11, %v6744_v26 }
 0x765   : > { %v7002_v51 = vpop.permute.xlu1 %7001 }
 0x766   : > { %8371 = vmatpush3.bf16.msra.mxu0 %v6761_v59  ;;  %v7019_v17 = vsel %vm11165_vm4, %v7002_v51, %v10988_v38  ;;  %v8756_v38 = vld [vmem:[%s11117_s5 + $0x40] sm:$0xff]  }
 0x767   : > { %6768 = vmatpush1.bf16.msra.mxu1 %v6755_v46  ;;  %8376 = vmatprep.subr.bf16.mxu0 %v8792_v0 }
 0x768   : > { %v7008_v23 = vpop.permute.xlu0 %7007  ;;  %6903 = vmatprep.subr.bf16.mxu1 %v6880_v37 }
 0x769   : > { %v7012_v36 = vpop.permute.xlu1 %7011  ;;  %8373 = vmatmul.mubr.msk.bf16.vlgmr.msra.gmra.mrb[184].mxu0 %vm6064_vm15, %v8753_v61  ;;  %v7021_v53 = vsel %vm11167_vm1, %v7008_v23, %v7010_v54 }
 0x76a   : > { %7819 = vmatmul.mubr.msk.bf16.vlgmr.msra.gmra.mrb[192].mxu1 %vm6064_vm15, %v8753_v61  ;;  %8377 = vmatpush3.bf16.msra.mxu0 %v10920_v7  ;;  %v7022_v32 = vsel %vm11166_vm10, %v7010_v54, %v7012_v36 }
 0x76b   : > { %6904 = vmatpush1.bf16.msra.mxu1 %v6879_v24  ;;  %8378 = vmatprep.subr.bf16.mxu0 %v8792_v0 }
 0x76c   : > { %v6874_v16 = vpop.permute.xlu0 %6873  ;;  %6905 = vmatprep.subr.bf16.mxu1 %v6882_v30  ;;  %8382 = vmatprep.mubr.msk.bf16.mxu0 %vm8793_vm14, %v8792_v0 }
 0x76d   : > { %v6876_v50 = vpop.permute.xlu1 %6875  ;;  %6935 = vmatprep.mubr.bf16.mxu1 %v11135_v15 }
 0x76e   : > { %8379 = vmatpush3.bf16.msra.mxu0 %v10967_v52  ;;  %v6883_v49 = vsel %vm11162_vm2, %v6874_v16, %v6876_v50  ;;  %vm11175_vm2 = vmmov %vm11170_vm0 }
 0x76f   : > { %6906 = vmatpush1.bf16.msra.mxu1 %v6881_v28  ;;  %8380 = vmatprep.subr.bf16.mxu0 %v8792_v0  ;;  %v6895_v7 = vsel %vm6068_vm11, %v6883_v49, 0 }
 0x770   : > { %v6878_v21 = vpop.permute.xlu0 %6877 }
 0x771   : > { %v7146_v42 = vpop.permute.xlu1 %7145  ;;  %v6884_v8 = vsel %vm11163_vm5, %v6876_v50, %v6878_v21  ;;  %v6901_v45 = vsel %vm6068_vm11, %v6878_v21, 0 }
 0x772   : > { %7824 = vmatprep.subr.msk.bf16.mxu1 %vm6068_vm11, %v6884_v8  ;;  %8381 = vmatpush3.bf16.msra.mxu0 %v6901_v45 }
 0x773   : > { %6908 = vmatpush1.bf16.msra.mxu1 %v6895_v7  ;;  %8386 = vmatprep.subr.bf16.mxu0 %v8792_v0 }
 0x774   : > { %v7144_v62 = vpop.permute.xlu0 %7143  ;;  %7043 = vmatprep.subr.bf16.mxu1 %v7020_v31 }
 0x775   : > { %v7014_v25 = vpop.permute.xlu1 %7013  ;;  %8383 = vmatmul.mubr.msk.bf16.vlgmr.msra.gmra.mrb[188].mxu0 %vm6064_vm15, %v8754_v4  ;;  %v7160_v44 = vsel %vm11170_vm0, %v7144_v62, %v7146_v42 }
 0x776   : > { %7825 = vmatmul.mubr.msk.bf16.vlgmr.msra.gmra.mrb[192].mxu1 %vm6064_vm15, %v8754_v4  ;;  %8387 = vmatpush3.bf16.msra.mxu0 %v11001_v3 }
 0x777   : > { %7044 = vmatpush1.bf16.msra.mxu1 %v7019_v17  ;;  %8388 = vmatprep.subr.bf16.mxu0 %v8792_v0 }
 0x778   : > { %v7142_v1 = vpop.permute.xlu0 %7141  ;;  %7045 = vmatprep.subr.bf16.mxu1 %v7022_v32  ;;  %8392 = vmatprep.mubr.msk.bf16.mxu0 %vm8793_vm14, %v8792_v0 }
 0x779   : > { %v7018_v22 = vpop.permute.xlu1 %7017  ;;  %7075 = vmatprep.mubr.bf16.mxu1 %v11135_v15  ;;  %v7159_v60 = vsel %vm11171_vm7, %v7142_v1, %v7144_v62 }
 0x77a   : > { %8389 = vmatpush3.bf16.msra.mxu0 %v7012_v36  ;;  %v7041_v55 = vsel %vm6068_vm11, %v7018_v22, 0 }
 0x77b   : > { %7046 = vmatpush1.bf16.msra.mxu1 %v7021_v53  ;;  %8390 = vmatprep.subr.bf16.mxu0 %v8792_v0 }
 0x77c   : > { %v7016_v6 = vpop.permute.xlu0 %7015 }
 0x77d   : > { %v7150_v33 = vpop.permute.xlu1 %7149  ;;  %v7023_v35 = vsel %vm11168_vm6, %v7014_v25, %v7016_v6  ;;  %v7024_v13 = vsel %vm11169_vm12, %v7016_v6, %v7018_v22 }
 0x77e   : > { %v7035_v20 = vsel %vm6068_vm11, %v7023_v35, 0  ;;  %7830 = vmatprep.subr.msk.bf16.mxu1 %vm6068_vm11, %v7024_v13  ;;  %8391 = vmatpush3.bf16.msra.mxu0 %v7041_v55 }
 0x77f   : > { %7048 = vmatpush1.bf16.msra.mxu1 %v7035_v20  ;;  %8396 = vmatprep.subr.bf16.mxu0 %v8792_v0 }
 0x780   : > { %v7152_v27 = vpop.permute.xlu0 %7151  ;;  %7183 = vmatprep.subr.bf16.mxu1 %v7160_v44 }
 0x781   : > { %v7148_v41 = vpop.permute.xlu1 %7147  ;;  %8393 = vmatmul.mubr.msk.bf16.vlgmr.msra.gmra.mrb[192].mxu0 %vm6064_vm15, %v8755_v34  ;;  %v7162_v52 = vsel %vm11172_vm8, %v7150_v33, %v7152_v27 }
 0x782   : > { %7831 = vmatmul.mubr.msk.bf16.vlgmr.msra.gmra.mrb[192].mxu1 %vm6064_vm15, %v8755_v34  ;;  %8397 = vmatpush3.bf16.msra.mxu0 %v7146_v42  ;;  %v7161_v56 = vsel %vm11173_vm9, %v7148_v41, %v7150_v33 }
 0x783   : > { %7184 = vmatpush1.bf16.msra.mxu1 %v7159_v60  ;;  %8398 = vmatprep.subr.bf16.mxu0 %v8792_v0 }
 0x784   : > { %v7154_v12 = vpop.permute.xlu0 %7153  ;;  %7185 = vmatprep.subr.bf16.mxu1 %v7162_v52  ;;  %8402 = vmatprep.mubr.msk.bf16.mxu0 %vm8793_vm14, %v8792_v0  ;;  %vm7312_vm14 = vcmask 519168  }
 0x785   : > { %v7156_v29 = vpop.permute.xlu1 %7155  ;;  %7215 = vmatprep.mubr.bf16.mxu1 %v11135_v15 }
 0x786   : > { %8399 = vmatpush3.bf16.msra.mxu0 %v7152_v27  ;;  %v7163_v43 = vsel %vm11174_vm13, %v7154_v12, %v7156_v29 }
 0x787   : > { %7186 = vmatpush1.bf16.msra.mxu1 %v7161_v56  ;;  %8400 = vmatprep.subr.bf16.mxu0 %v8792_v0  ;;  %v7175_v11 = vsel %vm6068_vm11, %v7163_v43, 0 }
 0x788   : > { %v7158_v9 = vpop.permute.xlu0 %7157 }
 0x789   : > { %v7164_v18 = vsel %vm11175_vm2, %v7156_v29, %v7158_v9  ;;  %v7181_v47 = vsel %vm6068_vm11, %v7158_v9, 0 }
 0x78a   : > { %7836 = vmatprep.subr.msk.bf16.mxu1 %vm6068_vm11, %v7164_v18  ;;  %8401 = vmatpush3.bf16.msra.mxu0 %v7181_v47 }
 0x78b   : > { %7188 = vmatpush1.bf16.msra.mxu1 %v7175_v11 }
 0x78d   : > { %8403 = vmatmul.mubr.msk.bf16.vlgmr.msra.gmra.mrb[196].mxu0 %vm6064_vm15, %v8756_v38 }
 0x78e   : > { %7837 = vmatmul.mubr.msk.bf16.vlgmr.msra.gmra.mrb[192].mxu1 %vm6064_vm15, %v8756_v38 }
 0x796   : > { %v7278_v35 = vpop.permute.xlu1 %7277 }
 0x799   : > { %v7283_v13 = vpop.permute.xlu0 %7282 }
 0x800   : > { %v6155_v15 = vpop.f32.mrb[164].mxu0 }
 0x801   : > { %v8324_v0 = vpop.f32.mrb[165].mxu0 }
 0x802   : > { %v6158_v63 = vpop.f32.mrb[166].mxu0 }
 0x803   : > { %v8325_v10 = vpop.f32.mrb[167].mxu0 }
 0x80c   : > { %v6286_v58 = vpop.f32.mrb[168].mxu0 }
 0x80d   : > { %v6287_v14 = vadd.f32 %v6286_v58, %v6155_v15  ;;  %v8334_v3 = vpop.f32.mrb[169].mxu0 }
 0x80e   : > { %v6289_v48 = vpop.f32.mrb[170].mxu0 }
 0x80f   : > { %v6290_v39 = vadd.f32 %v6289_v48, %v6158_v63  ;;  %v8335_v40 = vpop.f32.mrb[171].mxu0 }
 0x818   : > { %v6420_v2 = vpop.f32.mrb[172].mxu0 }
 0x819   : > { %v6429_v57 = vadd.f32 %v6420_v2, %v6287_v14  ;;  %v8344_v5 = vpop.f32.mrb[173].mxu0 }
 0x81a   : > { %v6423_v19 = vpop.f32.mrb[174].mxu0 }
 0x81b   : > { %v6432_v26 = vadd.f32 %v6423_v19, %v6290_v39  ;;  %v8345_v54 = vpop.f32.mrb[175].mxu0 }
 0x824   : > { %v6560_v51 = vpop.f32.mrb[176].mxu0 }
 0x825   : > { %v6569_v59 = vadd.f32 %v6560_v51, %v6429_v57  ;;  %v8354_v61 = vpop.f32.mrb[177].mxu0 }
 0x826   : > { %v6563_v46 = vpop.f32.mrb[178].mxu0 }
 0x827   : > { %v6572_v37 = vadd.f32 %v6563_v46, %v6432_v26  ;;  %v8355_v23 = vpop.f32.mrb[179].mxu0 }
 0x830   : > { %v6700_v36 = vpop.f32.mrb[180].mxu0 }
 0x831   : > { %v6709_v24 = vadd.f32 %v6700_v36, %v6569_v59  ;;  %v8364_v30 = vpop.f32.mrb[181].mxu0 }
 0x832   : > { %v6703_v16 = vpop.f32.mrb[182].mxu0 }
 0x833   : > { %v6712_v50 = vadd.f32 %v6703_v16, %v6572_v37  ;;  %v8365_v28 = vpop.f32.mrb[183].mxu0 }
 0x83c   : > { %v6840_v49 = vpop.f32.mrb[184].mxu0 }
 0x83d   : > { %v6849_v21 = vadd.f32 %v6840_v49, %v6709_v24  ;;  %v8374_v42 = vpop.f32.mrb[185].mxu0 }
 0x83e   : > { %v6843_v8 = vpop.f32.mrb[186].mxu0 }
 0x83f   : > { %v6852_v45 = vadd.f32 %v6843_v8, %v6712_v50  ;;  %v8375_v4 = vpop.f32.mrb[187].mxu0 }
 0x848   : > { %v6980_v7 = vpop.f32.mrb[188].mxu0 }
 0x849   : > { %v6989_v31 = vadd.f32 %v6980_v7, %v6849_v21  ;;  %v8384_v62 = vpop.f32.mrb[189].mxu0 }
 0x84a   : > { %v6983_v25 = vpop.f32.mrb[190].mxu0 }
 0x84b   : > { %v6992_v17 = vadd.f32 %v6983_v25, %v6852_v45  ;;  %v8385_v32 = vpop.f32.mrb[191].mxu0 }
 0x854   : > { %v7120_v1 = vpop.f32.mrb[192].mxu0 }
 0x855   : > { %v7129_v22 = vadd.f32 %v7120_v1, %v6989_v31  ;;  %v8394_v53 = vpop.f32.mrb[193].mxu0 }
 0x856   : > { %v7123_v6 = vpop.f32.mrb[194].mxu0 }
 0x857   : > { %v7132_v33 = vadd.f32 %v7123_v6, %v6992_v17  ;;  %v8395_v55 = vpop.f32.mrb[195].mxu0 }
 0x860   : > { %v7260_v34 = vpop.f32.mrb[196].mxu0 }
 0x861   : > { %v7269_v20 = vadd.f32 %v7260_v34, %v7129_v22  ;;  %v7217_v44 = vpop.f32.mrb[192].mxu1  ;;  %v8404_v27 = vpop.f32.mrb[197].mxu0 }
 0x862   : > { %v7285_v41 = vadd.f32 %v7278_v35, %v7217_v44  ;;  %v7219_v60 = vpop.f32.mrb[193].mxu1  ;;  %v7263_v52 = vpop.f32.mrb[198].mxu0 }
 0x863   : > { %v7287_v12 = vadd.f32 %v7278_v35, %v7269_v20  ;;  %v7286_v29 = vadd.f32 %v7278_v35, %v7219_v60  ;;  %v7272_v56 = vadd.f32 %v7263_v52, %v7132_v33  ;;  %v7221_v43 = vpop.f32.mrb[194].mxu1  ;;  %v8405_v9 = vpop.f32.mrb[199].mxu0 }
 0x864   : > { %v7288_v18 = vadd.f32 %v7283_v13, %v7221_v43  ;;  %v7223_v47 = vpop.f32.mrb[195].mxu1 }
 0x865   : > { %v7863_v38 = vpack.c.bf16 %v7287_v12, %v7287_v12  ;;  %v7862_v11 = vpack.c.bf16 %v7286_v29, %v7285_v41  ;;  %v7290_v15 = vadd.f32 %v7283_v13, %v7272_v56  ;;  %v7289_v0 = vadd.f32 %v7283_v13, %v7223_v47 }
 0x867   : > { %7313 = vst.msk [vmem:[%s305_s25 + $0x8] sm:$0xf] %vm7312_vm14, %v7863_v38  ;;  %7311 = vst [vmem:[%s305_s25] sm:$0xff] %v7862_v11  ;;  %v7865_v63 = vpack.c.bf16 %v7290_v15, %v7290_v15  ;;  %v7864_v10 = vpack.c.bf16 %v7289_v0, %v7288_v18 }
 0x869   : > { %7315 = vst.msk [vmem:[%s305_s25 + $0x14] sm:$0xf] %vm7312_vm14, %v7865_v63  ;;  %7314 = vst [vmem:[%s305_s25 + $0xc] sm:$0xff] %v7864_v10 }
 0x86a PF: > { %s18_s27 = sadd.s32 1, %s8763_s27  }
 0x86b   : > { %p15_p4 = scmp.ge.s32.totalorder %s18_s27, 4  }
 0x86d   :  { %17 = sbr.rel (!%p15_p4) target bundleno = 1 (0x1), region = 122 }

</bundles_post_ra>
